<compile_context>
chip_gen: v7x
topology: tpu7x:2x2x1
jax: 0.10.0
libtpu: 0.0.40
codegen_flags: <defaults>
</compile_context>

<pallas_src>
import math

import jax
import jax.numpy as jnp
from jax import lax
from jax.experimental import pallas as pl
from jax.experimental.pallas import tpu as pltpu


def _round_up(x, m):
    return ((x + m - 1) // m) * m


# --------------------------------------------------------------------------- #
# Pallas kernel: merged bidirectional LSTM over the char axis, emit [h_f | h_b]
# --------------------------------------------------------------------------- #
def _bilstm_kernel(idsf_ref, idsb_ref, tf_ref, tb_ref, wh_ref, o_ref, xc_ref):
    # idsf_ref : (C, TN, 1) int32   char ids, time-major
    # idsb_ref : (C, TN, 1) int32   char ids, time-reversed (for the bwd dir)
    # tf_ref   : (Vp, 8H)           per-id gate pre-activations, fwd cols only
    # tb_ref   : (Vp, 8H)           per-id gate pre-activations, bwd cols only
    # wh_ref   : (2H, 8H)           block-structured recurrent weights
    # o_ref    : (TN, OUT)          OUT = 2H rounded up to 128 lanes
    # xc_ref   : (C, TN, 8H) f32    scratch: per-step gate pre-activations
    C, TN, _ = idsf_ref.shape
    Vp, G8 = tf_ref.shape
    H2 = wh_ref.shape[0]          # 2H (both directions)
    H = H2 // 2
    G4 = 4 * H                    # first half of the 8H gate lanes (= [i | f])
    feed_dt = tf_ref.dtype

    # ---- 1) embedding + input projection + bias fused: one-hot gather-matmul
    # fwd gate columns come from ids[t], bwd gate columns from ids[C-1-t], so
    # the scratch is already time-aligned and the per-step add is just xc[t].
    iota = lax.broadcasted_iota(jnp.int32, (C, TN, Vp), 2)
    one = jnp.ones((), feed_dt)
    zero = jnp.zeros((), feed_dt)
    ohf = jnp.where(iota == idsf_ref[...], one, zero).reshape(C * TN, Vp)
    ohb = jnp.where(iota == idsb_ref[...], one, zero).reshape(C * TN, Vp)
    xc = jnp.dot(ohf, tf_ref[...], preferred_element_type=jnp.float32)
    xc = xc + jnp.dot(ohb, tb_ref[...], preferred_element_type=jnp.float32)
    xc_ref[...] = xc.reshape(C, TN, G8)

    wh = wh_ref[...]

    def step(t, carry):
        h, c = carry                                   # (TN, 2H) f32 each
        # Single fused recurrent matmul per step: (TN, 2H) @ (2H, 8H).
        rec = jnp.dot(h.astype(wh.dtype), wh,
                      preferred_element_type=jnp.float32)
        gates = rec + xc_ref[t]                        # (TN, 8H) f32
        # Gate layout: [ i_f i_b | f_f f_b | o_f o_b | g_f g_b ].
        # sigmoid on the lane-aligned first 4H (= i|f), sigmoid on o, tanh on g.
        sif = jax.nn.sigmoid(gates[:, :G4])            # (TN, 4H)
        o = jax.nn.sigmoid(gates[:, G4:G4 + H2])       # (TN, 2H)
        g = jnp.tanh(gates[:, G4 + H2:])               # (TN, 2H)
        c = sif[:, H2:] * c + sif[:, :H2] * g          # f*c + i*g
        h = o * jnp.tanh(c)
        return (h, c)

    z = jnp.zeros((TN, H2), jnp.float32)
    h, _ = lax.fori_loop(0, C, step, (z, z), unroll=True)

    # ---- 2) lane-dense output store (pad 2H up to OUT lanes) ----------------
    out_lanes = o_ref.shape[1]
    if out_lanes > H2:
        h = jnp.concatenate(
            [h, jnp.zeros((TN, out_lanes - H2), jnp.float32)], axis=1)
    o_ref[...] = h


# --------------------------------------------------------------------------- #
# Wrapper
# --------------------------------------------------------------------------- #
def char_encoder_forward(char_ids, params, *, tn=128, use_bf16=True):
    """char_ids: (B, W, C) int32.  Returns (B, W, 2*H) float32."""
    emb = params["emb"]                                # (V, E)
    V = emb.shape[0]
    H = params["whf"].shape[0]
    B, W, C = char_ids.shape
    N = B * W

    tn_eff = min(tn, _round_up(N, 8))
    n_pad = _round_up(N, tn_eff)

    ids = char_ids.reshape(N, C).astype(jnp.int32)
    if n_pad != N:
        ids = jnp.pad(ids, ((0, n_pad - N), (0, 0)))   # padded rows use id 0
    ids_t = ids.T                                      # (C, n_pad) time-major
    ids_f = ids_t[:, :, None]                          # (C, n_pad, 1)
    ids_b = ids_t[::-1][:, :, None]                    # time-reversed

    feed_dt = jnp.bfloat16 if use_bf16 else jnp.float32

    def split_gates(w):   # torch gate order i, f, g, o (each H columns)
        return w[:, 0:H], w[:, H:2 * H], w[:, 2 * H:3 * H], w[:, 3 * H:4 * H]

    # Merged, dir-minor, sigmoid-first gate layout:
    #   [ i_f i_b | f_f f_b | o_f o_b | g_f g_b ]   (8H columns)
    i_f, f_f, g_f, o_f = split_gates(params["wif"])
    i_b, f_b, g_b, o_b = split_gates(params["wib"])
    wi = jnp.concatenate([i_f, i_b, f_f, f_b, o_f, o_b, g_f, g_b], axis=1)

    bi_f, bf_f, bg_f, bo_f = split_gates(params["bf"])
    bi_b, bf_b, bg_b, bo_b = split_gates(params["bb"])
    bias = jnp.concatenate([bi_f, bi_b, bf_f, bf_b, bo_f, bo_b, bg_f, bg_b],
                           axis=1)                     # (1, 8H)

    ih_f, fh_f, gh_f, oh_f = split_gates(params["whf"])
    ih_b, fh_b, gh_b, oh_b = split_gates(params["whb"])
    zH = jnp.zeros((H, H), jnp.float32)
    wh = jnp.concatenate([
        jnp.concatenate([ih_f, zH, fh_f, zH, oh_f, zH, gh_f, zH], axis=1),
        jnp.concatenate([zH, ih_b, zH, fh_b, zH, oh_b, zH, gh_b], axis=1),
    ], axis=0).astype(feed_dt)                         # (2H, 8H) block-struct

    # Fold embedding + bias into a per-char-id gate-pre-activation table, and
    # split into fwd-only / bwd-only column-masked tables so the kernel can
    # gather fwd columns with ids[t] and bwd columns with ids[C-1-t].
    table = jnp.dot(emb, wi, precision=jax.lax.Precision.HIGHEST) + bias  # (V, 8H)
    col = jnp.arange(8 * H)
    fwd_cols = ((col // H) % 2) == 0
    table_f = jnp.where(fwd_cols[None, :], table, 0.0)
    table_b = jnp.where(fwd_cols[None, :], 0.0, table)

    Vp = _round_up(V, 128)                             # lane-pad the one-hot K
    if Vp != V:
        table_f = jnp.pad(table_f, ((0, Vp - V), (0, 0)))
        table_b = jnp.pad(table_b, ((0, Vp - V), (0, 0)))
    table_f = table_f.astype(feed_dt)
    table_b = table_b.astype(feed_dt)

    out_lanes = _round_up(2 * H, 128)                  # lane-dense output slab
    grid = (n_pad // tn_eff,)

    out = pl.pallas_call(
        _bilstm_kernel,
        out_shape=jax.ShapeDtypeStruct((n_pad, out_lanes), jnp.float32),
        grid=grid,
        in_specs=[
            pl.BlockSpec((C, tn_eff, 1), lambda i: (0, i, 0)),   # ids (fwd)
            pl.BlockSpec((C, tn_eff, 1), lambda i: (0, i, 0)),   # ids (rev)
            pl.BlockSpec((Vp, 8 * H), lambda i: (0, 0)),         # table fwd
            pl.BlockSpec((Vp, 8 * H), lambda i: (0, 0)),         # table bwd
            pl.BlockSpec((2 * H, 8 * H), lambda i: (0, 0)),      # wh
        ],
        out_specs=pl.BlockSpec((tn_eff, out_lanes), lambda i: (i, 0)),
        scratch_shapes=[
            pltpu.VMEM((C, tn_eff, 8 * H), jnp.float32),         # xc scratch
        ],
        compiler_params=pltpu.CompilerParams(
            dimension_semantics=("parallel",),
            vmem_limit_bytes=32 * 1024 * 1024,
        ),
    )(ids_f, ids_b, table_f, table_b, wh)

    return out[:N, :2 * H].reshape(B, W, 2 * H)


# --------------------------------------------------------------------------- #
# Pure-JAX reference (mirrors torch.nn.LSTM bidirectional, batch_first)
# --------------------------------------------------------------------------- #
def _reference_forward(char_ids, params):
    emb_table = params["emb"]
    H = params["whf"].shape[0]
    B, W, C = char_ids.shape
    x = jnp.take(emb_table, char_ids.reshape(B * W, C), axis=0)  # (N, C, E)

    def run_dir(x_seq, wih, whh, b):
        def cell(carry, x_t):
            h, c = carry
            gates = x_t @ wih + h @ whh + b
            i = jax.nn.sigmoid(gates[:, 0 * H:1 * H])
            f = jax.nn.sigmoid(gates[:, 1 * H:2 * H])
            g = jnp.tanh(gates[:, 2 * H:3 * H])
            o = jax.nn.sigmoid(gates[:, 3 * H:4 * H])
            c = f * c + i * g
            h = o * jnp.tanh(c)
            return (h, c), None

        z = jnp.zeros((x_seq.shape[1], H), jnp.float32)
        (h, _), _ = lax.scan(cell, (z, z), x_seq)
        return h

    x_t = jnp.transpose(x, (1, 0, 2))  # (C, N, E)
    hf = run_dir(x_t, params["wif"], params["whf"], params["bf"])
    hb = run_dir(x_t[::-1], params["wib"], params["whb"], params["bb"])
    return jnp.concatenate([hf, hb], axis=1).reshape(B, W, 2 * H)


# --------------------------------------------------------------------------- #
# Deterministic parameter init (shapes from CHAREncoder.create defaults,
# scaled-down vocab; embedding_size == hidden_dim == 32 as in the defaults)
# --------------------------------------------------------------------------- #
def make_params(key, num_char_dict, E, H):
    ks = jax.random.split(key, 9)
    k = 1.0 / math.sqrt(H)
    u = lambda kk, shape: jax.random.uniform(kk, shape, jnp.float32, -k, k)

    emb = jax.random.normal(ks[0], (num_char_dict, E), jnp.float32)

    # torch weight layout is (4H, E)/(4H, H); stored transposed for x @ W.
    wif = u(ks[1], (4 * H, E)).T
    whf = u(ks[2], (4 * H, H)).T
    bf = (u(ks[3], (4 * H,)) + u(ks[4], (4 * H,))).reshape(1, 4 * H)

    wib = u(ks[5], (4 * H, E)).T
    whb = u(ks[6], (4 * H, H)).T
    bb = (u(ks[7], (4 * H,)) + u(ks[8], (4 * H,))).reshape(1, 4 * H)

    # TODO(synk): bert_weights / bert_gamma (mode='weighted') are unused in forward.
    return {"emb": emb, "wif": wif, "whf": whf, "bf": bf,
            "wib": wib, "whb": whb, "bb": bb}


if __name__ == "__main__":
    B, W, C = 2, 8, 16           # batch, words per sentence, chars per word
    E = H = 32                   # embedding_size == hidden_dim (module default)
    num_char_dict = 64

    key = jax.random.PRNGKey(0)
    pkey, dkey = jax.random.split(key)
    params = make_params(pkey, num_char_dict, E, H)
    char_ids = jax.random.randint(dkey, (B, W, C), 0, num_char_dict, jnp.int32)

    ref = jax.block_until_ready(_reference_forward(char_ids, params))

    # f32 MXU feed: semantic check (tolerance covers matmul-precision-mode and
    # reassociation differences between the fused and per-step formulations).
    out_f32 = jax.block_until_ready(
        char_encoder_forward(char_ids, params, use_bf16=False))
    assert out_f32.shape == (B, W, 2 * H)
    assert jnp.allclose(out_f32, ref, atol=1e-2, rtol=0.0), "f32 kernel mismatch"

    # bf16 MXU feed (recommended perf config): f32 carries keep drift small.
    out_bf16 = jax.block_until_ready(
        char_encoder_forward(char_ids, params, use_bf16=True))
    assert out_bf16.shape == (B, W, 2 * H)
    assert jnp.allclose(out_bf16, ref, atol=5e-2, rtol=0.0), "bf16 kernel mismatch"

    print("KERNEL_OK")
</pallas_src>

<mosaic_0001>
module attributes {stable_mosaic.version = 11 : i64} {
  func.func @_bilstm_kernel(%arg0: i32, %arg1: memref<16x16x1xi32, #tpu.memory_space<vmem>>, %arg2: memref<16x16x1xi32, #tpu.memory_space<vmem>>, %arg3: memref<128x256xf32, #tpu.memory_space<vmem>>, %arg4: memref<128x256xf32, #tpu.memory_space<vmem>>, %arg5: memref<64x256xf32, #tpu.memory_space<vmem>>, %arg6: memref<16x128xf32, #tpu.memory_space<vmem>>, %arg7: memref<16x16x256xf32, #tpu.memory_space<vmem>>) attributes {dimension_semantics = [#tpu.dimension_semantics<parallel>], iteration_bounds = array<i64: 1>, scalar_prefetch = 0 : i64, scratch_operands = 1 : i64, tpu.core_type = #tpu.core_type<tc>, window_params = [{transform_indices = @transform_0, window_bounds = array<i64: 16, 16, 1>}, {transform_indices = @transform_1, window_bounds = array<i64: 16, 16, 1>}, {pipeline_mode = #tpu.pipeline_mode<synchronous>, transform_indices = @transform_2, window_bounds = array<i64: 128, 256>}, {pipeline_mode = #tpu.pipeline_mode<synchronous>, transform_indices = @transform_3, window_bounds = array<i64: 128, 256>}, {pipeline_mode = #tpu.pipeline_mode<synchronous>, transform_indices = @transform_4, window_bounds = array<i64: 64, 256>}, {transform_indices = @transform_5, window_bounds = array<i64: 16, 128>}]} {
    %0 = tpu.iota {dimensions = array<i32: 2>} : vector<16x16x128xi32>
    %c0 = arith.constant 0 : index
    %c0_0 = arith.constant 0 : index
    %c0_1 = arith.constant 0 : index
    %1 = vector.load %arg1[%c0, %c0_0, %c0_1] : memref<16x16x1xi32, #tpu.memory_space<vmem>>, vector<16x16x1xi32>
    %2 = vector.broadcast %1 : vector<16x16x1xi32> to vector<16x16x128xi32>
    %3 = arith.cmpi eq, %0, %2 : vector<16x16x128xi32>
    %cst = arith.constant 1.000000e+00 : f32
    %cst_2 = arith.constant 0.000000e+00 : f32
    %4 = vector.broadcast %cst : f32 to vector<16x16x128xf32>
    %5 = vector.broadcast %cst_2 : f32 to vector<16x16x128xf32>
    %6 = arith.select %3, %4, %5 : vector<16x16x128xi1>, vector<16x16x128xf32>
    %7 = vector.shape_cast %6 : vector<16x16x128xf32> to vector<256x128xf32>
    %c0_3 = arith.constant 0 : index
    %c0_4 = arith.constant 0 : index
    %c0_5 = arith.constant 0 : index
    %8 = vector.load %arg2[%c0_3, %c0_4, %c0_5] : memref<16x16x1xi32, #tpu.memory_space<vmem>>, vector<16x16x1xi32>
    %9 = vector.broadcast %8 : vector<16x16x1xi32> to vector<16x16x128xi32>
    %10 = arith.cmpi eq, %0, %9 : vector<16x16x128xi32>
    %cst_6 = arith.constant 1.000000e+00 : f32
    %cst_7 = arith.constant 0.000000e+00 : f32
    %11 = vector.broadcast %cst_6 : f32 to vector<16x16x128xf32>
    %12 = vector.broadcast %cst_7 : f32 to vector<16x16x128xf32>
    %13 = arith.select %10, %11, %12 : vector<16x16x128xi1>, vector<16x16x128xf32>
    %14 = vector.shape_cast %13 : vector<16x16x128xf32> to vector<256x128xf32>
    %c0_8 = arith.constant 0 : index
    %c0_9 = arith.constant 0 : index
    %15 = vector.load %arg3[%c0_8, %c0_9] : memref<128x256xf32, #tpu.memory_space<vmem>>, vector<128x256xf32>
    %cst_10 = arith.constant dense<0.000000e+00> : vector<256x256xf32>
    %16 = tpu.matmul %7, %15, %cst_10 {dimension_numbers = #tpu.dot_dimension_numbers<[1], [0], [0], [1], [0, 0, 1, 1], [], []>} : vector<256x128xf32>, vector<128x256xf32>, vector<256x256xf32> -> vector<256x256xf32>
    %c0_11 = arith.constant 0 : index
    %c0_12 = arith.constant 0 : index
    %17 = vector.load %arg4[%c0_11, %c0_12] : memref<128x256xf32, #tpu.memory_space<vmem>>, vector<128x256xf32>
    %cst_13 = arith.constant dense<0.000000e+00> : vector<256x256xf32>
    %18 = tpu.matmul %14, %17, %cst_13 {dimension_numbers = #tpu.dot_dimension_numbers<[1], [0], [0], [1], [0, 0, 1, 1], [], []>} : vector<256x128xf32>, vector<128x256xf32>, vector<256x256xf32> -> vector<256x256xf32>
    %19 = arith.addf %16, %18 : vector<256x256xf32>
    %20 = vector.shape_cast %19 : vector<256x256xf32> to vector<16x16x256xf32>
    %c0_14 = arith.constant 0 : index
    %c0_15 = arith.constant 0 : index
    %c0_16 = arith.constant 0 : index
    %21 = vector.load %arg7[%c0_14, %c0_15, %c0_16] : memref<16x16x256xf32, #tpu.memory_space<vmem>>, vector<16x16x256xf32>
    tpu.vector_store %arg7[%c0_14, %c0_15, %c0_16], %20 {strides = array<i32>} : memref<16x16x256xf32, #tpu.memory_space<vmem>>, vector<16x16x256xf32>,
    %c0_17 = arith.constant 0 : index
    %c0_18 = arith.constant 0 : index
    %22 = vector.load %arg5[%c0_17, %c0_18] : memref<64x256xf32, #tpu.memory_space<vmem>>, vector<64x256xf32>
    %cst_19 = arith.constant 0.000000e+00 : f32
    %23 = vector.broadcast %cst_19 : f32 to vector<16x64xf32>
    %c0_i32 = arith.constant 0 : i32
    %cst_20 = arith.constant dense<0.000000e+00> : vector<16x256xf32>
    %24 = tpu.matmul %23, %22, %cst_20 {dimension_numbers = #tpu.dot_dimension_numbers<[1], [0], [0], [1], [0, 0, 1, 1], [], []>} : vector<16x64xf32>, vector<64x256xf32>, vector<16x256xf32> -> vector<16x256xf32>
    %25 = arith.index_cast %c0_i32 : i32 to index
    %c0_21 = arith.constant 0 : index
    %c0_22 = arith.constant 0 : index
    %26 = vector.load %arg7[%25, %c0_21, %c0_22] : memref<16x16x256xf32, #tpu.memory_space<vmem>>, vector<1x16x256xf32>
    %27 = vector.shape_cast %26 : vector<1x16x256xf32> to vector<16x256xf32>
    %28 = arith.addf %24, %27 : vector<16x256xf32>
    %29 = vector.extract_strided_slice %28 {offsets = [0, 0], sizes = [16, 128], strides = [1, 1]} : vector<16x256xf32> to vector<16x128xf32>
    %30 = arith.negf %29 : vector<16x128xf32>
    %31 = math.exp %30 : vector<16x128xf32>
    %cst_23 = arith.constant 1.000000e+00 : f32
    %32 = vector.broadcast %cst_23 : f32 to vector<16x128xf32>
    %33 = arith.addf %32, %31 : vector<16x128xf32>
    %34 = arith.divf %32, %33 : vector<16x128xf32>
    %35 = vector.extract_strided_slice %28 {offsets = [0, 128], sizes = [16, 64], strides = [1, 1]} : vector<16x256xf32> to vector<16x64xf32>
    %36 = arith.negf %35 : vector<16x64xf32>
    %37 = math.exp %36 : vector<16x64xf32>
    %cst_24 = arith.constant 1.000000e+00 : f32
    %38 = vector.broadcast %cst_24 : f32 to vector<16x64xf32>
    %39 = arith.addf %38, %37 : vector<16x64xf32>
    %40 = arith.divf %38, %39 : vector<16x64xf32>
    %41 = vector.extract_strided_slice %28 {offsets = [0, 192], sizes = [16, 64], strides = [1, 1]} : vector<16x256xf32> to vector<16x64xf32>
    %42 = math.tanh %41 : vector<16x64xf32>
    %43 = vector.extract_strided_slice %34 {offsets = [0, 64], sizes = [16, 64], strides = [1, 1]} : vector<16x128xf32> to vector<16x64xf32>
    %44 = arith.mulf %43, %23 : vector<16x64xf32>
    %45 = vector.extract_strided_slice %34 {offsets = [0, 0], sizes = [16, 64], strides = [1, 1]} : vector<16x128xf32> to vector<16x64xf32>
    %46 = arith.mulf %45, %42 : vector<16x64xf32>
    %47 = arith.addf %44, %46 : vector<16x64xf32>
    %48 = math.tanh %47 : vector<16x64xf32>
    %49 = arith.mulf %40, %48 : vector<16x64xf32>
    %c1_i32 = arith.constant 1 : i32
    %cst_25 = arith.constant dense<0.000000e+00> : vector<16x256xf32>
    %50 = tpu.matmul %49, %22, %cst_25 {dimension_numbers = #tpu.dot_dimension_numbers<[1], [0], [0], [1], [0, 0, 1, 1], [], []>} : vector<16x64xf32>, vector<64x256xf32>, vector<16x256xf32> -> vector<16x256xf32>
    %51 = arith.index_cast %c1_i32 : i32 to index
    %c0_26 = arith.constant 0 : index
    %c0_27 = arith.constant 0 : index
    %52 = vector.load %arg7[%51, %c0_26, %c0_27] : memref<16x16x256xf32, #tpu.memory_space<vmem>>, vector<1x16x256xf32>
    %53 = vector.shape_cast %52 : vector<1x16x256xf32> to vector<16x256xf32>
    %54 = arith.addf %50, %53 : vector<16x256xf32>
    %55 = vector.extract_strided_slice %54 {offsets = [0, 0], sizes = [16, 128], strides = [1, 1]} : vector<16x256xf32> to vector<16x128xf32>
    %56 = arith.negf %55 : vector<16x128xf32>
    %57 = math.exp %56 : vector<16x128xf32>
    %cst_28 = arith.constant 1.000000e+00 : f32
    %58 = vector.broadcast %cst_28 : f32 to vector<16x128xf32>
    %59 = arith.addf %58, %57 : vector<16x128xf32>
    %60 = arith.divf %58, %59 : vector<16x128xf32>
    %61 = vector.extract_strided_slice %54 {offsets = [0, 128], sizes = [16, 64], strides = [1, 1]} : vector<16x256xf32> to vector<16x64xf32>
    %62 = arith.negf %61 : vector<16x64xf32>
    %63 = math.exp %62 : vector<16x64xf32>
    %cst_29 = arith.constant 1.000000e+00 : f32
    %64 = vector.broadcast %cst_29 : f32 to vector<16x64xf32>
    %65 = arith.addf %64, %63 : vector<16x64xf32>
    %66 = arith.divf %64, %65 : vector<16x64xf32>
    %67 = vector.extract_strided_slice %54 {offsets = [0, 192], sizes = [16, 64], strides = [1, 1]} : vector<16x256xf32> to vector<16x64xf32>
    %68 = math.tanh %67 : vector<16x64xf32>
    %69 = vector.extract_strided_slice %60 {offsets = [0, 64], sizes = [16, 64], strides = [1, 1]} : vector<16x128xf32> to vector<16x64xf32>
    %70 = arith.mulf %69, %47 : vector<16x64xf32>
    %71 = vector.extract_strided_slice %60 {offsets = [0, 0], sizes = [16, 64], strides = [1, 1]} : vector<16x128xf32> to vector<16x64xf32>
    %72 = arith.mulf %71, %68 : vector<16x64xf32>
    %73 = arith.addf %70, %72 : vector<16x64xf32>
    %74 = math.tanh %73 : vector<16x64xf32>
    %75 = arith.mulf %66, %74 : vector<16x64xf32>
    %c2_i32 = arith.constant 2 : i32
    %cst_30 = arith.constant dense<0.000000e+00> : vector<16x256xf32>
    %76 = tpu.matmul %75, %22, %cst_30 {dimension_numbers = #tpu.dot_dimension_numbers<[1], [0], [0], [1], [0, 0, 1, 1], [], []>} : vector<16x64xf32>, vector<64x256xf32>, vector<16x256xf32> -> vector<16x256xf32>
    %77 = arith.index_cast %c2_i32 : i32 to index
    %c0_31 = arith.constant 0 : index
    %c0_32 = arith.constant 0 : index
    %78 = vector.load %arg7[%77, %c0_31, %c0_32] : memref<16x16x256xf32, #tpu.memory_space<vmem>>, vector<1x16x256xf32>
    %79 = vector.shape_cast %78 : vector<1x16x256xf32> to vector<16x256xf32>
    %80 = arith.addf %76, %79 : vector<16x256xf32>
    %81 = vector.extract_strided_slice %80 {offsets = [0, 0], sizes = [16, 128], strides = [1, 1]} : vector<16x256xf32> to vector<16x128xf32>
    %82 = arith.negf %81 : vector<16x128xf32>
    %83 = math.exp %82 : vector<16x128xf32>
    %cst_33 = arith.constant 1.000000e+00 : f32
    %84 = vector.broadcast %cst_33 : f32 to vector<16x128xf32>
    %85 = arith.addf %84, %83 : vector<16x128xf32>
    %86 = arith.divf %84, %85 : vector<16x128xf32>
    %87 = vector.extract_strided_slice %80 {offsets = [0, 128], sizes = [16, 64], strides = [1, 1]} : vector<16x256xf32> to vector<16x64xf32>
    %88 = arith.negf %87 : vector<16x64xf32>
    %89 = math.exp %88 : vector<16x64xf32>
    %cst_34 = arith.constant 1.000000e+00 : f32
    %90 = vector.broadcast %cst_34 : f32 to vector<16x64xf32>
    %91 = arith.addf %90, %89 : vector<16x64xf32>
    %92 = arith.divf %90, %91 : vector<16x64xf32>
    %93 = vector.extract_strided_slice %80 {offsets = [0, 192], sizes = [16, 64], strides = [1, 1]} : vector<16x256xf32> to vector<16x64xf32>
    %94 = math.tanh %93 : vector<16x64xf32>
    %95 = vector.extract_strided_slice %86 {offsets = [0, 64], sizes = [16, 64], strides = [1, 1]} : vector<16x128xf32> to vector<16x64xf32>
    %96 = arith.mulf %95, %73 : vector<16x64xf32>
    %97 = vector.extract_strided_slice %86 {offsets = [0, 0], sizes = [16, 64], strides = [1, 1]} : vector<16x128xf32> to vector<16x64xf32>
    %98 = arith.mulf %97, %94 : vector<16x64xf32>
    %99 = arith.addf %96, %98 : vector<16x64xf32>
    %100 = math.tanh %99 : vector<16x64xf32>
    %101 = arith.mulf %92, %100 : vector<16x64xf32>
    %c3_i32 = arith.constant 3 : i32
    %cst_35 = arith.constant dense<0.000000e+00> : vector<16x256xf32>
    %102 = tpu.matmul %101, %22, %cst_35 {dimension_numbers = #tpu.dot_dimension_numbers<[1], [0], [0], [1], [0, 0, 1, 1], [], []>} : vector<16x64xf32>, vector<64x256xf32>, vector<16x256xf32> -> vector<16x256xf32>
    %103 = arith.index_cast %c3_i32 : i32 to index
    %c0_36 = arith.constant 0 : index
    %c0_37 = arith.constant 0 : index
    %104 = vector.load %arg7[%103, %c0_36, %c0_37] : memref<16x16x256xf32, #tpu.memory_space<vmem>>, vector<1x16x256xf32>
    %105 = vector.shape_cast %104 : vector<1x16x256xf32> to vector<16x256xf32>
    %106 = arith.addf %102, %105 : vector<16x256xf32>
    %107 = vector.extract_strided_slice %106 {offsets = [0, 0], sizes = [16, 128], strides = [1, 1]} : vector<16x256xf32> to vector<16x128xf32>
    %108 = arith.negf %107 : vector<16x128xf32>
    %109 = math.exp %108 : vector<16x128xf32>
    %cst_38 = arith.constant 1.000000e+00 : f32
    %110 = vector.broadcast %cst_38 : f32 to vector<16x128xf32>
    %111 = arith.addf %110, %109 : vector<16x128xf32>
    %112 = arith.divf %110, %111 : vector<16x128xf32>
    %113 = vector.extract_strided_slice %106 {offsets = [0, 128], sizes = [16, 64], strides = [1, 1]} : vector<16x256xf32> to vector<16x64xf32>
    %114 = arith.negf %113 : vector<16x64xf32>
    %115 = math.exp %114 : vector<16x64xf32>
    %cst_39 = arith.constant 1.000000e+00 : f32
    %116 = vector.broadcast %cst_39 : f32 to vector<16x64xf32>
    %117 = arith.addf %116, %115 : vector<16x64xf32>
    %118 = arith.divf %116, %117 : vector<16x64xf32>
    %119 = vector.extract_strided_slice %106 {offsets = [0, 192], sizes = [16, 64], strides = [1, 1]} : vector<16x256xf32> to vector<16x64xf32>
    %120 = math.tanh %119 : vector<16x64xf32>
    %121 = vector.extract_strided_slice %112 {offsets = [0, 64], sizes = [16, 64], strides = [1, 1]} : vector<16x128xf32> to vector<16x64xf32>
    %122 = arith.mulf %121, %99 : vector<16x64xf32>
    %123 = vector.extract_strided_slice %112 {offsets = [0, 0], sizes = [16, 64], strides = [1, 1]} : vector<16x128xf32> to vector<16x64xf32>
    %124 = arith.mulf %123, %120 : vector<16x64xf32>
    %125 = arith.addf %122, %124 : vector<16x64xf32>
    %126 = math.tanh %125 : vector<16x64xf32>
    %127 = arith.mulf %118, %126 : vector<16x64xf32>
    %c4_i32 = arith.constant 4 : i32
    %cst_40 = arith.constant dense<0.000000e+00> : vector<16x256xf32>
    %128 = tpu.matmul %127, %22, %cst_40 {dimension_numbers = #tpu.dot_dimension_numbers<[1], [0], [0], [1], [0, 0, 1, 1], [], []>} : vector<16x64xf32>, vector<64x256xf32>, vector<16x256xf32> -> vector<16x256xf32>
    %129 = arith.index_cast %c4_i32 : i32 to index
    %c0_41 = arith.constant 0 : index
    %c0_42 = arith.constant 0 : index
    %130 = vector.load %arg7[%129, %c0_41, %c0_42] : memref<16x16x256xf32, #tpu.memory_space<vmem>>, vector<1x16x256xf32>
    %131 = vector.shape_cast %130 : vector<1x16x256xf32> to vector<16x256xf32>
    %132 = arith.addf %128, %131 : vector<16x256xf32>
    %133 = vector.extract_strided_slice %132 {offsets = [0, 0], sizes = [16, 128], strides = [1, 1]} : vector<16x256xf32> to vector<16x128xf32>
    %134 = arith.negf %133 : vector<16x128xf32>
    %135 = math.exp %134 : vector<16x128xf32>
    %cst_43 = arith.constant 1.000000e+00 : f32
    %136 = vector.broadcast %cst_43 : f32 to vector<16x128xf32>
    %137 = arith.addf %136, %135 : vector<16x128xf32>
    %138 = arith.divf %136, %137 : vector<16x128xf32>
    %139 = vector.extract_strided_slice %132 {offsets = [0, 128], sizes = [16, 64], strides = [1, 1]} : vector<16x256xf32> to vector<16x64xf32>
    %140 = arith.negf %139 : vector<16x64xf32>
    %141 = math.exp %140 : vector<16x64xf32>
    %cst_44 = arith.constant 1.000000e+00 : f32
    %142 = vector.broadcast %cst_44 : f32 to vector<16x64xf32>
    %143 = arith.addf %142, %141 : vector<16x64xf32>
    %144 = arith.divf %142, %143 : vector<16x64xf32>
    %145 = vector.extract_strided_slice %132 {offsets = [0, 192], sizes = [16, 64], strides = [1, 1]} : vector<16x256xf32> to vector<16x64xf32>
    %146 = math.tanh %145 : vector<16x64xf32>
    %147 = vector.extract_strided_slice %138 {offsets = [0, 64], sizes = [16, 64], strides = [1, 1]} : vector<16x128xf32> to vector<16x64xf32>
    %148 = arith.mulf %147, %125 : vector<16x64xf32>
    %149 = vector.extract_strided_slice %138 {offsets = [0, 0], sizes = [16, 64], strides = [1, 1]} : vector<16x128xf32> to vector<16x64xf32>
    %150 = arith.mulf %149, %146 : vector<16x64xf32>
    %151 = arith.addf %148, %150 : vector<16x64xf32>
    %152 = math.tanh %151 : vector<16x64xf32>
    %153 = arith.mulf %144, %152 : vector<16x64xf32>
    %c5_i32 = arith.constant 5 : i32
    %cst_45 = arith.constant dense<0.000000e+00> : vector<16x256xf32>
    %154 = tpu.matmul %153, %22, %cst_45 {dimension_numbers = #tpu.dot_dimension_numbers<[1], [0], [0], [1], [0, 0, 1, 1], [], []>} : vector<16x64xf32>, vector<64x256xf32>, vector<16x256xf32> -> vector<16x256xf32>
    %155 = arith.index_cast %c5_i32 : i32 to index
    %c0_46 = arith.constant 0 : index
    %c0_47 = arith.constant 0 : index
    %156 = vector.load %arg7[%155, %c0_46, %c0_47] : memref<16x16x256xf32, #tpu.memory_space<vmem>>, vector<1x16x256xf32>
    %157 = vector.shape_cast %156 : vector<1x16x256xf32> to vector<16x256xf32>
    %158 = arith.addf %154, %157 : vector<16x256xf32>
    %159 = vector.extract_strided_slice %158 {offsets = [0, 0], sizes = [16, 128], strides = [1, 1]} : vector<16x256xf32> to vector<16x128xf32>
    %160 = arith.negf %159 : vector<16x128xf32>
    %161 = math.exp %160 : vector<16x128xf32>
    %cst_48 = arith.constant 1.000000e+00 : f32
    %162 = vector.broadcast %cst_48 : f32 to vector<16x128xf32>
    %163 = arith.addf %162, %161 : vector<16x128xf32>
    %164 = arith.divf %162, %163 : vector<16x128xf32>
    %165 = vector.extract_strided_slice %158 {offsets = [0, 128], sizes = [16, 64], strides = [1, 1]} : vector<16x256xf32> to vector<16x64xf32>
    %166 = arith.negf %165 : vector<16x64xf32>
    %167 = math.exp %166 : vector<16x64xf32>
    %cst_49 = arith.constant 1.000000e+00 : f32
    %168 = vector.broadcast %cst_49 : f32 to vector<16x64xf32>
    %169 = arith.addf %168, %167 : vector<16x64xf32>
    %170 = arith.divf %168, %169 : vector<16x64xf32>
    %171 = vector.extract_strided_slice %158 {offsets = [0, 192], sizes = [16, 64], strides = [1, 1]} : vector<16x256xf32> to vector<16x64xf32>
    %172 = math.tanh %171 : vector<16x64xf32>
    %173 = vector.extract_strided_slice %164 {offsets = [0, 64], sizes = [16, 64], strides = [1, 1]} : vector<16x128xf32> to vector<16x64xf32>
    %174 = arith.mulf %173, %151 : vector<16x64xf32>
    %175 = vector.extract_strided_slice %164 {offsets = [0, 0], sizes = [16, 64], strides = [1, 1]} : vector<16x128xf32> to vector<16x64xf32>
    %176 = arith.mulf %175, %172 : vector<16x64xf32>
    %177 = arith.addf %174, %176 : vector<16x64xf32>
    %178 = math.tanh %177 : vector<16x64xf32>
    %179 = arith.mulf %170, %178 : vector<16x64xf32>
    %c6_i32 = arith.constant 6 : i32
    %cst_50 = arith.constant dense<0.000000e+00> : vector<16x256xf32>
    %180 = tpu.matmul %179, %22, %cst_50 {dimension_numbers = #tpu.dot_dimension_numbers<[1], [0], [0], [1], [0, 0, 1, 1], [], []>} : vector<16x64xf32>, vector<64x256xf32>, vector<16x256xf32> -> vector<16x256xf32>
    %181 = arith.index_cast %c6_i32 : i32 to index
    %c0_51 = arith.constant 0 : index
    %c0_52 = arith.constant 0 : index
    %182 = vector.load %arg7[%181, %c0_51, %c0_52] : memref<16x16x256xf32, #tpu.memory_space<vmem>>, vector<1x16x256xf32>
    %183 = vector.shape_cast %182 : vector<1x16x256xf32> to vector<16x256xf32>
    %184 = arith.addf %180, %183 : vector<16x256xf32>
    %185 = vector.extract_strided_slice %184 {offsets = [0, 0], sizes = [16, 128], strides = [1, 1]} : vector<16x256xf32> to vector<16x128xf32>
    %186 = arith.negf %185 : vector<16x128xf32>
    %187 = math.exp %186 : vector<16x128xf32>
    %cst_53 = arith.constant 1.000000e+00 : f32
    %188 = vector.broadcast %cst_53 : f32 to vector<16x128xf32>
    %189 = arith.addf %188, %187 : vector<16x128xf32>
    %190 = arith.divf %188, %189 : vector<16x128xf32>
    %191 = vector.extract_strided_slice %184 {offsets = [0, 128], sizes = [16, 64], strides = [1, 1]} : vector<16x256xf32> to vector<16x64xf32>
    %192 = arith.negf %191 : vector<16x64xf32>
    %193 = math.exp %192 : vector<16x64xf32>
    %cst_54 = arith.constant 1.000000e+00 : f32
    %194 = vector.broadcast %cst_54 : f32 to vector<16x64xf32>
    %195 = arith.addf %194, %193 : vector<16x64xf32>
    %196 = arith.divf %194, %195 : vector<16x64xf32>
    %197 = vector.extract_strided_slice %184 {offsets = [0, 192], sizes = [16, 64], strides = [1, 1]} : vector<16x256xf32> to vector<16x64xf32>
    %198 = math.tanh %197 : vector<16x64xf32>
    %199 = vector.extract_strided_slice %190 {offsets = [0, 64], sizes = [16, 64], strides = [1, 1]} : vector<16x128xf32> to vector<16x64xf32>
    %200 = arith.mulf %199, %177 : vector<16x64xf32>
    %201 = vector.extract_strided_slice %190 {offsets = [0, 0], sizes = [16, 64], strides = [1, 1]} : vector<16x128xf32> to vector<16x64xf32>
    %202 = arith.mulf %201, %198 : vector<16x64xf32>
    %203 = arith.addf %200, %202 : vector<16x64xf32>
    %204 = math.tanh %203 : vector<16x64xf32>
    %205 = arith.mulf %196, %204 : vector<16x64xf32>
    %c7_i32 = arith.constant 7 : i32
    %cst_55 = arith.constant dense<0.000000e+00> : vector<16x256xf32>
    %206 = tpu.matmul %205, %22, %cst_55 {dimension_numbers = #tpu.dot_dimension_numbers<[1], [0], [0], [1], [0, 0, 1, 1], [], []>} : vector<16x64xf32>, vector<64x256xf32>, vector<16x256xf32> -> vector<16x256xf32>
    %207 = arith.index_cast %c7_i32 : i32 to index
    %c0_56 = arith.constant 0 : index
    %c0_57 = arith.constant 0 : index
    %208 = vector.load %arg7[%207, %c0_56, %c0_57] : memref<16x16x256xf32, #tpu.memory_space<vmem>>, vector<1x16x256xf32>
    %209 = vector.shape_cast %208 : vector<1x16x256xf32> to vector<16x256xf32>
    %210 = arith.addf %206, %209 : vector<16x256xf32>
    %211 = vector.extract_strided_slice %210 {offsets = [0, 0], sizes = [16, 128], strides = [1, 1]} : vector<16x256xf32> to vector<16x128xf32>
    %212 = arith.negf %211 : vector<16x128xf32>
    %213 = math.exp %212 : vector<16x128xf32>
    %cst_58 = arith.constant 1.000000e+00 : f32
    %214 = vector.broadcast %cst_58 : f32 to vector<16x128xf32>
    %215 = arith.addf %214, %213 : vector<16x128xf32>
    %216 = arith.divf %214, %215 : vector<16x128xf32>
    %217 = vector.extract_strided_slice %210 {offsets = [0, 128], sizes = [16, 64], strides = [1, 1]} : vector<16x256xf32> to vector<16x64xf32>
    %218 = arith.negf %217 : vector<16x64xf32>
    %219 = math.exp %218 : vector<16x64xf32>
    %cst_59 = arith.constant 1.000000e+00 : f32
    %220 = vector.broadcast %cst_59 : f32 to vector<16x64xf32>
    %221 = arith.addf %220, %219 : vector<16x64xf32>
    %222 = arith.divf %220, %221 : vector<16x64xf32>
    %223 = vector.extract_strided_slice %210 {offsets = [0, 192], sizes = [16, 64], strides = [1, 1]} : vector<16x256xf32> to vector<16x64xf32>
    %224 = math.tanh %223 : vector<16x64xf32>
    %225 = vector.extract_strided_slice %216 {offsets = [0, 64], sizes = [16, 64], strides = [1, 1]} : vector<16x128xf32> to vector<16x64xf32>
    %226 = arith.mulf %225, %203 : vector<16x64xf32>
    %227 = vector.extract_strided_slice %216 {offsets = [0, 0], sizes = [16, 64], strides = [1, 1]} : vector<16x128xf32> to vector<16x64xf32>
    %228 = arith.mulf %227, %224 : vector<16x64xf32>
    %229 = arith.addf %226, %228 : vector<16x64xf32>
    %230 = math.tanh %229 : vector<16x64xf32>
    %231 = arith.mulf %222, %230 : vector<16x64xf32>
    %c8_i32 = arith.constant 8 : i32
    %cst_60 = arith.constant dense<0.000000e+00> : vector<16x256xf32>
    %232 = tpu.matmul %231, %22, %cst_60 {dimension_numbers = #tpu.dot_dimension_numbers<[1], [0], [0], [1], [0, 0, 1, 1], [], []>} : vector<16x64xf32>, vector<64x256xf32>, vector<16x256xf32> -> vector<16x256xf32>
    %233 = arith.index_cast %c8_i32 : i32 to index
    %c0_61 = arith.constant 0 : index
    %c0_62 = arith.constant 0 : index
    %234 = vector.load %arg7[%233, %c0_61, %c0_62] : memref<16x16x256xf32, #tpu.memory_space<vmem>>, vector<1x16x256xf32>
    %235 = vector.shape_cast %234 : vector<1x16x256xf32> to vector<16x256xf32>
    %236 = arith.addf %232, %235 : vector<16x256xf32>
    %237 = vector.extract_strided_slice %236 {offsets = [0, 0], sizes = [16, 128], strides = [1, 1]} : vector<16x256xf32> to vector<16x128xf32>
    %238 = arith.negf %237 : vector<16x128xf32>
    %239 = math.exp %238 : vector<16x128xf32>
    %cst_63 = arith.constant 1.000000e+00 : f32
    %240 = vector.broadcast %cst_63 : f32 to vector<16x128xf32>
    %241 = arith.addf %240, %239 : vector<16x128xf32>
    %242 = arith.divf %240, %241 : vector<16x128xf32>
    %243 = vector.extract_strided_slice %236 {offsets = [0, 128], sizes = [16, 64], strides = [1, 1]} : vector<16x256xf32> to vector<16x64xf32>
    %244 = arith.negf %243 : vector<16x64xf32>
    %245 = math.exp %244 : vector<16x64xf32>
    %cst_64 = arith.constant 1.000000e+00 : f32
    %246 = vector.broadcast %cst_64 : f32 to vector<16x64xf32>
    %247 = arith.addf %246, %245 : vector<16x64xf32>
    %248 = arith.divf %246, %247 : vector<16x64xf32>
    %249 = vector.extract_strided_slice %236 {offsets = [0, 192], sizes = [16, 64], strides = [1, 1]} : vector<16x256xf32> to vector<16x64xf32>
    %250 = math.tanh %249 : vector<16x64xf32>
    %251 = vector.extract_strided_slice %242 {offsets = [0, 64], sizes = [16, 64], strides = [1, 1]} : vector<16x128xf32> to vector<16x64xf32>
    %252 = arith.mulf %251, %229 : vector<16x64xf32>
    %253 = vector.extract_strided_slice %242 {offsets = [0, 0], sizes = [16, 64], strides = [1, 1]} : vector<16x128xf32> to vector<16x64xf32>
    %254 = arith.mulf %253, %250 : vector<16x64xf32>
    %255 = arith.addf %252, %254 : vector<16x64xf32>
    %256 = math.tanh %255 : vector<16x64xf32>
    %257 = arith.mulf %248, %256 : vector<16x64xf32>
    %c9_i32 = arith.constant 9 : i32
    %cst_65 = arith.constant dense<0.000000e+00> : vector<16x256xf32>
    %258 = tpu.matmul %257, %22, %cst_65 {dimension_numbers = #tpu.dot_dimension_numbers<[1], [0], [0], [1], [0, 0, 1, 1], [], []>} : vector<16x64xf32>, vector<64x256xf32>, vector<16x256xf32> -> vector<16x256xf32>
    %259 = arith.index_cast %c9_i32 : i32 to index
    %c0_66 = arith.constant 0 : index
    %c0_67 = arith.constant 0 : index
    %260 = vector.load %arg7[%259, %c0_66, %c0_67] : memref<16x16x256xf32, #tpu.memory_space<vmem>>, vector<1x16x256xf32>
    %261 = vector.shape_cast %260 : vector<1x16x256xf32> to vector<16x256xf32>
    %262 = arith.addf %258, %261 : vector<16x256xf32>
    %263 = vector.extract_strided_slice %262 {offsets = [0, 0], sizes = [16, 128], strides = [1, 1]} : vector<16x256xf32> to vector<16x128xf32>
    %264 = arith.negf %263 : vector<16x128xf32>
    %265 = math.exp %264 : vector<16x128xf32>
    %cst_68 = arith.constant 1.000000e+00 : f32
    %266 = vector.broadcast %cst_68 : f32 to vector<16x128xf32>
    %267 = arith.addf %266, %265 : vector<16x128xf32>
    %268 = arith.divf %266, %267 : vector<16x128xf32>
    %269 = vector.extract_strided_slice %262 {offsets = [0, 128], sizes = [16, 64], strides = [1, 1]} : vector<16x256xf32> to vector<16x64xf32>
    %270 = arith.negf %269 : vector<16x64xf32>
    %271 = math.exp %270 : vector<16x64xf32>
    %cst_69 = arith.constant 1.000000e+00 : f32
    %272 = vector.broadcast %cst_69 : f32 to vector<16x64xf32>
    %273 = arith.addf %272, %271 : vector<16x64xf32>
    %274 = arith.divf %272, %273 : vector<16x64xf32>
    %275 = vector.extract_strided_slice %262 {offsets = [0, 192], sizes = [16, 64], strides = [1, 1]} : vector<16x256xf32> to vector<16x64xf32>
    %276 = math.tanh %275 : vector<16x64xf32>
    %277 = vector.extract_strided_slice %268 {offsets = [0, 64], sizes = [16, 64], strides = [1, 1]} : vector<16x128xf32> to vector<16x64xf32>
    %278 = arith.mulf %277, %255 : vector<16x64xf32>
    %279 = vector.extract_strided_slice %268 {offsets = [0, 0], sizes = [16, 64], strides = [1, 1]} : vector<16x128xf32> to vector<16x64xf32>
    %280 = arith.mulf %279, %276 : vector<16x64xf32>
    %281 = arith.addf %278, %280 : vector<16x64xf32>
    %282 = math.tanh %281 : vector<16x64xf32>
    %283 = arith.mulf %274, %282 : vector<16x64xf32>
    %c10_i32 = arith.constant 10 : i32
    %cst_70 = arith.constant dense<0.000000e+00> : vector<16x256xf32>
    %284 = tpu.matmul %283, %22, %cst_70 {dimension_numbers = #tpu.dot_dimension_numbers<[1], [0], [0], [1], [0, 0, 1, 1], [], []>} : vector<16x64xf32>, vector<64x256xf32>, vector<16x256xf32> -> vector<16x256xf32>
    %285 = arith.index_cast %c10_i32 : i32 to index
    %c0_71 = arith.constant 0 : index
    %c0_72 = arith.constant 0 : index
    %286 = vector.load %arg7[%285, %c0_71, %c0_72] : memref<16x16x256xf32, #tpu.memory_space<vmem>>, vector<1x16x256xf32>
    %287 = vector.shape_cast %286 : vector<1x16x256xf32> to vector<16x256xf32>
    %288 = arith.addf %284, %287 : vector<16x256xf32>
    %289 = vector.extract_strided_slice %288 {offsets = [0, 0], sizes = [16, 128], strides = [1, 1]} : vector<16x256xf32> to vector<16x128xf32>
    %290 = arith.negf %289 : vector<16x128xf32>
    %291 = math.exp %290 : vector<16x128xf32>
    %cst_73 = arith.constant 1.000000e+00 : f32
    %292 = vector.broadcast %cst_73 : f32 to vector<16x128xf32>
    %293 = arith.addf %292, %291 : vector<16x128xf32>
    %294 = arith.divf %292, %293 : vector<16x128xf32>
    %295 = vector.extract_strided_slice %288 {offsets = [0, 128], sizes = [16, 64], strides = [1, 1]} : vector<16x256xf32> to vector<16x64xf32>
    %296 = arith.negf %295 : vector<16x64xf32>
    %297 = math.exp %296 : vector<16x64xf32>
    %cst_74 = arith.constant 1.000000e+00 : f32
    %298 = vector.broadcast %cst_74 : f32 to vector<16x64xf32>
    %299 = arith.addf %298, %297 : vector<16x64xf32>
    %300 = arith.divf %298, %299 : vector<16x64xf32>
    %301 = vector.extract_strided_slice %288 {offsets = [0, 192], sizes = [16, 64], strides = [1, 1]} : vector<16x256xf32> to vector<16x64xf32>
    %302 = math.tanh %301 : vector<16x64xf32>
    %303 = vector.extract_strided_slice %294 {offsets = [0, 64], sizes = [16, 64], strides = [1, 1]} : vector<16x128xf32> to vector<16x64xf32>
    %304 = arith.mulf %303, %281 : vector<16x64xf32>
    %305 = vector.extract_strided_slice %294 {offsets = [0, 0], sizes = [16, 64], strides = [1, 1]} : vector<16x128xf32> to vector<16x64xf32>
    %306 = arith.mulf %305, %302 : vector<16x64xf32>
    %307 = arith.addf %304, %306 : vector<16x64xf32>
    %308 = math.tanh %307 : vector<16x64xf32>
    %309 = arith.mulf %300, %308 : vector<16x64xf32>
    %c11_i32 = arith.constant 11 : i32
    %cst_75 = arith.constant dense<0.000000e+00> : vector<16x256xf32>
    %310 = tpu.matmul %309, %22, %cst_75 {dimension_numbers = #tpu.dot_dimension_numbers<[1], [0], [0], [1], [0, 0, 1, 1], [], []>} : vector<16x64xf32>, vector<64x256xf32>, vector<16x256xf32> -> vector<16x256xf32>
    %311 = arith.index_cast %c11_i32 : i32 to index
    %c0_76 = arith.constant 0 : index
    %c0_77 = arith.constant 0 : index
    %312 = vector.load %arg7[%311, %c0_76, %c0_77] : memref<16x16x256xf32, #tpu.memory_space<vmem>>, vector<1x16x256xf32>
    %313 = vector.shape_cast %312 : vector<1x16x256xf32> to vector<16x256xf32>
    %314 = arith.addf %310, %313 : vector<16x256xf32>
    %315 = vector.extract_strided_slice %314 {offsets = [0, 0], sizes = [16, 128], strides = [1, 1]} : vector<16x256xf32> to vector<16x128xf32>
    %316 = arith.negf %315 : vector<16x128xf32>
    %317 = math.exp %316 : vector<16x128xf32>
    %cst_78 = arith.constant 1.000000e+00 : f32
    %318 = vector.broadcast %cst_78 : f32 to vector<16x128xf32>
    %319 = arith.addf %318, %317 : vector<16x128xf32>
    %320 = arith.divf %318, %319 : vector<16x128xf32>
    %321 = vector.extract_strided_slice %314 {offsets = [0, 128], sizes = [16, 64], strides = [1, 1]} : vector<16x256xf32> to vector<16x64xf32>
    %322 = arith.negf %321 : vector<16x64xf32>
    %323 = math.exp %322 : vector<16x64xf32>
    %cst_79 = arith.constant 1.000000e+00 : f32
    %324 = vector.broadcast %cst_79 : f32 to vector<16x64xf32>
    %325 = arith.addf %324, %323 : vector<16x64xf32>
    %326 = arith.divf %324, %325 : vector<16x64xf32>
    %327 = vector.extract_strided_slice %314 {offsets = [0, 192], sizes = [16, 64], strides = [1, 1]} : vector<16x256xf32> to vector<16x64xf32>
    %328 = math.tanh %327 : vector<16x64xf32>
    %329 = vector.extract_strided_slice %320 {offsets = [0, 64], sizes = [16, 64], strides = [1, 1]} : vector<16x128xf32> to vector<16x64xf32>
    %330 = arith.mulf %329, %307 : vector<16x64xf32>
    %331 = vector.extract_strided_slice %320 {offsets = [0, 0], sizes = [16, 64], strides = [1, 1]} : vector<16x128xf32> to vector<16x64xf32>
    %332 = arith.mulf %331, %328 : vector<16x64xf32>
    %333 = arith.addf %330, %332 : vector<16x64xf32>
    %334 = math.tanh %333 : vector<16x64xf32>
    %335 = arith.mulf %326, %334 : vector<16x64xf32>
    %c12_i32 = arith.constant 12 : i32
    %cst_80 = arith.constant dense<0.000000e+00> : vector<16x256xf32>
    %336 = tpu.matmul %335, %22, %cst_80 {dimension_numbers = #tpu.dot_dimension_numbers<[1], [0], [0], [1], [0, 0, 1, 1], [], []>} : vector<16x64xf32>, vector<64x256xf32>, vector<16x256xf32> -> vector<16x256xf32>
    %337 = arith.index_cast %c12_i32 : i32 to index
    %c0_81 = arith.constant 0 : index
    %c0_82 = arith.constant 0 : index
    %338 = vector.load %arg7[%337, %c0_81, %c0_82] : memref<16x16x256xf32, #tpu.memory_space<vmem>>, vector<1x16x256xf32>
    %339 = vector.shape_cast %338 : vector<1x16x256xf32> to vector<16x256xf32>
    %340 = arith.addf %336, %339 : vector<16x256xf32>
    %341 = vector.extract_strided_slice %340 {offsets = [0, 0], sizes = [16, 128], strides = [1, 1]} : vector<16x256xf32> to vector<16x128xf32>
    %342 = arith.negf %341 : vector<16x128xf32>
    %343 = math.exp %342 : vector<16x128xf32>
    %cst_83 = arith.constant 1.000000e+00 : f32
    %344 = vector.broadcast %cst_83 : f32 to vector<16x128xf32>
    %345 = arith.addf %344, %343 : vector<16x128xf32>
    %346 = arith.divf %344, %345 : vector<16x128xf32>
    %347 = vector.extract_strided_slice %340 {offsets = [0, 128], sizes = [16, 64], strides = [1, 1]} : vector<16x256xf32> to vector<16x64xf32>
    %348 = arith.negf %347 : vector<16x64xf32>
    %349 = math.exp %348 : vector<16x64xf32>
    %cst_84 = arith.constant 1.000000e+00 : f32
    %350 = vector.broadcast %cst_84 : f32 to vector<16x64xf32>
    %351 = arith.addf %350, %349 : vector<16x64xf32>
    %352 = arith.divf %350, %351 : vector<16x64xf32>
    %353 = vector.extract_strided_slice %340 {offsets = [0, 192], sizes = [16, 64], strides = [1, 1]} : vector<16x256xf32> to vector<16x64xf32>
    %354 = math.tanh %353 : vector<16x64xf32>
    %355 = vector.extract_strided_slice %346 {offsets = [0, 64], sizes = [16, 64], strides = [1, 1]} : vector<16x128xf32> to vector<16x64xf32>
    %356 = arith.mulf %355, %333 : vector<16x64xf32>
    %357 = vector.extract_strided_slice %346 {offsets = [0, 0], sizes = [16, 64], strides = [1, 1]} : vector<16x128xf32> to vector<16x64xf32>
    %358 = arith.mulf %357, %354 : vector<16x64xf32>
    %359 = arith.addf %356, %358 : vector<16x64xf32>
    %360 = math.tanh %359 : vector<16x64xf32>
    %361 = arith.mulf %352, %360 : vector<16x64xf32>
    %c13_i32 = arith.constant 13 : i32
    %cst_85 = arith.constant dense<0.000000e+00> : vector<16x256xf32>
    %362 = tpu.matmul %361, %22, %cst_85 {dimension_numbers = #tpu.dot_dimension_numbers<[1], [0], [0], [1], [0, 0, 1, 1], [], []>} : vector<16x64xf32>, vector<64x256xf32>, vector<16x256xf32> -> vector<16x256xf32>
    %363 = arith.index_cast %c13_i32 : i32 to index
    %c0_86 = arith.constant 0 : index
    %c0_87 = arith.constant 0 : index
    %364 = vector.load %arg7[%363, %c0_86, %c0_87] : memref<16x16x256xf32, #tpu.memory_space<vmem>>, vector<1x16x256xf32>
    %365 = vector.shape_cast %364 : vector<1x16x256xf32> to vector<16x256xf32>
    %366 = arith.addf %362, %365 : vector<16x256xf32>
    %367 = vector.extract_strided_slice %366 {offsets = [0, 0], sizes = [16, 128], strides = [1, 1]} : vector<16x256xf32> to vector<16x128xf32>
    %368 = arith.negf %367 : vector<16x128xf32>
    %369 = math.exp %368 : vector<16x128xf32>
    %cst_88 = arith.constant 1.000000e+00 : f32
    %370 = vector.broadcast %cst_88 : f32 to vector<16x128xf32>
    %371 = arith.addf %370, %369 : vector<16x128xf32>
    %372 = arith.divf %370, %371 : vector<16x128xf32>
    %373 = vector.extract_strided_slice %366 {offsets = [0, 128], sizes = [16, 64], strides = [1, 1]} : vector<16x256xf32> to vector<16x64xf32>
    %374 = arith.negf %373 : vector<16x64xf32>
    %375 = math.exp %374 : vector<16x64xf32>
    %cst_89 = arith.constant 1.000000e+00 : f32
    %376 = vector.broadcast %cst_89 : f32 to vector<16x64xf32>
    %377 = arith.addf %376, %375 : vector<16x64xf32>
    %378 = arith.divf %376, %377 : vector<16x64xf32>
    %379 = vector.extract_strided_slice %366 {offsets = [0, 192], sizes = [16, 64], strides = [1, 1]} : vector<16x256xf32> to vector<16x64xf32>
    %380 = math.tanh %379 : vector<16x64xf32>
    %381 = vector.extract_strided_slice %372 {offsets = [0, 64], sizes = [16, 64], strides = [1, 1]} : vector<16x128xf32> to vector<16x64xf32>
    %382 = arith.mulf %381, %359 : vector<16x64xf32>
    %383 = vector.extract_strided_slice %372 {offsets = [0, 0], sizes = [16, 64], strides = [1, 1]} : vector<16x128xf32> to vector<16x64xf32>
    %384 = arith.mulf %383, %380 : vector<16x64xf32>
    %385 = arith.addf %382, %384 : vector<16x64xf32>
    %386 = math.tanh %385 : vector<16x64xf32>
    %387 = arith.mulf %378, %386 : vector<16x64xf32>
    %c14_i32 = arith.constant 14 : i32
    %cst_90 = arith.constant dense<0.000000e+00> : vector<16x256xf32>
    %388 = tpu.matmul %387, %22, %cst_90 {dimension_numbers = #tpu.dot_dimension_numbers<[1], [0], [0], [1], [0, 0, 1, 1], [], []>} : vector<16x64xf32>, vector<64x256xf32>, vector<16x256xf32> -> vector<16x256xf32>
    %389 = arith.index_cast %c14_i32 : i32 to index
    %c0_91 = arith.constant 0 : index
    %c0_92 = arith.constant 0 : index
    %390 = vector.load %arg7[%389, %c0_91, %c0_92] : memref<16x16x256xf32, #tpu.memory_space<vmem>>, vector<1x16x256xf32>
    %391 = vector.shape_cast %390 : vector<1x16x256xf32> to vector<16x256xf32>
    %392 = arith.addf %388, %391 : vector<16x256xf32>
    %393 = vector.extract_strided_slice %392 {offsets = [0, 0], sizes = [16, 128], strides = [1, 1]} : vector<16x256xf32> to vector<16x128xf32>
    %394 = arith.negf %393 : vector<16x128xf32>
    %395 = math.exp %394 : vector<16x128xf32>
    %cst_93 = arith.constant 1.000000e+00 : f32
    %396 = vector.broadcast %cst_93 : f32 to vector<16x128xf32>
    %397 = arith.addf %396, %395 : vector<16x128xf32>
    %398 = arith.divf %396, %397 : vector<16x128xf32>
    %399 = vector.extract_strided_slice %392 {offsets = [0, 128], sizes = [16, 64], strides = [1, 1]} : vector<16x256xf32> to vector<16x64xf32>
    %400 = arith.negf %399 : vector<16x64xf32>
    %401 = math.exp %400 : vector<16x64xf32>
    %cst_94 = arith.constant 1.000000e+00 : f32
    %402 = vector.broadcast %cst_94 : f32 to vector<16x64xf32>
    %403 = arith.addf %402, %401 : vector<16x64xf32>
    %404 = arith.divf %402, %403 : vector<16x64xf32>
    %405 = vector.extract_strided_slice %392 {offsets = [0, 192], sizes = [16, 64], strides = [1, 1]} : vector<16x256xf32> to vector<16x64xf32>
    %406 = math.tanh %405 : vector<16x64xf32>
    %407 = vector.extract_strided_slice %398 {offsets = [0, 64], sizes = [16, 64], strides = [1, 1]} : vector<16x128xf32> to vector<16x64xf32>
    %408 = arith.mulf %407, %385 : vector<16x64xf32>
    %409 = vector.extract_strided_slice %398 {offsets = [0, 0], sizes = [16, 64], strides = [1, 1]} : vector<16x128xf32> to vector<16x64xf32>
    %410 = arith.mulf %409, %406 : vector<16x64xf32>
    %411 = arith.addf %408, %410 : vector<16x64xf32>
    %412 = math.tanh %411 : vector<16x64xf32>
    %413 = arith.mulf %404, %412 : vector<16x64xf32>
    %c15_i32 = arith.constant 15 : i32
    %cst_95 = arith.constant dense<0.000000e+00> : vector<16x256xf32>
    %414 = tpu.matmul %413, %22, %cst_95 {dimension_numbers = #tpu.dot_dimension_numbers<[1], [0], [0], [1], [0, 0, 1, 1], [], []>} : vector<16x64xf32>, vector<64x256xf32>, vector<16x256xf32> -> vector<16x256xf32>
    %415 = arith.index_cast %c15_i32 : i32 to index
    %c0_96 = arith.constant 0 : index
    %c0_97 = arith.constant 0 : index
    %416 = vector.load %arg7[%415, %c0_96, %c0_97] : memref<16x16x256xf32, #tpu.memory_space<vmem>>, vector<1x16x256xf32>
    %417 = vector.shape_cast %416 : vector<1x16x256xf32> to vector<16x256xf32>
    %418 = arith.addf %414, %417 : vector<16x256xf32>
    %419 = vector.extract_strided_slice %418 {offsets = [0, 0], sizes = [16, 128], strides = [1, 1]} : vector<16x256xf32> to vector<16x128xf32>
    %420 = arith.negf %419 : vector<16x128xf32>
    %421 = math.exp %420 : vector<16x128xf32>
    %cst_98 = arith.constant 1.000000e+00 : f32
    %422 = vector.broadcast %cst_98 : f32 to vector<16x128xf32>
    %423 = arith.addf %422, %421 : vector<16x128xf32>
    %424 = arith.divf %422, %423 : vector<16x128xf32>
    %425 = vector.extract_strided_slice %418 {offsets = [0, 128], sizes = [16, 64], strides = [1, 1]} : vector<16x256xf32> to vector<16x64xf32>
    %426 = arith.negf %425 : vector<16x64xf32>
    %427 = math.exp %426 : vector<16x64xf32>
    %cst_99 = arith.constant 1.000000e+00 : f32
    %428 = vector.broadcast %cst_99 : f32 to vector<16x64xf32>
    %429 = arith.addf %428, %427 : vector<16x64xf32>
    %430 = arith.divf %428, %429 : vector<16x64xf32>
    %431 = vector.extract_strided_slice %418 {offsets = [0, 192], sizes = [16, 64], strides = [1, 1]} : vector<16x256xf32> to vector<16x64xf32>
    %432 = math.tanh %431 : vector<16x64xf32>
    %433 = vector.extract_strided_slice %424 {offsets = [0, 64], sizes = [16, 64], strides = [1, 1]} : vector<16x128xf32> to vector<16x64xf32>
    %434 = arith.mulf %433, %411 : vector<16x64xf32>
    %435 = vector.extract_strided_slice %424 {offsets = [0, 0], sizes = [16, 64], strides = [1, 1]} : vector<16x128xf32> to vector<16x64xf32>
    %436 = arith.mulf %435, %432 : vector<16x64xf32>
    %437 = arith.addf %434, %436 : vector<16x64xf32>
    %438 = math.tanh %437 : vector<16x64xf32>
    %439 = arith.mulf %430, %438 : vector<16x64xf32>
    %c16_i32 = arith.constant 16 : i32
    %cst_100 = arith.constant 0.000000e+00 : f32
    %440 = vector.broadcast %cst_100 : f32 to vector<16x64xf32>
    %441 = tpu.concatenate %439, %440 in 1 : vector<16x64xf32>, vector<16x64xf32> -> vector<16x128xf32>
    %c0_101 = arith.constant 0 : index
    %c0_102 = arith.constant 0 : index
    %442 = vector.load %arg6[%c0_101, %c0_102] : memref<16x128xf32, #tpu.memory_space<vmem>>, vector<16x128xf32>
    tpu.vector_store %arg6[%c0_101, %c0_102], %441 {strides = array<i32>} : memref<16x128xf32, #tpu.memory_space<vmem>>, vector<16x128xf32>,
    return
  }
  func.func @transform_0(%arg0: i32) -> (i32, i32, i32) {
    %c0_i32 = arith.constant 0 : i32
    %c0_i32_0 = arith.constant 0 : i32
    %c0_i32_1 = arith.constant 0 : i32
    return %c0_i32, %arg0, %c0_i32_0 : i32, i32, i32
  }
  func.func @transform_1(%arg0: i32) -> (i32, i32, i32) {
    %c0_i32 = arith.constant 0 : i32
    %c0_i32_0 = arith.constant 0 : i32
    %c0_i32_1 = arith.constant 0 : i32
    return %c0_i32, %arg0, %c0_i32_0 : i32, i32, i32
  }
  func.func @transform_2(%arg0: i32) -> (i32, i32) {
    %c0_i32 = arith.constant 0 : i32
    %c0_i32_0 = arith.constant 0 : i32
    %c0_i32_1 = arith.constant 0 : i32
    return %c0_i32, %c0_i32_0 : i32, i32
  }
  func.func @transform_3(%arg0: i32) -> (i32, i32) {
    %c0_i32 = arith.constant 0 : i32
    %c0_i32_0 = arith.constant 0 : i32
    %c0_i32_1 = arith.constant 0 : i32
    return %c0_i32, %c0_i32_0 : i32, i32
  }
  func.func @transform_4(%arg0: i32) -> (i32, i32) {
    %c0_i32 = arith.constant 0 : i32
    %c0_i32_0 = arith.constant 0 : i32
    %c0_i32_1 = arith.constant 0 : i32
    return %c0_i32, %c0_i32_0 : i32, i32
  }
  func.func @transform_5(%arg0: i32) -> (i32, i32) {
    %c0_i32 = arith.constant 0 : i32
    %c0_i32_0 = arith.constant 0 : i32
    return %arg0, %c0_i32 : i32, i32
  }
}

</mosaic_0001>

<bundles_post_ra>
// kernel: tpu_custom_call.1
= control target key start
LH: loop header
LB: loop body
LE: loop exit
PB: predicated region body
PF: predicated region fallthrough
CT: control target
= control target key end

     0   :  { %10 = vsyncpa [#allocation4], 0  ;;  %s5583_s0 = inlined_call_operand.vmem [shape: s32[16,16,1], index: 0, kind: input, shape index: {}]   ;;  %s5584_s1 = inlined_call_operand.vmem [shape: s32[16,16,1], index: 1, kind: input, shape index: {}]   ;;  %s5585_s2 = inlined_call_operand.vmem [shape: f32[128,256], index: 2, kind: input, shape index: {}]   ;;  %s5586_s3 = inlined_call_operand.vmem [shape: f32[128,256], index: 3, kind: input, shape index: {}]   ;;  %s5587_s4 = inlined_call_operand.hbm [shape: f32[64,256], index: 4, kind: input, shape index: {}]   ;;  %s5588_s5 = inlined_call_operand.hbm [shape: f32[16,128], index: 5, kind: output, shape index: {}]  }
   0x1   :  { %11 = vsyncpa [#allocation5], 0  ;;  %s4515_s18 = smov [#allocation3]   ;;  %s4467_s22 = scalar_lea.hbm %s5587_s4, 2048 }
   0x2   :  { %s25_s19 = sshll.u32 %s4515_s18, 4  ;;  %p4468_p0 = scmp.ne.s32.totalorder %s5587_s4, %s4467_s22  ;;  %s26_s19 = int_to_ptr.vmem [resolvable:$true] %s25_s19 }
   0x3   :  { %p4471_p1 = scmp.lt.u32.totalorder %s4467_s22, %s5587_s4 }
   0x5   :  { %p4473_p2 = pnand %p4471_p1, %p4468_p0 }
   0x7   :  { %4476 = shalt.err (!%p4473_p2)
}
   0x8   :  { %s4477_s27 = scalar_lea.vmem %s26_s19, 2048  ;;  %p4482_p4 = scmp.lt.s32.totalorder %s26_s19, %s26_s19 }
   0x9   :  { %p4478_p3 = scmp.ne.s32.totalorder %s26_s19, %s4477_s27  ;;  %p4483_p5 = scmp.lt.s32.totalorder %s4477_s27, %s4477_s27 }
   0xb   :  { %p4484_p6 = por %p4483_p5, %p4482_p4 }
   0xd   :  { %p4485_p7 = pnand %p4484_p6, %p4478_p3 }
   0xf   :  { %4488 = shalt.err (!%p4485_p7)
}
  0x10   :  { %s4516_s28 = smov 256   ;;  %s4517_s29 = smov 16  }
  0x11   :  { %31 = dma.hbm_to_vmem [thread:$0]  %s5587_s4, 2048, %s26_s19, [#allocation4], %s4516_s28, %s4516_s28, %s4517_s29  }
  0x12   :  { %4511 = dma.done.wait [#allocation4], 2048  }
  0x13   :  { %4512 = vsyncadd [#allocation4], 4294965248  ;;  %v4518_v0 = vmov 0   ;;  %v231_v1 = vld [vmem:[%s5584_s1 + $0x10] sm:$0xff]  ;;  %v229_v2 = vld [vmem:[%s5584_s1] sm:$0xff]  ;;  %v4519_v5 = vmov 0.0  }
  0x14   :  { %4082 = vset.pattern.permute.xlu1 %v4518_v0  ;;  %4081 = vset.pattern.permute.xlu0 %v4518_v0  ;;  %v232_v3 = vld [vmem:[%s5584_s1 + $0x18] sm:$0xff]  ;;  %v230_v4 = vld [vmem:[%s5584_s1 + $0x8] sm:$0xff]  ;;  %v233_v7 = vld [vmem:[%s5584_s1 + $0x20] sm:$0xff] }
  0x15   :  { %268 = vperm.xlu1 %4082, %v231_v1   ;;  %262 = vperm.xlu0 %4081, %v229_v2   ;;  %v234_v6 = vld [vmem:[%s5584_s1 + $0x28] sm:$0xff]  ;;  %v236_v8 = vld [vmem:[%s5584_s1 + $0x38] sm:$0xff]  ;;  %v235_v9 = vld [vmem:[%s5584_s1 + $0x30] sm:$0xff] }
  0x16   :  { %549 = vmatprep.mubr.f32.mxu1 %v4519_v5  ;;  %1151 = vmatprep.mubr.f32.mxu0 %v4519_v5  ;;  %v454_v10 = vld [vmem:[%s5586_s3 + $0x8] sm:$0xff]  ;;  %v456_v11 = vld [vmem:[%s5586_s3 + $0x18] sm:$0xff]  ;;  %v453_v14 = vld [vmem:[%s5586_s3] sm:$0xff] }
  0x17   :  { %v238_v12 = vld [vmem:[%s5584_s1 + $0x48] sm:$0xff]  ;;  %v3623_v13 = vpack.c.bf16 %v456_v11, %v454_v10  ;;  %v455_v15 = vld [vmem:[%s5586_s3 + $0x10] sm:$0xff]  ;;  %v460_v18 = vld [vmem:[%s5586_s3 + $0x38] sm:$0xff] }
  0x18   :  { %v458_v16 = vld [vmem:[%s5586_s3 + $0x28] sm:$0xff]  ;;  %v3625_v17 = vpack.c.bf16 %v455_v15, %v453_v14  ;;  %v457_v19 = vld [vmem:[%s5586_s3 + $0x20] sm:$0xff]  ;;  %v459_v20 = vld [vmem:[%s5586_s3 + $0x30] sm:$0xff] }
  0x19   :  { %271 = vperm.xlu1 %4082, %v232_v3   ;;  %265 = vperm.xlu0 %4081, %v230_v4   ;;  %v237_v21 = vld [vmem:[%s5584_s1 + $0x40] sm:$0xff]  ;;  %v3627_v22 = vpack.c.bf16 %v460_v18, %v458_v16  ;;  %v462_v23 = vld [vmem:[%s5586_s3 + $0x48] sm:$0xff]  ;;  %v464_v24 = vld [vmem:[%s5586_s3 + $0x58] sm:$0xff]  ;;  %v3629_v25 = vpack.c.bf16 %v459_v20, %v457_v19 }
  0x1a   :  { %3624 = vmatprep.subr.bf16.mxu1 %v3623_v13  ;;  %v3631_v26 = vpack.c.bf16 %v464_v24, %v462_v23  ;;  %v461_v27 = vld [vmem:[%s5586_s3 + $0x40] sm:$0xff]  ;;  %v463_v28 = vld [vmem:[%s5586_s3 + $0x50] sm:$0xff]  ;;  %v466_v29 = vld [vmem:[%s5586_s3 + $0x68] sm:$0xff] }
  0x1b   :  { %3626 = vmatpush1.bf16.msra.mxu1 %v3625_v17  ;;  %v468_v30 = vld [vmem:[%s5586_s3 + $0x78] sm:$0xff]  ;;  %v239_v32 = vld [vmem:[%s5584_s1 + $0x50] sm:$0xff]  ;;  %v3633_v33 = vpack.c.bf16 %v463_v28, %v461_v27  ;;  %v465_v35 = vld [vmem:[%s5586_s3 + $0x60] sm:$0xff] }
  0x1c   :  { %3628 = vmatprep.subr.bf16.mxu1 %v3627_v22  ;;  %v240_v31 = vld [vmem:[%s5584_s1 + $0x58] sm:$0xff]  ;;  %v3635_v34 = vpack.c.bf16 %v468_v30, %v466_v29  ;;  %v467_v36 = vld [vmem:[%s5586_s3 + $0x70] sm:$0xff]  ;;  %v470_v37 = vld [vmem:[%s5586_s3 + $0x88] sm:$0xff] }
  0x1d   :  { %277 = vperm.xlu1 %4082, %v234_v6   ;;  %274 = vperm.xlu0 %4081, %v233_v7   ;;  %v472_v38 = vld [vmem:[%s5586_s3 + $0x98] sm:$0xff]  ;;  %v242_v39 = vld [vmem:[%s5584_s1 + $0x68] sm:$0xff]  ;;  %v241_v40 = vld [vmem:[%s5584_s1 + $0x60] sm:$0xff]  ;;  %v3637_v41 = vpack.c.bf16 %v467_v36, %v465_v35 }
  0x1e   :  { %v3639_v42 = vpack.c.bf16 %v472_v38, %v470_v37  ;;  %v469_v43 = vld [vmem:[%s5586_s3 + $0x80] sm:$0xff]  ;;  %v471_v44 = vld [vmem:[%s5586_s3 + $0x90] sm:$0xff]  ;;  %v474_v45 = vld [vmem:[%s5586_s3 + $0xa8] sm:$0xff] }
  0x1f   :  { %3630 = vmatpush1.bf16.msra.mxu1 %v3629_v25  ;;  %v476_v46 = vld [vmem:[%s5586_s3 + $0xb8] sm:$0xff]  ;;  %v243_v48 = vld [vmem:[%s5584_s1 + $0x70] sm:$0xff]  ;;  %v3641_v49 = vpack.c.bf16 %v471_v44, %v469_v43  ;;  %v473_v51 = vld [vmem:[%s5586_s3 + $0xa0] sm:$0xff] }
  0x20   :  { %3632 = vmatprep.subr.bf16.mxu1 %v3631_v26  ;;  %v244_v47 = vld [vmem:[%s5584_s1 + $0x78] sm:$0xff]  ;;  %v3643_v50 = vpack.c.bf16 %v476_v46, %v474_v45  ;;  %v475_v52 = vld [vmem:[%s5586_s3 + $0xb0] sm:$0xff]  ;;  %v478_v53 = vld [vmem:[%s5586_s3 + $0xc8] sm:$0xff] }
  0x21   :  { %283 = vperm.xlu1 %4082, %v236_v8   ;;  %280 = vperm.xlu0 %4081, %v235_v9   ;;  %v480_v54 = vld [vmem:[%s5586_s3 + $0xd8] sm:$0xff]  ;;  %v246_v55 = vld [vmem:[%s5584_s1 + $0x88] sm:$0xff]  ;;  %v245_v56 = vld [vmem:[%s5584_s1 + $0x80] sm:$0xff]  ;;  %v3645_v57 = vpack.c.bf16 %v475_v52, %v473_v51 }
  0x22   :  { %v3647_v58 = vpack.c.bf16 %v480_v54, %v478_v53  ;;  %v477_v59 = vld [vmem:[%s5586_s3 + $0xc0] sm:$0xff]  ;;  %v479_v60 = vld [vmem:[%s5586_s3 + $0xd0] sm:$0xff]  ;;  %v482_v61 = vld [vmem:[%s5586_s3 + $0xe8] sm:$0xff] }
  0x23   :  { %3634 = vmatpush1.bf16.msra.mxu1 %v3633_v33  ;;  %v484_v62 = vld [vmem:[%s5586_s3 + $0xf8] sm:$0xff]  ;;  %v247_v0 = vld [vmem:[%s5584_s1 + $0x90] sm:$0xff]  ;;  %v3649_v1 = vpack.c.bf16 %v479_v60, %v477_v59  ;;  %v481_v3 = vld [vmem:[%s5586_s3 + $0xe0] sm:$0xff] }
  0x24   :  { %3636 = vmatprep.subr.bf16.mxu1 %v3635_v34  ;;  %v248_v63 = vld [vmem:[%s5584_s1 + $0x98] sm:$0xff]  ;;  %v3651_v2 = vpack.c.bf16 %v484_v62, %v482_v61  ;;  %v483_v4 = vld [vmem:[%s5586_s3 + $0xf0] sm:$0xff]  ;;  %v422_v6 = vld [vmem:[%s5585_s2 + $0x8] sm:$0xff]  ;;  %v4520_v61 = vmov 1.0  }
  0x25   :  { %289 = vperm.xlu1 %4082, %v238_v12   ;;  %286 = vperm.xlu0 %4081, %v237_v21   ;;  %v424_v7 = vld [vmem:[%s5585_s2 + $0x18] sm:$0xff]  ;;  %v250_v8 = vld [vmem:[%s5584_s1 + $0xa8] sm:$0xff]  ;;  %v249_v9 = vld [vmem:[%s5584_s1 + $0xa0] sm:$0xff]  ;;  %v3653_v10 = vpack.c.bf16 %v483_v4, %v481_v3 }
  0x26   :  { %v3655_v11 = vpack.c.bf16 %v424_v7, %v422_v6  ;;  %v252_v12 = vld [vmem:[%s5584_s1 + $0xb8] sm:$0xff]  ;;  %v251_v13 = vld [vmem:[%s5584_s1 + $0xb0] sm:$0xff]  ;;  %v254_v14 = vld [vmem:[%s5584_s1 + $0xc8] sm:$0xff] }
  0x27   :  { %3638 = vmatpush1.bf16.msra.mxu1 %v3637_v41  ;;  %v253_v15 = vld [vmem:[%s5584_s1 + $0xc0] sm:$0xff]  ;;  %v256_v16 = vld [vmem:[%s5584_s1 + $0xd8] sm:$0xff]  ;;  %v255_v17 = vld [vmem:[%s5584_s1 + $0xd0] sm:$0xff] }
  0x28   :  { %3640 = vmatprep.subr.bf16.mxu1 %v3639_v42  ;;  %v258_v18 = vld [vmem:[%s5584_s1 + $0xe8] sm:$0xff]  ;;  %v257_v19 = vld [vmem:[%s5584_s1 + $0xe0] sm:$0xff]  ;;  %v260_v20 = vld [vmem:[%s5584_s1 + $0xf8] sm:$0xff]  ;;  %v35_v42 = vlaneseq }
  0x29   :  { %295 = vperm.xlu1 %4082, %v240_v31   ;;  %292 = vperm.xlu0 %4081, %v239_v32   ;;  %v259_v21 = vld [vmem:[%s5584_s1 + $0xf0] sm:$0xff]  ;;  %v38_v22 = vld [vmem:[%s5583_s0 + $0x8] sm:$0xff]  ;;  %v37_v23 = vld [vmem:[%s5583_s0] sm:$0xff] }
  0x2a   :  { %v1064_v24 = vld [vmem:[#allocation3 + $0x8] sm:$0xff]  ;;  %v1066_v25 = vld [vmem:[#allocation3 + $0x18] sm:$0xff]  ;;  %v1063_v27 = vld [vmem:[#allocation3] sm:$0xff]  ;;  %v4801_v51 = vand.u32 127, %v35_v42 }
  0x2b   :  { %3642 = vmatpush1.bf16.msra.mxu1 %v3641_v49  ;;  %v4773_v26 = vpack.c.bf16 %v1066_v25, %v1064_v24  ;;  %v1065_v28 = vld [vmem:[#allocation3 + $0x10] sm:$0xff]  ;;  %v1068_v30 = vld [vmem:[#allocation3 + $0x28] sm:$0xff]  ;;  %v1070_v31 = vld [vmem:[#allocation3 + $0x38] sm:$0xff] }
  0x2c   :  { %3644 = vmatprep.subr.bf16.mxu1 %v3643_v50  ;;  %v4776_v29 = vpack.c.bf16 %v1065_v28, %v1063_v27  ;;  %v1067_v32 = vld [vmem:[#allocation3 + $0x20] sm:$0xff]  ;;  %v1069_v33 = vld [vmem:[#allocation3 + $0x30] sm:$0xff]  ;;  %v4779_v34 = vpack.c.bf16 %v1070_v31, %v1068_v30  ;;  %v1072_v36 = vld [vmem:[#allocation3 + $0x48] sm:$0xff] }
  0x2d   :  { %301 = vperm.xlu1 %4082, %v242_v39   ;;  %298 = vperm.xlu0 %4081, %v241_v40   ;;  %v4781_v35 = vpack.c.bf16 %v1069_v33, %v1067_v32  ;;  %v1074_v37 = vld [vmem:[#allocation3 + $0x58] sm:$0xff]  ;;  %v1071_v39 = vld [vmem:[#allocation3 + $0x40] sm:$0xff]  ;;  %v1073_v40 = vld [vmem:[#allocation3 + $0x50] sm:$0xff] }
  0x2e   :  { %3688 = vmatprep.subr.bf16.mxu0 %v4773_v26  ;;  %v4785_v38 = vpack.c.bf16 %v1074_v37, %v1072_v36  ;;  %v4787_v41 = vpack.c.bf16 %v1073_v40, %v1071_v39  ;;  %v1076_v43 = vld [vmem:[#allocation3 + $0x68] sm:$0xff]  ;;  %v1078_v44 = vld [vmem:[#allocation3 + $0x78] sm:$0xff]  ;;  %v1075_v46 = vld [vmem:[#allocation3 + $0x60] sm:$0xff] }
  0x2f   :  { %3646 = vmatpush1.bf16.msra.mxu1 %v3645_v57  ;;  %3690 = vmatpush1.bf16.msra.mxu0 %v4776_v29  ;;  %v4791_v45 = vpack.c.bf16 %v1078_v44, %v1076_v43  ;;  %v423_v49 = vld [vmem:[%s5585_s2 + $0x10] sm:$0xff]  ;;  %v426_v52 = vld [vmem:[%s5585_s2 + $0x28] sm:$0xff]  ;;  %v428_v53 = vld [vmem:[%s5585_s2 + $0x38] sm:$0xff] }
  0x30   :  { %3648 = vmatprep.subr.bf16.mxu1 %v3647_v58  ;;  %3692 = vmatprep.subr.bf16.mxu0 %v4779_v34  ;;  %v425_v57 = vld [vmem:[%s5585_s2 + $0x20] sm:$0xff]  ;;  %v427_v58 = vld [vmem:[%s5585_s2 + $0x30] sm:$0xff]  ;;  %v430_v59 = vld [vmem:[%s5585_s2 + $0x48] sm:$0xff] }
  0x31   :  { %307 = vperm.xlu1 %4082, %v244_v47   ;;  %304 = vperm.xlu0 %4081, %v243_v48   ;;  %v1077_v47 = vld [vmem:[#allocation3 + $0x70] sm:$0xff]  ;;  %v421_v48 = vld [vmem:[%s5585_s2] sm:$0xff]  ;;  %v432_v60 = vld [vmem:[%s5585_s2 + $0x58] sm:$0xff]  ;;  %v3661_v62 = vpack.c.bf16 %v427_v58, %v425_v57 }
  0x32   :  { %v4799_v50 = vpack.c.bf16 %v1077_v47, %v1075_v46  ;;  %v3657_v54 = vpack.c.bf16 %v423_v49, %v421_v48  ;;  %v434_v3 = vld [vmem:[%s5585_s2 + $0x68] sm:$0xff]  ;;  %v436_v4 = vld [vmem:[%s5585_s2 + $0x78] sm:$0xff]  ;;  %v443_v24 = vld [vmem:[%s5585_s2 + $0xb0] sm:$0xff] }
  0x33   :  { %3650 = vmatpush1.bf16.msra.mxu1 %v3649_v1  ;;  %3694 = vmatpush1.bf16.msra.mxu0 %v4781_v35  ;;  %v429_v1 = vld [vmem:[%s5585_s2 + $0x40] sm:$0xff]  ;;  %v446_v25 = vld [vmem:[%s5585_s2 + $0xc8] sm:$0xff]  ;;  %v448_v27 = vld [vmem:[%s5585_s2 + $0xd8] sm:$0xff] }
  0x34   :  { %3652 = vmatprep.subr.bf16.mxu1 %v3651_v2  ;;  %3696 = vmatprep.subr.bf16.mxu0 %v4785_v38  ;;  %v431_v2 = vld [vmem:[%s5585_s2 + $0x50] sm:$0xff]  ;;  %v3679_v31 = vpack.c.bf16 %v448_v27, %v446_v25  ;;  %v445_v32 = vld [vmem:[%s5585_s2 + $0xc0] sm:$0xff]  ;;  %v450_v36 = vld [vmem:[%s5585_s2 + $0xe8] sm:$0xff] }
  0x35   :  { %313 = vperm.xlu1 %4082, %v246_v55   ;;  %310 = vperm.xlu0 %4081, %v245_v56   ;;  %v3659_v56 = vpack.c.bf16 %v428_v53, %v426_v52  ;;  %v3665_v7 = vpack.c.bf16 %v431_v2, %v429_v1  ;;  %v447_v33 = vld [vmem:[%s5585_s2 + $0xd0] sm:$0xff]  ;;  %v452_v37 = vld [vmem:[%s5585_s2 + $0xf8] sm:$0xff]  ;;  %v449_v43 = vld [vmem:[%s5585_s2 + $0xe0] sm:$0xff] }
  0x36   :  { %v3681_v40 = vpack.c.bf16 %v447_v33, %v445_v32  ;;  %v3683_v42 = vpack.c.bf16 %v452_v37, %v450_v36  ;;  %v451_v44 = vld [vmem:[%s5585_s2 + $0xf0] sm:$0xff] }
  0x37   :  { %3654 = vmatpush1.bf16.msra.mxu1 %v3653_v10  ;;  %3698 = vmatpush1.bf16.msra.mxu0 %v4787_v41  ;;  %v435_v10 = vld [vmem:[%s5585_s2 + $0x70] sm:$0xff]  ;;  %v3685_v47 = vpack.c.bf16 %v451_v44, %v449_v43 }
  0x38   :  { %3656 = vmatprep.subr.bf16.mxu1 %v3655_v11  ;;  %3700 = vmatprep.subr.bf16.mxu0 %v4791_v45  ;;  %v438_v11 = vld [vmem:[%s5585_s2 + $0x88] sm:$0xff] }
  0x39   :  { %319 = vperm.xlu1 %4082, %v248_v63   ;;  %316 = vperm.xlu0 %4081, %v247_v0   ;;  %v3663_v0 = vpack.c.bf16 %v432_v60, %v430_v59 }
  0x3b   :  { %3702 = vmatpush1.bf16.msra.mxu0 %v4799_v50 }
  0x3c   :  { %3704 = vmatprep.subr.bf16.mxu0 %v4773_v26 }
  0x3d   :  { %325 = vperm.xlu1 %4082, %v250_v8   ;;  %322 = vperm.xlu0 %4081, %v249_v9   ;;  %v3667_v8 = vpack.c.bf16 %v436_v4, %v434_v3  ;;  %v433_v9 = vld [vmem:[%s5585_s2 + $0x60] sm:$0xff] }
  0x3e   :  { %1152 = vmatmul.mubr.f32.vlgmr.msra.gmra.mrb[0].mxu0 %v4519_v5 }
  0x3f   :  { %1157 = vmatprep.mubr.f32.mxu0 %v4519_v5  ;;  %3706 = vmatpush1.bf16.msra.mxu0 %v4776_v29 }
  0x40   :  { %3708 = vmatprep.subr.bf16.mxu0 %v4779_v34 }
  0x41   :  { %331 = vperm.xlu1 %4082, %v252_v12   ;;  %328 = vperm.xlu0 %4081, %v251_v13   ;;  %v440_v12 = vld [vmem:[%s5585_s2 + $0x98] sm:$0xff]  ;;  %v3669_v13 = vpack.c.bf16 %v435_v10, %v433_v9 }
  0x42   :  { %1158 = vmatmul.mubr.f32.gmra.mrb[2].mxu0 %v4519_v5 }
  0x43   :  { %3710 = vmatpush1.bf16.msra.mxu0 %v4781_v35  ;;  %1299 = vmatprep.mubr.f32.mxu0 %v4519_v5 }
  0x44   :  { %3712 = vmatprep.subr.bf16.mxu0 %v4785_v38 }
  0x45   :  { %337 = vperm.xlu1 %4082, %v254_v14   ;;  %334 = vperm.xlu0 %4081, %v253_v15   ;;  %v3671_v15 = vpack.c.bf16 %v440_v12, %v438_v11 }
  0x47   :  { %3714 = vmatpush1.bf16.msra.mxu0 %v4787_v41 }
  0x48   :  { %3716 = vmatprep.subr.bf16.mxu0 %v4791_v45 }
  0x49   :  { %343 = vperm.xlu1 %4082, %v256_v16   ;;  %340 = vperm.xlu0 %4081, %v255_v17   ;;  %v437_v16 = vld [vmem:[%s5585_s2 + $0x80] sm:$0xff]  ;;  %v439_v17 = vld [vmem:[%s5585_s2 + $0x90] sm:$0xff] }
  0x4b   :  { %3718 = vmatpush1.bf16.msra.mxu0 %v4799_v50 }
  0x4c   :  { %3720 = vmatprep.subr.bf16.mxu0 %v4773_v26 }
  0x4d   :  { %349 = vperm.xlu1 %4082, %v258_v18   ;;  %346 = vperm.xlu0 %4081, %v257_v19   ;;  %v442_v18 = vld [vmem:[%s5585_s2 + $0xa8] sm:$0xff]  ;;  %v444_v19 = vld [vmem:[%s5585_s2 + $0xb8] sm:$0xff] }
  0x51   :  { %355 = vperm.xlu1 %4082, %v260_v20   ;;  %352 = vperm.xlu0 %4081, %v259_v21   ;;  %v3673_v21 = vpack.c.bf16 %v439_v17, %v437_v16 }
  0x55   :  { %73 = vperm.xlu1 %4082, %v38_v22   ;;  %70 = vperm.xlu0 %4081, %v37_v23   ;;  %v3675_v22 = vpack.c.bf16 %v444_v19, %v442_v18  ;;  %v441_v23 = vld [vmem:[%s5585_s2 + $0xa0] sm:$0xff]  ;;  %s4521_s2 = smov 64  }
  0x56   :  { %v3677_v30 = vpack.c.bf16 %v443_v24, %v441_v23 }
  0x94   :  { %v263_v55 = vpop.permute.xlu0 %262  ;;  %v269_v6 = vpop.permute.xlu1 %268 }
  0x95   :  { %vm357_vm0 = vcmp.eq.s32.totalorder %v4801_v51, %v263_v55  ;;  %vm359_vm2 = vcmp.eq.s32.totalorder %v4801_v51, %v269_v6 }
  0x96   :  { %3465 = vmatmul.mubr.msk.f32.vlgmr.msra.gmra.mrb[0].mxu1 %vm357_vm0, %v4520_v61 }
  0x97   :  { %3658 = vmatpush1.bf16.msra.mxu1 %v3657_v54  ;;  %555 = vmatprep.mubr.f32.mxu1 %v4519_v5 }
  0x98   :  { %v266_v63 = vpop.permute.xlu0 %265  ;;  %3660 = vmatprep.subr.bf16.mxu1 %v3659_v56  ;;  %v272_v14 = vpop.permute.xlu1 %271 }
  0x99   :  { %vm358_vm1 = vcmp.eq.s32.totalorder %v4801_v51, %v266_v63  ;;  %vm360_vm3 = vcmp.eq.s32.totalorder %v4801_v51, %v272_v14 }
  0x9a   :  { %3466 = vmatmul.mubr.msk.f32.gmra.mrb[2].mxu1 %vm358_vm1, %v4520_v61 }
  0x9b   :  { %561 = vmatprep.mubr.f32.mxu1 %v4519_v5  ;;  %3662 = vmatpush1.bf16.msra.mxu1 %v3661_v62 }
  0x9c   :  { %3664 = vmatprep.subr.bf16.mxu1 %v3663_v0  ;;  %v275_v20 = vpop.permute.xlu0 %274  ;;  %v278_v28 = vpop.permute.xlu1 %277 }
  0x9d   :  { %vm361_vm4 = vcmp.eq.s32.totalorder %v4801_v51, %v275_v20  ;;  %vm362_vm5 = vcmp.eq.s32.totalorder %v4801_v51, %v278_v28 }
  0x9e   :  { %3467 = vmatmul.mubr.msk.f32.gmra.mrb[4].mxu1 %vm359_vm2, %v4520_v61 }
  0x9f   :  { %567 = vmatprep.mubr.f32.mxu1 %v4519_v5  ;;  %3666 = vmatpush1.bf16.msra.mxu1 %v3665_v7 }
  0xa0   :  { %3668 = vmatprep.subr.bf16.mxu1 %v3667_v8  ;;  %v281_v39 = vpop.permute.xlu0 %280  ;;  %v284_v46 = vpop.permute.xlu1 %283 }
  0xa1   :  { %vm363_vm6 = vcmp.eq.s32.totalorder %v4801_v51, %v281_v39  ;;  %vm364_vm7 = vcmp.eq.s32.totalorder %v4801_v51, %v284_v46  ;;  %v39_v46 = vld [vmem:[%s5583_s0 + $0x10] sm:$0xff] }
  0xa2   :  { %3468 = vmatmul.mubr.msk.f32.gmra.mrb[6].mxu1 %vm360_vm3, %v4520_v61 }
  0xa3   :  { %573 = vmatprep.mubr.f32.mxu1 %v4519_v5  ;;  %3670 = vmatpush1.bf16.msra.mxu1 %v3669_v13 }
  0xa4   :  { %3672 = vmatprep.subr.bf16.mxu1 %v3671_v15  ;;  %v287_v48 = vpop.permute.xlu0 %286  ;;  %v290_v49 = vpop.permute.xlu1 %289 }
  0xa5   :  { %vm365_vm8 = vcmp.eq.s32.totalorder %v4801_v51, %v287_v48  ;;  %vm366_vm9 = vcmp.eq.s32.totalorder %v4801_v51, %v290_v49  ;;  %v40_v48 = vld [vmem:[%s5583_s0 + $0x18] sm:$0xff] }
  0xa6   :  { %3469 = vmatmul.mubr.msk.f32.gmra.mrb[8].mxu1 %vm361_vm4, %v4520_v61 }
  0xa7   :  { %579 = vmatprep.mubr.f32.mxu1 %v4519_v5  ;;  %3674 = vmatpush1.bf16.msra.mxu1 %v3673_v21 }
  0xa8   :  { %3676 = vmatprep.subr.bf16.mxu1 %v3675_v22  ;;  %v293_v52 = vpop.permute.xlu0 %292  ;;  %v296_v53 = vpop.permute.xlu1 %295 }
  0xa9   :  { %vm367_vm10 = vcmp.eq.s32.totalorder %v4801_v51, %v293_v52  ;;  %vm368_vm11 = vcmp.eq.s32.totalorder %v4801_v51, %v296_v53 }
  0xaa   :  { %3470 = vmatmul.mubr.msk.f32.gmra.mrb[10].mxu1 %vm362_vm5, %v4520_v61 }
  0xab   :  { %585 = vmatprep.mubr.f32.mxu1 %v4519_v5  ;;  %3678 = vmatpush1.bf16.msra.mxu1 %v3677_v30 }
  0xac   :  { %3680 = vmatprep.subr.bf16.mxu1 %v3679_v31  ;;  %v299_v54 = vpop.permute.xlu0 %298  ;;  %v302_v55 = vpop.permute.xlu1 %301 }
  0xad   :  { %vm369_vm12 = vcmp.eq.s32.totalorder %v4801_v51, %v299_v54  ;;  %vm370_vm13 = vcmp.eq.s32.totalorder %v4801_v51, %v302_v55 }
  0xae   :  { %3471 = vmatmul.mubr.msk.f32.gmra.mrb[12].mxu1 %vm363_vm6, %v4520_v61 }
  0xaf   :  { %591 = vmatprep.mubr.f32.mxu1 %v4519_v5  ;;  %3682 = vmatpush1.bf16.msra.mxu1 %v3681_v40 }
  0xb0   :  { %3684 = vmatprep.subr.bf16.mxu1 %v3683_v42  ;;  %v305_v56 = vpop.permute.xlu0 %304  ;;  %v308_v57 = vpop.permute.xlu1 %307 }
  0xb1   :  { %vm371_vm14 = vcmp.eq.s32.totalorder %v4801_v51, %v305_v56  ;;  %vm372_vm15 = vcmp.eq.s32.totalorder %v4801_v51, %v308_v57 }
  0xb2   :  { %3472 = vmatmul.mubr.msk.f32.gmra.mrb[14].mxu1 %vm364_vm7, %v4520_v61 }
  0xb3   :  { %597 = vmatprep.mubr.f32.mxu1 %v4519_v5  ;;  %3686 = vmatpush1.bf16.msra.mxu1 %v3685_v47 }
  0xb4   :  { %v311_v58 = vpop.permute.xlu0 %310  ;;  %v314_v59 = vpop.permute.xlu1 %313 }
  0xb5   :  { %vm373_vm0 = vcmp.eq.s32.totalorder %v4801_v51, %v311_v58  ;;  %vm374_vm1 = vcmp.eq.s32.totalorder %v4801_v51, %v314_v59 }
  0xb6   :  { %3473 = vmatmul.mubr.msk.f32.gmra.mrb[16].mxu1 %vm365_vm8, %v4520_v61 }
  0xb7   :  { %603 = vmatprep.mubr.f32.mxu1 %v4519_v5 }
  0xb8   :  { %v317_v60 = vpop.permute.xlu0 %316  ;;  %v320_v62 = vpop.permute.xlu1 %319 }
  0xb9   :  { %vm375_vm2 = vcmp.eq.s32.totalorder %v4801_v51, %v317_v60  ;;  %vm376_vm3 = vcmp.eq.s32.totalorder %v4801_v51, %v320_v62 }
  0xba   :  { %3474 = vmatmul.mubr.msk.f32.gmra.mrb[18].mxu1 %vm366_vm9, %v4520_v61 }
  0xbb   :  { %609 = vmatprep.mubr.f32.mxu1 %v4519_v5 }
  0xbc   :  { %v323_v63 = vpop.permute.xlu0 %322  ;;  %v326_v0 = vpop.permute.xlu1 %325 }
  0xbd   :  { %vm377_vm4 = vcmp.eq.s32.totalorder %v4801_v51, %v323_v63  ;;  %vm378_vm5 = vcmp.eq.s32.totalorder %v4801_v51, %v326_v0 }
  0xbe   :  { %3475 = vmatmul.mubr.msk.f32.gmra.mrb[20].mxu1 %vm367_vm10, %v4520_v61 }
  0xbf   :  { %615 = vmatprep.mubr.f32.mxu1 %v4519_v5 }
  0xc0   :  { %v329_v1 = vpop.permute.xlu0 %328  ;;  %v332_v2 = vpop.permute.xlu1 %331 }
  0xc1   :  { %vm379_vm6 = vcmp.eq.s32.totalorder %v4801_v51, %v329_v1  ;;  %vm380_vm7 = vcmp.eq.s32.totalorder %v4801_v51, %v332_v2 }
  0xc2   :  { %3476 = vmatmul.mubr.msk.f32.gmra.mrb[22].mxu1 %vm368_vm11, %v4520_v61 }
  0xc3   :  { %621 = vmatprep.mubr.f32.mxu1 %v4519_v5 }
  0xc4   :  { %v335_v3 = vpop.permute.xlu0 %334  ;;  %v338_v4 = vpop.permute.xlu1 %337 }
  0xc5   :  { %vm381_vm8 = vcmp.eq.s32.totalorder %v4801_v51, %v335_v3  ;;  %vm382_vm9 = vcmp.eq.s32.totalorder %v4801_v51, %v338_v4 }
  0xc6   :  { %3477 = vmatmul.mubr.msk.f32.gmra.mrb[24].mxu1 %vm369_vm12, %v4520_v61 }
  0xc7   :  { %627 = vmatprep.mubr.f32.mxu1 %v4519_v5 }
  0xc8   :  { %v341_v6 = vpop.permute.xlu0 %340  ;;  %v344_v7 = vpop.permute.xlu1 %343 }
  0xc9   :  { %vm383_vm10 = vcmp.eq.s32.totalorder %v4801_v51, %v341_v6  ;;  %vm384_vm11 = vcmp.eq.s32.totalorder %v4801_v51, %v344_v7 }
  0xca   :  { %3478 = vmatmul.mubr.msk.f32.gmra.mrb[26].mxu1 %vm370_vm13, %v4520_v61 }
  0xcb   :  { %633 = vmatprep.mubr.f32.mxu1 %v4519_v5 }
  0xcc   :  { %v347_v8 = vpop.permute.xlu0 %346  ;;  %v350_v9 = vpop.permute.xlu1 %349 }
  0xcd   :  { %vm385_vm12 = vcmp.eq.s32.totalorder %v4801_v51, %v347_v8  ;;  %vm386_vm13 = vcmp.eq.s32.totalorder %v4801_v51, %v350_v9 }
  0xce   :  { %3479 = vmatmul.mubr.msk.f32.gmra.mrb[28].mxu1 %vm371_vm14, %v4520_v61 }
  0xcf   :  { %639 = vmatprep.mubr.f32.mxu1 %v4519_v5 }
  0xd0   :  { %v353_v10 = vpop.permute.xlu0 %352  ;;  %v356_v11 = vpop.permute.xlu1 %355 }
  0xd1   :  { %vm387_vm14 = vcmp.eq.s32.totalorder %v4801_v51, %v353_v10 }
  0xd2   :  { %3480 = vmatmul.mubr.msk.f32.gmra.mrb[30].mxu1 %vm372_vm15, %v4520_v61  ;;  %vm388_vm15 = vcmp.eq.s32.totalorder %v4801_v51, %v356_v11 }
  0xd3   :  { %645 = vmatprep.mubr.f32.mxu1 %v4519_v5 }
  0xd4   :  { %v71_v12 = vpop.permute.xlu0 %70  ;;  %v74_v13 = vpop.permute.xlu1 %73 }
  0xd6   :  { %3481 = vmatmul.mubr.msk.f32.gmra.mrb[32].mxu1 %vm373_vm0, %v4520_v61  ;;  %vm165_vm0 = vcmp.eq.s32.totalorder %v4801_v51, %v71_v12 }
  0xd7   :  { %651 = vmatprep.mubr.f32.mxu1 %v4519_v5 }
  0xda   :  { %3482 = vmatmul.mubr.msk.f32.gmra.mrb[34].mxu1 %vm374_vm1, %v4520_v61  ;;  %vm166_vm1 = vcmp.eq.s32.totalorder %v4801_v51, %v74_v13 }
  0xdb   :  { %657 = vmatprep.mubr.f32.mxu1 %v4519_v5 }
  0xde   :  { %3483 = vmatmul.mubr.msk.f32.gmra.mrb[36].mxu1 %vm375_vm2, %v4520_v61 }
  0xdf   :  { %663 = vmatprep.mubr.f32.mxu1 %v4519_v5 }
  0xe2   :  { %3484 = vmatmul.mubr.msk.f32.gmra.mrb[38].mxu1 %vm376_vm3, %v4520_v61 }
  0xe3   :  { %669 = vmatprep.mubr.f32.mxu1 %v4519_v5 }
  0xe6   :  { %3485 = vmatmul.mubr.msk.f32.gmra.mrb[40].mxu1 %vm377_vm4, %v4520_v61  ;;  %vm1083_vm4 = vcmask 523264  }
  0xe7   :  { %675 = vmatprep.mubr.f32.mxu1 %v4519_v5 }
  0xea   :  { %3486 = vmatmul.mubr.msk.f32.gmra.mrb[42].mxu1 %vm378_vm5, %v4520_v61 }
  0xeb   :  { %681 = vmatprep.mubr.f32.mxu1 %v4519_v5 }
  0xee   :  { %3487 = vmatmul.mubr.msk.f32.gmra.mrb[44].mxu1 %vm379_vm6, %v4520_v61 }
  0xef   :  { %687 = vmatprep.mubr.f32.mxu1 %v4519_v5 }
  0xf2   :  { %3488 = vmatmul.mubr.msk.f32.gmra.mrb[46].mxu1 %vm380_vm7, %v4520_v61 }
  0xf3   :  { %693 = vmatprep.mubr.f32.mxu1 %v4519_v5 }
  0xf6   :  { %3489 = vmatmul.mubr.msk.f32.gmra.mrb[48].mxu1 %vm381_vm8, %v4520_v61 }
  0xf7   :  { %699 = vmatprep.mubr.f32.mxu1 %v4519_v5 }
  0xfa   :  { %3490 = vmatmul.mubr.msk.f32.gmra.mrb[50].mxu1 %vm382_vm9, %v4520_v61 }
  0xfb   :  { %705 = vmatprep.mubr.f32.mxu1 %v4519_v5 }
  0xfe   :  { %3491 = vmatmul.mubr.msk.f32.gmra.mrb[52].mxu1 %vm383_vm10, %v4520_v61 }
  0xff   :  { %711 = vmatprep.mubr.f32.mxu1 %v4519_v5 }
 0x102   :  { %3492 = vmatmul.mubr.msk.f32.gmra.mrb[54].mxu1 %vm384_vm11, %v4520_v61 }
 0x103   :  { %717 = vmatprep.mubr.f32.mxu1 %v4519_v5 }
 0x106   :  { %3493 = vmatmul.mubr.msk.f32.gmra.mrb[56].mxu1 %vm385_vm12, %v4520_v61 }
 0x107   :  { %723 = vmatprep.mubr.f32.mxu1 %v4519_v5 }
 0x10a   :  { %3494 = vmatmul.mubr.msk.f32.gmra.mrb[58].mxu1 %vm386_vm13, %v4520_v61 }
 0x10b   :  { %729 = vmatprep.mubr.f32.mxu1 %v4519_v5 }
 0x10e   :  { %3495 = vmatmul.mubr.msk.f32.gmra.mrb[60].mxu1 %vm387_vm14, %v4520_v61 }
 0x10f   :  { %735 = vmatprep.mubr.f32.mxu1 %v4519_v5 }
 0x111   :  { %v1153_v14 = vpop.f32.mrb[0].mxu0 }
 0x112   :  { %3496 = vmatmul.mubr.msk.f32.gmra.mrb[62].mxu1 %vm388_vm15, %v4520_v61  ;;  %v1155_v15 = vpop.f32.mrb[1].mxu0 }
 0x113   :  { %806 = vmatprep.mubr.f32.mxu1 %v4519_v5 }
 0x115   :  { %v1159_v16 = vpop.f32.mrb[2].mxu0 }
 0x116   :  { %3497 = vmatmul.mubr.msk.f32.vlgmr.msra.gmra.mrb[0].mxu1 %vm165_vm0, %v4520_v61  ;;  %v1161_v17 = vpop.f32.mrb[3].mxu0 }
 0x117   :  { %812 = vmatprep.mubr.f32.mxu1 %v4519_v5 }
 0x11a   :  { %3498 = vmatmul.mubr.msk.f32.gmra.mrb[2].mxu1 %vm166_vm1, %v4520_v61 }
 0x11b   :  { %818 = vmatprep.mubr.f32.mxu1 %v4519_v5 }
 0x1e9   :  { %v808_v18 = vpop.f32.mrb[0].mxu1 }
 0x1ea   :  { %v3943_v19 = vadd.f32 %v1153_v14, %v808_v18  ;;  %v810_v20 = vpop.f32.mrb[1].mxu1 }
 0x1eb   :  { %v3944_v21 = vadd.f32 %v1155_v15, %v810_v20 }
 0x1ec   :  { %v3529_v30 = vmul.f32 -1.442695, %v3943_v19 }
 0x1ed   :  { %4083 = vtanh.f32 %v3944_v21  ;;  %v814_v22 = vpop.f32.mrb[2].mxu1  ;;  %v3531_v62 = vmul.f32 -1.442695, %v3944_v21 }
 0x1ee   :  { %v3945_v23 = vadd.f32 %v1159_v16, %v814_v22  ;;  %v816_v24 = vpop.f32.mrb[3].mxu1 }
 0x1ef   :  { %v3946_v25 = vadd.f32 %v1161_v17, %v816_v24 }
 0x1f0   :  { %v3530_v31 = vmul.f32 -1.442695, %v3945_v23 }
 0x1f1   :  { %4085 = vtanh.f32 %v3946_v25  ;;  %v3532_v63 = vmul.f32 -1.442695, %v3946_v25 }
 0x1f2   :  { %4087 = vpow2.f32 %v3529_v30 }
 0x1f3   :  { %4089 = vpow2.f32 %v3530_v31 }
 0x1f7   :  { %v4084_v27 = vpop.eup %4083 }
 0x1f8   :  { %1194 = vrot.lane.b32.xlu0 %v4084_v27, %s4521_s2 }
 0x1fb   :  { %v4086_v28 = vpop.eup %4085 }
 0x1fc   :  { %1196 = vrot.lane.b32.xlu1 %v4086_v28, %s4521_s2  ;;  %v4088_v32 = vpop.eup %4087 }
 0x1fd   :  { %v1170_v33 = vadd.f32 1.0, %v4088_v32  ;;  %v4090_v36 = vpop.eup %4089 }
 0x1fe   :  { %v1171_v37 = vadd.f32 1.0, %v4090_v36 }
 0x1ff   :  { %4091 = vrcp.f32 %v1170_v33 }
 0x200   :  { %4093 = vrcp.f32 %v1171_v37 }
 0x209   :  { %v4092_v39 = vpop.eup %4091 }
 0x20a   :  { %v4094_v43 = vpop.eup %4093  ;;  %v1190_v49 = vmul.f32 0.0, %v4092_v39 }
 0x20b   :  { %v1191_v54 = vmul.f32 0.0, %v4094_v43 }
 0x26a   :  { %v1195_v40 = vpop.permute.xlu0 %1194 }
 0x26b   :  { %v1200_v42 = vmul.f32 %v4092_v39, %v1195_v40 }
 0x26d   :  { %1204 = vrot.lane.b32.xlu0 %v1200_v42, %s4521_s2  ;;  %v41_v42 = vld [vmem:[%s5583_s0 + $0x20] sm:$0xff] }
 0x26e   :  { %v1197_v44 = vpop.permute.xlu1 %1196 }
 0x26f   :  { %v1201_v47 = vmul.f32 %v4094_v43, %v1197_v44  ;;  %v42_v44 = vld [vmem:[%s5583_s0 + $0x28] sm:$0xff] }
 0x271   :  { %76 = vperm.xlu0 %4081, %v39_v46   ;;  %1206 = vrot.lane.b32.xlu1 %v1201_v47, %s4521_s2 }
 0x275   :  { %79 = vperm.xlu1 %4082, %v40_v48  }
 0x2df   :  { %v1205_v52 = vpop.permute.xlu0 %1204 }
 0x2e0   :  { %v5014_v53 = vadd.f32 %v1205_v52, %v1190_v49 }
 0x2e2   :  { %4095 = vtanh.f32 %v5014_v53 }
 0x2e3   :  { %v1207_v55 = vpop.permute.xlu1 %1206 }
 0x2e4   :  { %v5017_v56 = vadd.f32 %v1207_v55, %v1191_v54 }
 0x2e6   :  { %4097 = vtanh.f32 %v5017_v56 }
 0x2e7   :  { %4099 = vpow2.f32 %v3531_v62 }
 0x2e8   :  { %4101 = vpow2.f32 %v3532_v63 }
 0x2ec   :  { %v4096_v57 = vpop.eup %4095 }
 0x2ed   :  { %1216 = vrot.lane.b32.xlu0 %v4096_v57, %s4521_s2 }
 0x2f0   :  { %v4098_v58 = vpop.eup %4097  ;;  %v77_v59 = vpop.permute.xlu0 %76 }
 0x2f1   :  { %vm167_vm2 = vcmp.eq.s32.totalorder %v4801_v51, %v77_v59  ;;  %1218 = vrot.lane.b32.xlu1 %v4098_v58, %s4521_s2  ;;  %v4100_v0 = vpop.eup %4099 }
 0x2f2   :  { %3499 = vmatmul.mubr.msk.f32.gmra.mrb[4].mxu1 %vm167_vm2, %v4520_v61  ;;  %v1182_v1 = vadd.f32 1.0, %v4100_v0  ;;  %v4102_v2 = vpop.eup %4101 }
 0x2f3   :  { %824 = vmatprep.mubr.f32.mxu1 %v4519_v5  ;;  %v1183_v3 = vadd.f32 1.0, %v4102_v2 }
 0x2f4   :  { %v80_v60 = vpop.permute.xlu1 %79  ;;  %4103 = vrcp.f32 %v1182_v1 }
 0x2f5   :  { %vm168_vm3 = vcmp.eq.s32.totalorder %v4801_v51, %v80_v60  ;;  %4105 = vrcp.f32 %v1183_v3 }
 0x2f6   :  { %3500 = vmatmul.mubr.msk.f32.gmra.mrb[6].mxu1 %vm168_vm3, %v4520_v61 }
 0x2f7   :  { %830 = vmatprep.mubr.f32.mxu1 %v4519_v5 }
 0x2fe   :  { %v4104_v4 = vpop.eup %4103 }
 0x2ff   :  { %v4106_v8 = vpop.eup %4105 }
 0x35f   :  { %v1217_v6 = vpop.permute.xlu0 %1216 }
 0x360   :  { %v1222_v7 = vmul.f32 %v4104_v4, %v1217_v6 }
 0x362   :  { %3533 = vmatmul.mubr.msk.f32.vlgmr.msra.gmra.mrb[4].mxu0 %vm1083_vm4, %v1222_v7 }
 0x363   :  { %v1219_v9 = vpop.permute.xlu1 %1218  ;;  %1305 = vmatprep.mubr.f32.mxu0 %v4519_v5  ;;  %3722 = vmatpush1.bf16.msra.mxu0 %v4776_v29 }
 0x364   :  { %v1223_v10 = vmul.f32 %v4106_v8, %v1219_v9  ;;  %3724 = vmatprep.subr.bf16.mxu0 %v4779_v34 }
 0x366   :  { %3534 = vmatmul.mubr.msk.f32.gmra.mrb[6].mxu0 %vm1083_vm4, %v1223_v10 }
 0x367   :  { %3726 = vmatpush1.bf16.msra.mxu0 %v4781_v35  ;;  %1447 = vmatprep.mubr.f32.mxu0 %v4519_v5 }
 0x368   :  { %3728 = vmatprep.subr.bf16.mxu0 %v4785_v38 }
 0x36b   :  { %3730 = vmatpush1.bf16.msra.mxu0 %v4787_v41 }
 0x36c   :  { %3732 = vmatprep.subr.bf16.mxu0 %v4791_v45 }
 0x36f   :  { %3734 = vmatpush1.bf16.msra.mxu0 %v4799_v50 }
 0x370   :  { %3736 = vmatprep.subr.bf16.mxu0 %v4773_v26 }
 0x3c5   :  { %v820_v11 = vpop.f32.mrb[4].mxu1 }
 0x3c6   :  { %v822_v12 = vpop.f32.mrb[5].mxu1 }
 0x3c9   :  { %v826_v13 = vpop.f32.mrb[6].mxu1 }
 0x3ca   :  { %v828_v14 = vpop.f32.mrb[7].mxu1 }
 0x435   :  { %v1301_v15 = vpop.f32.mrb[4].mxu0 }
 0x436   :  { %v3947_v16 = vadd.f32 %v1301_v15, %v820_v11  ;;  %v1303_v17 = vpop.f32.mrb[5].mxu0 }
 0x437   :  { %v3948_v18 = vadd.f32 %v1303_v17, %v822_v12 }
 0x438   :  { %v3535_v25 = vmul.f32 -1.442695, %v3947_v16 }
 0x439   :  { %4107 = vtanh.f32 %v3948_v18  ;;  %v1307_v19 = vpop.f32.mrb[6].mxu0 }
 0x43a   :  { %v3949_v20 = vadd.f32 %v1307_v19, %v826_v13  ;;  %v1309_v21 = vpop.f32.mrb[7].mxu0 }
 0x43b   :  { %v3950_v22 = vadd.f32 %v1309_v21, %v828_v14 }
 0x43c   :  { %v3536_v27 = vmul.f32 -1.442695, %v3949_v20 }
 0x43d   :  { %4109 = vtanh.f32 %v3950_v22  ;;  %v3538_v59 = vmul.f32 -1.442695, %v3950_v22 }
 0x43e   :  { %4111 = vpow2.f32 %v3535_v25 }
 0x43f   :  { %4113 = vpow2.f32 %v3536_v27 }
 0x443   :  { %v4108_v23 = vpop.eup %4107 }
 0x444   :  { %1342 = vrot.lane.b32.xlu0 %v4108_v23, %s4521_s2 }
 0x447   :  { %v4110_v24 = vpop.eup %4109 }
 0x448   :  { %1344 = vrot.lane.b32.xlu1 %v4110_v24, %s4521_s2  ;;  %v4112_v28 = vpop.eup %4111 }
 0x449   :  { %v1318_v30 = vadd.f32 1.0, %v4112_v28  ;;  %v4114_v31 = vpop.eup %4113 }
 0x44a   :  { %v1319_v32 = vadd.f32 1.0, %v4114_v31 }
 0x44b   :  { %4115 = vrcp.f32 %v1318_v30 }
 0x44c   :  { %4117 = vrcp.f32 %v1319_v32 }
 0x455   :  { %v4116_v33 = vpop.eup %4115 }
 0x456   :  { %v4118_v39 = vpop.eup %4117  ;;  %v1338_v46 = vmul.f32 %v4116_v33, %v5014_v53 }
 0x457   :  { %v1339_v49 = vmul.f32 %v4118_v39, %v5017_v56  ;;  %v3537_v56 = vmul.f32 -1.442695, %v3948_v18 }
 0x4b6   :  { %v1343_v36 = vpop.permute.xlu0 %1342 }
 0x4b7   :  { %v1348_v37 = vmul.f32 %v4116_v33, %v1343_v36 }
 0x4b9   :  { %1352 = vrot.lane.b32.xlu0 %v1348_v37, %s4521_s2  ;;  %v43_v37 = vld [vmem:[%s5583_s0 + $0x30] sm:$0xff] }
 0x4ba   :  { %v1345_v40 = vpop.permute.xlu1 %1344 }
 0x4bb   :  { %v1349_v43 = vmul.f32 %v4118_v39, %v1345_v40  ;;  %v44_v40 = vld [vmem:[%s5583_s0 + $0x38] sm:$0xff] }
 0x4bd   :  { %82 = vperm.xlu0 %4081, %v41_v42   ;;  %1354 = vrot.lane.b32.xlu1 %v1349_v43, %s4521_s2 }
 0x4c1   :  { %85 = vperm.xlu1 %4082, %v42_v44  }
 0x52b   :  { %v1353_v47 = vpop.permute.xlu0 %1352 }
 0x52c   :  { %v5051_v48 = vadd.f32 %v1353_v47, %v1338_v46 }
 0x52e   :  { %4119 = vtanh.f32 %v5051_v48 }
 0x52f   :  { %v1355_v52 = vpop.permute.xlu1 %1354 }
 0x530   :  { %v5055_v54 = vadd.f32 %v1355_v52, %v1339_v49 }
 0x532   :  { %4121 = vtanh.f32 %v5055_v54 }
 0x533   :  { %4123 = vpow2.f32 %v3537_v56 }
 0x534   :  { %4125 = vpow2.f32 %v3538_v59 }
 0x538   :  { %v4120_v55 = vpop.eup %4119 }
 0x539   :  { %1364 = vrot.lane.b32.xlu0 %v4120_v55, %s4521_s2 }
 0x53c   :  { %v4122_v57 = vpop.eup %4121  ;;  %v83_v58 = vpop.permute.xlu0 %82 }
 0x53d   :  { %vm169_vm5 = vcmp.eq.s32.totalorder %v4801_v51, %v83_v58  ;;  %1366 = vrot.lane.b32.xlu1 %v4122_v57, %s4521_s2  ;;  %v4124_v60 = vpop.eup %4123 }
 0x53e   :  { %3501 = vmatmul.mubr.msk.f32.gmra.mrb[8].mxu1 %vm169_vm5, %v4520_v61  ;;  %v1330_v62 = vadd.f32 1.0, %v4124_v60  ;;  %v4126_v63 = vpop.eup %4125 }
 0x53f   :  { %836 = vmatprep.mubr.f32.mxu1 %v4519_v5  ;;  %v1331_v0 = vadd.f32 1.0, %v4126_v63 }
 0x540   :  { %v86_v53 = vpop.permute.xlu1 %85  ;;  %4127 = vrcp.f32 %v1330_v62 }
 0x541   :  { %vm170_vm6 = vcmp.eq.s32.totalorder %v4801_v51, %v86_v53  ;;  %4129 = vrcp.f32 %v1331_v0 }
 0x542   :  { %3502 = vmatmul.mubr.msk.f32.gmra.mrb[10].mxu1 %vm170_vm6, %v4520_v61 }
 0x543   :  { %842 = vmatprep.mubr.f32.mxu1 %v4519_v5 }
 0x54a   :  { %v4128_v1 = vpop.eup %4127 }
 0x54b   :  { %v4130_v4 = vpop.eup %4129 }
 0x5ab   :  { %v1365_v2 = vpop.permute.xlu0 %1364 }
 0x5ac   :  { %v1370_v3 = vmul.f32 %v4128_v1, %v1365_v2 }
 0x5ae   :  { %3539 = vmatmul.mubr.msk.f32.vlgmr.msra.gmra.mrb[8].mxu0 %vm1083_vm4, %v1370_v3 }
 0x5af   :  { %v1367_v6 = vpop.permute.xlu1 %1366  ;;  %1453 = vmatprep.mubr.f32.mxu0 %v4519_v5  ;;  %3738 = vmatpush1.bf16.msra.mxu0 %v4776_v29 }
 0x5b0   :  { %v1371_v7 = vmul.f32 %v4130_v4, %v1367_v6  ;;  %3740 = vmatprep.subr.bf16.mxu0 %v4779_v34 }
 0x5b2   :  { %3540 = vmatmul.mubr.msk.f32.gmra.mrb[10].mxu0 %vm1083_vm4, %v1371_v7 }
 0x5b3   :  { %3742 = vmatpush1.bf16.msra.mxu0 %v4781_v35  ;;  %1595 = vmatprep.mubr.f32.mxu0 %v4519_v5 }
 0x5b4   :  { %3744 = vmatprep.subr.bf16.mxu0 %v4785_v38 }
 0x5b7   :  { %3746 = vmatpush1.bf16.msra.mxu0 %v4787_v41 }
 0x5b8   :  { %3748 = vmatprep.subr.bf16.mxu0 %v4791_v45 }
 0x5bb   :  { %3750 = vmatpush1.bf16.msra.mxu0 %v4799_v50 }
 0x5bc   :  { %3752 = vmatprep.subr.bf16.mxu0 %v4773_v26 }
 0x611   :  { %v832_v8 = vpop.f32.mrb[8].mxu1 }
 0x612   :  { %v834_v9 = vpop.f32.mrb[9].mxu1 }
 0x615   :  { %v838_v10 = vpop.f32.mrb[10].mxu1 }
 0x616   :  { %v840_v11 = vpop.f32.mrb[11].mxu1 }
 0x681   :  { %v1449_v12 = vpop.f32.mrb[8].mxu0 }
 0x682   :  { %v3951_v13 = vadd.f32 %v1449_v12, %v832_v8  ;;  %v1451_v14 = vpop.f32.mrb[9].mxu0 }
 0x683   :  { %v3952_v15 = vadd.f32 %v1451_v14, %v834_v9 }
 0x684   :  { %v3541_v22 = vmul.f32 -1.442695, %v3951_v13 }
 0x685   :  { %4131 = vtanh.f32 %v3952_v15  ;;  %v1455_v16 = vpop.f32.mrb[10].mxu0 }
 0x686   :  { %v3953_v17 = vadd.f32 %v1455_v16, %v838_v10  ;;  %v1457_v18 = vpop.f32.mrb[11].mxu0 }
 0x687   :  { %v3954_v19 = vadd.f32 %v1457_v18, %v840_v11 }
 0x688   :  { %v3542_v23 = vmul.f32 -1.442695, %v3953_v17 }
 0x689   :  { %4133 = vtanh.f32 %v3954_v19  ;;  %v3544_v58 = vmul.f32 -1.442695, %v3954_v19 }
 0x68a   :  { %4135 = vpow2.f32 %v3541_v22 }
 0x68b   :  { %4137 = vpow2.f32 %v3542_v23 }
 0x68f   :  { %v4132_v20 = vpop.eup %4131 }
 0x690   :  { %1490 = vrot.lane.b32.xlu0 %v4132_v20, %s4521_s2 }
 0x693   :  { %v4134_v21 = vpop.eup %4133 }
 0x694   :  { %1492 = vrot.lane.b32.xlu1 %v4134_v21, %s4521_s2  ;;  %v4136_v24 = vpop.eup %4135 }
 0x695   :  { %v1466_v25 = vadd.f32 1.0, %v4136_v24  ;;  %v4138_v27 = vpop.eup %4137 }
 0x696   :  { %v1467_v28 = vadd.f32 1.0, %v4138_v27 }
 0x697   :  { %4139 = vrcp.f32 %v1466_v25 }
 0x698   :  { %4141 = vrcp.f32 %v1467_v28 }
 0x6a1   :  { %v4140_v30 = vpop.eup %4139 }
 0x6a2   :  { %v4142_v33 = vpop.eup %4141  ;;  %v1486_v42 = vmul.f32 %v4140_v30, %v5051_v48 }
 0x6a3   :  { %v1487_v46 = vmul.f32 %v4142_v33, %v5055_v54  ;;  %v3543_v54 = vmul.f32 -1.442695, %v3952_v15 }
 0x702   :  { %v1491_v31 = vpop.permute.xlu0 %1490 }
 0x703   :  { %v1496_v32 = vmul.f32 %v4140_v30, %v1491_v31 }
 0x705   :  { %1500 = vrot.lane.b32.xlu0 %v1496_v32, %s4521_s2  ;;  %v45_v32 = vld [vmem:[%s5583_s0 + $0x40] sm:$0xff] }
 0x706   :  { %v1493_v36 = vpop.permute.xlu1 %1492 }
 0x707   :  { %v1497_v39 = vmul.f32 %v4142_v33, %v1493_v36  ;;  %v46_v36 = vld [vmem:[%s5583_s0 + $0x48] sm:$0xff] }
 0x709   :  { %88 = vperm.xlu0 %4081, %v43_v37   ;;  %1502 = vrot.lane.b32.xlu1 %v1497_v39, %s4521_s2 }
 0x70d   :  { %91 = vperm.xlu1 %4082, %v44_v40  }
 0x777   :  { %v1501_v43 = vpop.permute.xlu0 %1500 }
 0x778   :  { %v5089_v44 = vadd.f32 %v1501_v43, %v1486_v42 }
 0x77a   :  { %4143 = vtanh.f32 %v5089_v44 }
 0x77b   :  { %v1503_v47 = vpop.permute.xlu1 %1502 }
 0x77c   :  { %v5093_v49 = vadd.f32 %v1503_v47, %v1487_v46 }
 0x77e   :  { %4145 = vtanh.f32 %v5093_v49 }
 0x77f   :  { %4147 = vpow2.f32 %v3543_v54 }
 0x780   :  { %4149 = vpow2.f32 %v3544_v58 }
 0x784   :  { %v4144_v52 = vpop.eup %4143 }
 0x785   :  { %1512 = vrot.lane.b32.xlu0 %v4144_v52, %s4521_s2 }
 0x788   :  { %v4146_v55 = vpop.eup %4145  ;;  %v89_v57 = vpop.permute.xlu0 %88 }
 0x789   :  { %vm171_vm7 = vcmp.eq.s32.totalorder %v4801_v51, %v89_v57  ;;  %1514 = vrot.lane.b32.xlu1 %v4146_v55, %s4521_s2  ;;  %v4148_v53 = vpop.eup %4147 }
 0x78a   :  { %3503 = vmatmul.mubr.msk.f32.gmra.mrb[12].mxu1 %vm171_vm7, %v4520_v61  ;;  %v1478_v56 = vadd.f32 1.0, %v4148_v53  ;;  %v4150_v59 = vpop.eup %4149 }
 0x78b   :  { %848 = vmatprep.mubr.f32.mxu1 %v4519_v5  ;;  %v1479_v60 = vadd.f32 1.0, %v4150_v59 }
 0x78c   :  { %v92_v48 = vpop.permute.xlu1 %91  ;;  %4151 = vrcp.f32 %v1478_v56 }
 0x78d   :  { %vm172_vm8 = vcmp.eq.s32.totalorder %v4801_v51, %v92_v48  ;;  %4153 = vrcp.f32 %v1479_v60 }
 0x78e   :  { %3504 = vmatmul.mubr.msk.f32.gmra.mrb[14].mxu1 %vm172_vm8, %v4520_v61 }
 0x78f   :  { %854 = vmatprep.mubr.f32.mxu1 %v4519_v5 }
 0x796   :  { %v4152_v62 = vpop.eup %4151 }
 0x797   :  { %v4154_v1 = vpop.eup %4153 }
 0x7f7   :  { %v1513_v63 = vpop.permute.xlu0 %1512 }
 0x7f8   :  { %v1518_v0 = vmul.f32 %v4152_v62, %v1513_v63 }
 0x7fa   :  { %3545 = vmatmul.mubr.msk.f32.vlgmr.msra.gmra.mrb[12].mxu0 %vm1083_vm4, %v1518_v0 }
 0x7fb   :  { %v1515_v2 = vpop.permute.xlu1 %1514  ;;  %1601 = vmatprep.mubr.f32.mxu0 %v4519_v5  ;;  %3754 = vmatpush1.bf16.msra.mxu0 %v4776_v29 }
 0x7fc   :  { %v1519_v3 = vmul.f32 %v4154_v1, %v1515_v2  ;;  %3756 = vmatprep.subr.bf16.mxu0 %v4779_v34 }
 0x7fe   :  { %3546 = vmatmul.mubr.msk.f32.gmra.mrb[14].mxu0 %vm1083_vm4, %v1519_v3 }
 0x7ff   :  { %3758 = vmatpush1.bf16.msra.mxu0 %v4781_v35  ;;  %1743 = vmatprep.mubr.f32.mxu0 %v4519_v5 }
 0x800   :  { %3760 = vmatprep.subr.bf16.mxu0 %v4785_v38 }
 0x803   :  { %3762 = vmatpush1.bf16.msra.mxu0 %v4787_v41 }
 0x804   :  { %3764 = vmatprep.subr.bf16.mxu0 %v4791_v45 }
 0x807   :  { %3766 = vmatpush1.bf16.msra.mxu0 %v4799_v50 }
 0x808   :  { %3768 = vmatprep.subr.bf16.mxu0 %v4773_v26 }
 0x85d   :  { %v844_v4 = vpop.f32.mrb[12].mxu1 }
 0x85e   :  { %v846_v6 = vpop.f32.mrb[13].mxu1 }
 0x861   :  { %v850_v7 = vpop.f32.mrb[14].mxu1 }
 0x862   :  { %v852_v8 = vpop.f32.mrb[15].mxu1 }
 0x8cd   :  { %v1597_v9 = vpop.f32.mrb[12].mxu0 }
 0x8ce   :  { %v3955_v10 = vadd.f32 %v1597_v9, %v844_v4  ;;  %v1599_v11 = vpop.f32.mrb[13].mxu0 }
 0x8cf   :  { %v3956_v12 = vadd.f32 %v1599_v11, %v846_v6 }
 0x8d0   :  { %v3547_v19 = vmul.f32 -1.442695, %v3955_v10 }
 0x8d1   :  { %4155 = vtanh.f32 %v3956_v12  ;;  %v1603_v13 = vpop.f32.mrb[14].mxu0 }
 0x8d2   :  { %v3957_v14 = vadd.f32 %v1603_v13, %v850_v7  ;;  %v1605_v15 = vpop.f32.mrb[15].mxu0 }
 0x8d3   :  { %v3958_v16 = vadd.f32 %v1605_v15, %v852_v8 }
 0x8d4   :  { %v3548_v20 = vmul.f32 -1.442695, %v3957_v14 }
 0x8d5   :  { %4157 = vtanh.f32 %v3958_v16  ;;  %v3550_v57 = vmul.f32 -1.442695, %v3958_v16 }
 0x8d6   :  { %4159 = vpow2.f32 %v3547_v19 }
 0x8d7   :  { %4161 = vpow2.f32 %v3548_v20 }
 0x8db   :  { %v4156_v17 = vpop.eup %4155 }
 0x8dc   :  { %1638 = vrot.lane.b32.xlu0 %v4156_v17, %s4521_s2 }
 0x8df   :  { %v4158_v18 = vpop.eup %4157 }
 0x8e0   :  { %1640 = vrot.lane.b32.xlu1 %v4158_v18, %s4521_s2  ;;  %v4160_v21 = vpop.eup %4159 }
 0x8e1   :  { %v1614_v22 = vadd.f32 1.0, %v4160_v21  ;;  %v4162_v23 = vpop.eup %4161 }
 0x8e2   :  { %v1615_v24 = vadd.f32 1.0, %v4162_v23 }
 0x8e3   :  { %4163 = vrcp.f32 %v1614_v22 }
 0x8e4   :  { %4165 = vrcp.f32 %v1615_v24 }
 0x8ed   :  { %v4164_v25 = vpop.eup %4163 }
 0x8ee   :  { %v4166_v30 = vpop.eup %4165  ;;  %v1634_v37 = vmul.f32 %v4164_v25, %v5089_v44 }
 0x8ef   :  { %v1635_v42 = vmul.f32 %v4166_v30, %v5093_v49  ;;  %v3549_v49 = vmul.f32 -1.442695, %v3956_v12 }
 0x94e   :  { %v1639_v27 = vpop.permute.xlu0 %1638 }
 0x94f   :  { %v1644_v28 = vmul.f32 %v4164_v25, %v1639_v27 }
 0x951   :  { %1648 = vrot.lane.b32.xlu0 %v1644_v28, %s4521_s2  ;;  %v47_v28 = vld [vmem:[%s5583_s0 + $0x50] sm:$0xff] }
 0x952   :  { %v1641_v31 = vpop.permute.xlu1 %1640 }
 0x953   :  { %v1645_v33 = vmul.f32 %v4166_v30, %v1641_v31  ;;  %v48_v31 = vld [vmem:[%s5583_s0 + $0x58] sm:$0xff] }
 0x955   :  { %94 = vperm.xlu0 %4081, %v45_v32   ;;  %1650 = vrot.lane.b32.xlu1 %v1645_v33, %s4521_s2 }
 0x959   :  { %97 = vperm.xlu1 %4082, %v46_v36  }
 0x9c3   :  { %v1649_v39 = vpop.permute.xlu0 %1648 }
 0x9c4   :  { %v5127_v40 = vadd.f32 %v1649_v39, %v1634_v37 }
 0x9c6   :  { %4167 = vtanh.f32 %v5127_v40 }
 0x9c7   :  { %v1651_v43 = vpop.permute.xlu1 %1650 }
 0x9c8   :  { %v5131_v46 = vadd.f32 %v1651_v43, %v1635_v42 }
 0x9ca   :  { %4169 = vtanh.f32 %v5131_v46 }
 0x9cb   :  { %4171 = vpow2.f32 %v3549_v49 }
 0x9cc   :  { %4173 = vpow2.f32 %v3550_v57 }
 0x9d0   :  { %v4168_v47 = vpop.eup %4167 }
 0x9d1   :  { %1660 = vrot.lane.b32.xlu0 %v4168_v47, %s4521_s2 }
 0x9d4   :  { %v4170_v52 = vpop.eup %4169  ;;  %v95_v55 = vpop.permute.xlu0 %94 }
 0x9d5   :  { %vm173_vm9 = vcmp.eq.s32.totalorder %v4801_v51, %v95_v55  ;;  %1662 = vrot.lane.b32.xlu1 %v4170_v52, %s4521_s2  ;;  %v4172_v48 = vpop.eup %4171 }
 0x9d6   :  { %3505 = vmatmul.mubr.msk.f32.gmra.mrb[16].mxu1 %vm173_vm9, %v4520_v61  ;;  %v1626_v54 = vadd.f32 1.0, %v4172_v48  ;;  %v4174_v58 = vpop.eup %4173 }
 0x9d7   :  { %860 = vmatprep.mubr.f32.mxu1 %v4519_v5  ;;  %v1627_v53 = vadd.f32 1.0, %v4174_v58 }
 0x9d8   :  { %v98_v44 = vpop.permute.xlu1 %97  ;;  %4175 = vrcp.f32 %v1626_v54 }
 0x9d9   :  { %vm174_vm10 = vcmp.eq.s32.totalorder %v4801_v51, %v98_v44  ;;  %4177 = vrcp.f32 %v1627_v53 }
 0x9da   :  { %3506 = vmatmul.mubr.msk.f32.gmra.mrb[18].mxu1 %vm174_vm10, %v4520_v61 }
 0x9db   :  { %866 = vmatprep.mubr.f32.mxu1 %v4519_v5 }
 0x9e2   :  { %v4176_v56 = vpop.eup %4175 }
 0x9e3   :  { %v4178_v62 = vpop.eup %4177 }
 0xa43   :  { %v1661_v59 = vpop.permute.xlu0 %1660 }
 0xa44   :  { %v1666_v60 = vmul.f32 %v4176_v56, %v1661_v59 }
 0xa46   :  { %3551 = vmatmul.mubr.msk.f32.vlgmr.msra.gmra.mrb[16].mxu0 %vm1083_vm4, %v1666_v60 }
 0xa47   :  { %v1663_v63 = vpop.permute.xlu1 %1662  ;;  %1749 = vmatprep.mubr.f32.mxu0 %v4519_v5  ;;  %3770 = vmatpush1.bf16.msra.mxu0 %v4776_v29 }
 0xa48   :  { %v1667_v0 = vmul.f32 %v4178_v62, %v1663_v63  ;;  %3772 = vmatprep.subr.bf16.mxu0 %v4779_v34 }
 0xa4a   :  { %3552 = vmatmul.mubr.msk.f32.gmra.mrb[18].mxu0 %vm1083_vm4, %v1667_v0 }
 0xa4b   :  { %3774 = vmatpush1.bf16.msra.mxu0 %v4781_v35  ;;  %1891 = vmatprep.mubr.f32.mxu0 %v4519_v5 }
 0xa4c   :  { %3776 = vmatprep.subr.bf16.mxu0 %v4785_v38 }
 0xa4f   :  { %3778 = vmatpush1.bf16.msra.mxu0 %v4787_v41 }
 0xa50   :  { %3780 = vmatprep.subr.bf16.mxu0 %v4791_v45 }
 0xa53   :  { %3782 = vmatpush1.bf16.msra.mxu0 %v4799_v50 }
 0xa54   :  { %3784 = vmatprep.subr.bf16.mxu0 %v4773_v26 }
 0xaa9   :  { %v856_v1 = vpop.f32.mrb[16].mxu1 }
 0xaaa   :  { %v858_v2 = vpop.f32.mrb[17].mxu1 }
 0xaad   :  { %v862_v3 = vpop.f32.mrb[18].mxu1 }
 0xaae   :  { %v864_v4 = vpop.f32.mrb[19].mxu1 }
 0xb19   :  { %v1745_v6 = vpop.f32.mrb[16].mxu0 }
 0xb1a   :  { %v3959_v7 = vadd.f32 %v1745_v6, %v856_v1  ;;  %v1747_v8 = vpop.f32.mrb[17].mxu0 }
 0xb1b   :  { %v3960_v9 = vadd.f32 %v1747_v8, %v858_v2 }
 0xb1c   :  { %v3553_v16 = vmul.f32 -1.442695, %v3959_v7 }
 0xb1d   :  { %4179 = vtanh.f32 %v3960_v9  ;;  %v1751_v10 = vpop.f32.mrb[18].mxu0 }
 0xb1e   :  { %v3961_v11 = vadd.f32 %v1751_v10, %v862_v3  ;;  %v1753_v12 = vpop.f32.mrb[19].mxu0 }
 0xb1f   :  { %v3962_v13 = vadd.f32 %v1753_v12, %v864_v4 }
 0xb20   :  { %v3554_v17 = vmul.f32 -1.442695, %v3961_v11 }
 0xb21   :  { %4181 = vtanh.f32 %v3962_v13  ;;  %v3556_v55 = vmul.f32 -1.442695, %v3962_v13 }
 0xb22   :  { %4183 = vpow2.f32 %v3553_v16 }
 0xb23   :  { %4185 = vpow2.f32 %v3554_v17 }
 0xb27   :  { %v4180_v14 = vpop.eup %4179 }
 0xb28   :  { %1786 = vrot.lane.b32.xlu0 %v4180_v14, %s4521_s2 }
 0xb2b   :  { %v4182_v15 = vpop.eup %4181 }
 0xb2c   :  { %1788 = vrot.lane.b32.xlu1 %v4182_v15, %s4521_s2  ;;  %v4184_v18 = vpop.eup %4183 }
 0xb2d   :  { %v1762_v19 = vadd.f32 1.0, %v4184_v18  ;;  %v4186_v20 = vpop.eup %4185 }
 0xb2e   :  { %v1763_v21 = vadd.f32 1.0, %v4186_v20 }
 0xb2f   :  { %4187 = vrcp.f32 %v1762_v19 }
 0xb30   :  { %4189 = vrcp.f32 %v1763_v21 }
 0xb39   :  { %v4188_v22 = vpop.eup %4187 }
 0xb3a   :  { %v4190_v25 = vpop.eup %4189  ;;  %v1782_v32 = vmul.f32 %v4188_v22, %v5127_v40 }
 0xb3b   :  { %v1783_v37 = vmul.f32 %v4190_v25, %v5131_v46  ;;  %v3555_v46 = vmul.f32 -1.442695, %v3960_v9 }
 0xb9a   :  { %v1787_v23 = vpop.permute.xlu0 %1786 }
 0xb9b   :  { %v1792_v24 = vmul.f32 %v4188_v22, %v1787_v23 }
 0xb9d   :  { %1796 = vrot.lane.b32.xlu0 %v1792_v24, %s4521_s2  ;;  %v49_v24 = vld [vmem:[%s5583_s0 + $0x60] sm:$0xff] }
 0xb9e   :  { %v1789_v27 = vpop.permute.xlu1 %1788 }
 0xb9f   :  { %v1793_v30 = vmul.f32 %v4190_v25, %v1789_v27  ;;  %v50_v27 = vld [vmem:[%s5583_s0 + $0x68] sm:$0xff] }
 0xba1   :  { %100 = vperm.xlu0 %4081, %v47_v28   ;;  %1798 = vrot.lane.b32.xlu1 %v1793_v30, %s4521_s2 }
 0xba5   :  { %103 = vperm.xlu1 %4082, %v48_v31  }
 0xc0f   :  { %v1797_v33 = vpop.permute.xlu0 %1796 }
 0xc10   :  { %v5165_v36 = vadd.f32 %v1797_v33, %v1782_v32 }
 0xc12   :  { %4191 = vtanh.f32 %v5165_v36 }
 0xc13   :  { %v1799_v39 = vpop.permute.xlu1 %1798 }
 0xc14   :  { %v5169_v42 = vadd.f32 %v1799_v39, %v1783_v37 }
 0xc16   :  { %4193 = vtanh.f32 %v5169_v42 }
 0xc17   :  { %4195 = vpow2.f32 %v3555_v46 }
 0xc18   :  { %4197 = vpow2.f32 %v3556_v55 }
 0xc1c   :  { %v4192_v43 = vpop.eup %4191 }
 0xc1d   :  { %1808 = vrot.lane.b32.xlu0 %v4192_v43, %s4521_s2 }
 0xc20   :  { %v4194_v47 = vpop.eup %4193  ;;  %v101_v52 = vpop.permute.xlu0 %100 }
 0xc21   :  { %vm175_vm11 = vcmp.eq.s32.totalorder %v4801_v51, %v101_v52  ;;  %1810 = vrot.lane.b32.xlu1 %v4194_v47, %s4521_s2  ;;  %v4196_v44 = vpop.eup %4195 }
 0xc22   :  { %3507 = vmatmul.mubr.msk.f32.gmra.mrb[20].mxu1 %vm175_vm11, %v4520_v61  ;;  %v1774_v49 = vadd.f32 1.0, %v4196_v44  ;;  %v4198_v57 = vpop.eup %4197 }
 0xc23   :  { %872 = vmatprep.mubr.f32.mxu1 %v4519_v5  ;;  %v1775_v48 = vadd.f32 1.0, %v4198_v57 }
 0xc24   :  { %v104_v40 = vpop.permute.xlu1 %103  ;;  %4199 = vrcp.f32 %v1774_v49 }
 0xc25   :  { %vm176_vm12 = vcmp.eq.s32.totalorder %v4801_v51, %v104_v40  ;;  %4201 = vrcp.f32 %v1775_v48 }
 0xc26   :  { %3508 = vmatmul.mubr.msk.f32.gmra.mrb[22].mxu1 %vm176_vm12, %v4520_v61 }
 0xc27   :  { %878 = vmatprep.mubr.f32.mxu1 %v4519_v5 }
 0xc2e   :  { %v4200_v54 = vpop.eup %4199 }
 0xc2f   :  { %v4202_v56 = vpop.eup %4201 }
 0xc8f   :  { %v1809_v58 = vpop.permute.xlu0 %1808 }
 0xc90   :  { %v1814_v53 = vmul.f32 %v4200_v54, %v1809_v58 }
 0xc92   :  { %3557 = vmatmul.mubr.msk.f32.vlgmr.msra.gmra.mrb[20].mxu0 %vm1083_vm4, %v1814_v53 }
 0xc93   :  { %v1811_v59 = vpop.permute.xlu1 %1810  ;;  %1897 = vmatprep.mubr.f32.mxu0 %v4519_v5  ;;  %3786 = vmatpush1.bf16.msra.mxu0 %v4776_v29 }
 0xc94   :  { %v1815_v60 = vmul.f32 %v4202_v56, %v1811_v59  ;;  %3788 = vmatprep.subr.bf16.mxu0 %v4779_v34 }
 0xc96   :  { %3558 = vmatmul.mubr.msk.f32.gmra.mrb[22].mxu0 %vm1083_vm4, %v1815_v60 }
 0xc97   :  { %3790 = vmatpush1.bf16.msra.mxu0 %v4781_v35  ;;  %2039 = vmatprep.mubr.f32.mxu0 %v4519_v5 }
 0xc98   :  { %3792 = vmatprep.subr.bf16.mxu0 %v4785_v38 }
 0xc9b   :  { %3794 = vmatpush1.bf16.msra.mxu0 %v4787_v41 }
 0xc9c   :  { %3796 = vmatprep.subr.bf16.mxu0 %v4791_v45 }
 0xc9f   :  { %3798 = vmatpush1.bf16.msra.mxu0 %v4799_v50 }
 0xca0   :  { %3800 = vmatprep.subr.bf16.mxu0 %v4773_v26 }
 0xcf5   :  { %v868_v62 = vpop.f32.mrb[20].mxu1 }
 0xcf6   :  { %v870_v63 = vpop.f32.mrb[21].mxu1 }
 0xcf9   :  { %v874_v0 = vpop.f32.mrb[22].mxu1 }
 0xcfa   :  { %v876_v1 = vpop.f32.mrb[23].mxu1 }
 0xd65   :  { %v1893_v2 = vpop.f32.mrb[20].mxu0 }
 0xd66   :  { %v3963_v3 = vadd.f32 %v1893_v2, %v868_v62  ;;  %v1895_v4 = vpop.f32.mrb[21].mxu0 }
 0xd67   :  { %v3964_v6 = vadd.f32 %v1895_v4, %v870_v63 }
 0xd68   :  { %v3559_v13 = vmul.f32 -1.442695, %v3963_v3 }
 0xd69   :  { %4203 = vtanh.f32 %v3964_v6  ;;  %v1899_v7 = vpop.f32.mrb[22].mxu0 }
 0xd6a   :  { %v3965_v8 = vadd.f32 %v1899_v7, %v874_v0  ;;  %v1901_v9 = vpop.f32.mrb[23].mxu0 }
 0xd6b   :  { %v3966_v10 = vadd.f32 %v1901_v9, %v876_v1 }
 0xd6c   :  { %v3560_v14 = vmul.f32 -1.442695, %v3965_v8 }
 0xd6d   :  { %4205 = vtanh.f32 %v3966_v10  ;;  %v3562_v52 = vmul.f32 -1.442695, %v3966_v10 }
 0xd6e   :  { %4207 = vpow2.f32 %v3559_v13 }
 0xd6f   :  { %4209 = vpow2.f32 %v3560_v14 }
 0xd73   :  { %v4204_v11 = vpop.eup %4203 }
 0xd74   :  { %1934 = vrot.lane.b32.xlu0 %v4204_v11, %s4521_s2 }
 0xd77   :  { %v4206_v12 = vpop.eup %4205 }
 0xd78   :  { %1936 = vrot.lane.b32.xlu1 %v4206_v12, %s4521_s2  ;;  %v4208_v15 = vpop.eup %4207 }
 0xd79   :  { %v1910_v16 = vadd.f32 1.0, %v4208_v15  ;;  %v4210_v17 = vpop.eup %4209 }
 0xd7a   :  { %v1911_v18 = vadd.f32 1.0, %v4210_v17 }
 0xd7b   :  { %4211 = vrcp.f32 %v1910_v16 }
 0xd7c   :  { %4213 = vrcp.f32 %v1911_v18 }
 0xd85   :  { %v4212_v19 = vpop.eup %4211 }
 0xd86   :  { %v4214_v22 = vpop.eup %4213  ;;  %v1930_v28 = vmul.f32 %v4212_v19, %v5165_v36 }
 0xd87   :  { %v1931_v32 = vmul.f32 %v4214_v22, %v5169_v42  ;;  %v3561_v42 = vmul.f32 -1.442695, %v3964_v6 }
 0xde6   :  { %v1935_v20 = vpop.permute.xlu0 %1934 }
 0xde7   :  { %v1940_v21 = vmul.f32 %v4212_v19, %v1935_v20 }
 0xde9   :  { %1944 = vrot.lane.b32.xlu0 %v1940_v21, %s4521_s2  ;;  %v51_v21 = vld [vmem:[%s5583_s0 + $0x70] sm:$0xff] }
 0xdea   :  { %v1937_v23 = vpop.permute.xlu1 %1936 }
 0xdeb   :  { %v1941_v25 = vmul.f32 %v4214_v22, %v1937_v23  ;;  %v52_v23 = vld [vmem:[%s5583_s0 + $0x78] sm:$0xff] }
 0xded   :  { %106 = vperm.xlu0 %4081, %v49_v24   ;;  %1946 = vrot.lane.b32.xlu1 %v1941_v25, %s4521_s2 }
 0xdf1   :  { %109 = vperm.xlu1 %4082, %v50_v27  }
 0xe5b   :  { %v1945_v30 = vpop.permute.xlu0 %1944 }
 0xe5c   :  { %v5203_v31 = vadd.f32 %v1945_v30, %v1930_v28 }
 0xe5e   :  { %4215 = vtanh.f32 %v5203_v31 }
 0xe5f   :  { %v1947_v33 = vpop.permute.xlu1 %1946 }
 0xe60   :  { %v5207_v37 = vadd.f32 %v1947_v33, %v1931_v32 }
 0xe62   :  { %4217 = vtanh.f32 %v5207_v37 }
 0xe63   :  { %4219 = vpow2.f32 %v3561_v42 }
 0xe64   :  { %4221 = vpow2.f32 %v3562_v52 }
 0xe68   :  { %v4216_v39 = vpop.eup %4215 }
 0xe69   :  { %1956 = vrot.lane.b32.xlu0 %v4216_v39, %s4521_s2 }
 0xe6c   :  { %v4218_v43 = vpop.eup %4217  ;;  %v107_v47 = vpop.permute.xlu0 %106 }
 0xe6d   :  { %vm177_vm13 = vcmp.eq.s32.totalorder %v4801_v51, %v107_v47  ;;  %1958 = vrot.lane.b32.xlu1 %v4218_v43, %s4521_s2  ;;  %v4220_v40 = vpop.eup %4219 }
 0xe6e   :  { %3509 = vmatmul.mubr.msk.f32.gmra.mrb[24].mxu1 %vm177_vm13, %v4520_v61  ;;  %v1922_v46 = vadd.f32 1.0, %v4220_v40  ;;  %v4222_v55 = vpop.eup %4221 }
 0xe6f   :  { %884 = vmatprep.mubr.f32.mxu1 %v4519_v5  ;;  %v1923_v44 = vadd.f32 1.0, %v4222_v55 }
 0xe70   :  { %v110_v36 = vpop.permute.xlu1 %109  ;;  %4223 = vrcp.f32 %v1922_v46 }
 0xe71   :  { %vm178_vm14 = vcmp.eq.s32.totalorder %v4801_v51, %v110_v36  ;;  %4225 = vrcp.f32 %v1923_v44 }
 0xe72   :  { %3510 = vmatmul.mubr.msk.f32.gmra.mrb[26].mxu1 %vm178_vm14, %v4520_v61 }
 0xe73   :  { %890 = vmatprep.mubr.f32.mxu1 %v4519_v5 }
 0xe7a   :  { %v4224_v49 = vpop.eup %4223 }
 0xe7b   :  { %v4226_v54 = vpop.eup %4225 }
 0xedb   :  { %v1957_v57 = vpop.permute.xlu0 %1956 }
 0xedc   :  { %v1962_v48 = vmul.f32 %v4224_v49, %v1957_v57 }
 0xede   :  { %3563 = vmatmul.mubr.msk.f32.vlgmr.msra.gmra.mrb[24].mxu0 %vm1083_vm4, %v1962_v48 }
 0xedf   :  { %v1959_v58 = vpop.permute.xlu1 %1958  ;;  %2045 = vmatprep.mubr.f32.mxu0 %v4519_v5  ;;  %3802 = vmatpush1.bf16.msra.mxu0 %v4776_v29 }
 0xee0   :  { %v1963_v53 = vmul.f32 %v4226_v54, %v1959_v58  ;;  %3804 = vmatprep.subr.bf16.mxu0 %v4779_v34 }
 0xee2   :  { %3564 = vmatmul.mubr.msk.f32.gmra.mrb[26].mxu0 %vm1083_vm4, %v1963_v53 }
 0xee3   :  { %3806 = vmatpush1.bf16.msra.mxu0 %v4781_v35  ;;  %2187 = vmatprep.mubr.f32.mxu0 %v4519_v5 }
 0xee4   :  { %3808 = vmatprep.subr.bf16.mxu0 %v4785_v38 }
 0xee7   :  { %3810 = vmatpush1.bf16.msra.mxu0 %v4787_v41 }
 0xee8   :  { %3812 = vmatprep.subr.bf16.mxu0 %v4791_v45 }
 0xeeb   :  { %3814 = vmatpush1.bf16.msra.mxu0 %v4799_v50 }
 0xeec   :  { %3816 = vmatprep.subr.bf16.mxu0 %v4773_v26 }
 0xf41   :  { %v880_v56 = vpop.f32.mrb[24].mxu1 }
 0xf42   :  { %v882_v59 = vpop.f32.mrb[25].mxu1 }
 0xf45   :  { %v886_v60 = vpop.f32.mrb[26].mxu1 }
 0xf46   :  { %v888_v62 = vpop.f32.mrb[27].mxu1 }
 0xfb1   :  { %v2041_v63 = vpop.f32.mrb[24].mxu0 }
 0xfb2   :  { %v3967_v0 = vadd.f32 %v2041_v63, %v880_v56  ;;  %v2043_v1 = vpop.f32.mrb[25].mxu0 }
 0xfb3   :  { %v3968_v2 = vadd.f32 %v2043_v1, %v882_v59 }
 0xfb4   :  { %v3565_v10 = vmul.f32 -1.442695, %v3967_v0 }
 0xfb5   :  { %4227 = vtanh.f32 %v3968_v2  ;;  %v2047_v3 = vpop.f32.mrb[26].mxu0 }
 0xfb6   :  { %v3969_v4 = vadd.f32 %v2047_v3, %v886_v60  ;;  %v2049_v6 = vpop.f32.mrb[27].mxu0 }
 0xfb7   :  { %v3970_v7 = vadd.f32 %v2049_v6, %v888_v62 }
 0xfb8   :  { %v3566_v11 = vmul.f32 -1.442695, %v3969_v4 }
 0xfb9   :  { %4229 = vtanh.f32 %v3970_v7  ;;  %v3568_v47 = vmul.f32 -1.442695, %v3970_v7 }
 0xfba   :  { %4231 = vpow2.f32 %v3565_v10 }
 0xfbb   :  { %4233 = vpow2.f32 %v3566_v11 }
 0xfbf   :  { %v4228_v8 = vpop.eup %4227 }
 0xfc0   :  { %2082 = vrot.lane.b32.xlu0 %v4228_v8, %s4521_s2 }
 0xfc3   :  { %v4230_v9 = vpop.eup %4229 }
 0xfc4   :  { %2084 = vrot.lane.b32.xlu1 %v4230_v9, %s4521_s2  ;;  %v4232_v12 = vpop.eup %4231 }
 0xfc5   :  { %v2058_v13 = vadd.f32 1.0, %v4232_v12  ;;  %v4234_v14 = vpop.eup %4233 }
 0xfc6   :  { %v2059_v15 = vadd.f32 1.0, %v4234_v14 }
 0xfc7   :  { %4235 = vrcp.f32 %v2058_v13 }
 0xfc8   :  { %4237 = vrcp.f32 %v2059_v15 }
 0xfd1   :  { %v4236_v16 = vpop.eup %4235 }
 0xfd2   :  { %v4238_v19 = vpop.eup %4237  ;;  %v2078_v24 = vmul.f32 %v4236_v16, %v5203_v31 }
 0xfd3   :  { %v2079_v28 = vmul.f32 %v4238_v19, %v5207_v37  ;;  %v3567_v37 = vmul.f32 -1.442695, %v3968_v2 }
0x1032   :  { %v2083_v17 = vpop.permute.xlu0 %2082 }
0x1033   :  { %v2088_v18 = vmul.f32 %v4236_v16, %v2083_v17 }
0x1035   :  { %2092 = vrot.lane.b32.xlu0 %v2088_v18, %s4521_s2  ;;  %v53_v18 = vld [vmem:[%s5583_s0 + $0x80] sm:$0xff] }
0x1036   :  { %v2085_v20 = vpop.permute.xlu1 %2084 }
0x1037   :  { %v2089_v22 = vmul.f32 %v4238_v19, %v2085_v20  ;;  %v54_v20 = vld [vmem:[%s5583_s0 + $0x88] sm:$0xff] }
0x1039   :  { %112 = vperm.xlu0 %4081, %v51_v21   ;;  %2094 = vrot.lane.b32.xlu1 %v2089_v22, %s4521_s2 }
0x103d   :  { %115 = vperm.xlu1 %4082, %v52_v23  }
0x10a7   :  { %v2093_v25 = vpop.permute.xlu0 %2092 }
0x10a8   :  { %v5241_v27 = vadd.f32 %v2093_v25, %v2078_v24 }
0x10aa   :  { %4239 = vtanh.f32 %v5241_v27 }
0x10ab   :  { %v2095_v30 = vpop.permute.xlu1 %2094 }
0x10ac   :  { %v5245_v32 = vadd.f32 %v2095_v30, %v2079_v28 }
0x10ae   :  { %4241 = vtanh.f32 %v5245_v32 }
0x10af   :  { %4243 = vpow2.f32 %v3567_v37 }
0x10b0   :  { %4245 = vpow2.f32 %v3568_v47 }
0x10b4   :  { %v4240_v33 = vpop.eup %4239 }
0x10b5   :  { %2104 = vrot.lane.b32.xlu0 %v4240_v33, %s4521_s2 }
0x10b8   :  { %v4242_v39 = vpop.eup %4241  ;;  %v113_v43 = vpop.permute.xlu0 %112 }
0x10b9   :  { %vm179_vm15 = vcmp.eq.s32.totalorder %v4801_v51, %v113_v43  ;;  %2106 = vrot.lane.b32.xlu1 %v4242_v39, %s4521_s2  ;;  %v4244_v36 = vpop.eup %4243 }
0x10ba   :  { %3511 = vmatmul.mubr.msk.f32.gmra.mrb[28].mxu1 %vm179_vm15, %v4520_v61  ;;  %v2070_v42 = vadd.f32 1.0, %v4244_v36  ;;  %v4246_v52 = vpop.eup %4245 }
0x10bb   :  { %896 = vmatprep.mubr.f32.mxu1 %v4519_v5  ;;  %v2071_v40 = vadd.f32 1.0, %v4246_v52 }
0x10bc   :  { %v116_v31 = vpop.permute.xlu1 %115  ;;  %4247 = vrcp.f32 %v2070_v42 }
0x10bd   :  { %vm180_vm0 = vcmp.eq.s32.totalorder %v4801_v51, %v116_v31  ;;  %4249 = vrcp.f32 %v2071_v40 }
0x10be   :  { %3512 = vmatmul.mubr.msk.f32.gmra.mrb[30].mxu1 %vm180_vm0, %v4520_v61 }
0x10bf   :  { %902 = vmatprep.mubr.f32.mxu1 %v4519_v5 }
0x10c6   :  { %v4248_v46 = vpop.eup %4247 }
0x10c7   :  { %v4250_v49 = vpop.eup %4249 }
0x1127   :  { %v2105_v55 = vpop.permute.xlu0 %2104 }
0x1128   :  { %v2110_v44 = vmul.f32 %v4248_v46, %v2105_v55 }
0x112a   :  { %3569 = vmatmul.mubr.msk.f32.vlgmr.msra.gmra.mrb[28].mxu0 %vm1083_vm4, %v2110_v44 }
0x112b   :  { %v2107_v57 = vpop.permute.xlu1 %2106  ;;  %2193 = vmatprep.mubr.f32.mxu0 %v4519_v5  ;;  %3818 = vmatpush1.bf16.msra.mxu0 %v4776_v29 }
0x112c   :  { %v2111_v48 = vmul.f32 %v4250_v49, %v2107_v57  ;;  %3820 = vmatprep.subr.bf16.mxu0 %v4779_v34 }
0x112e   :  { %3570 = vmatmul.mubr.msk.f32.gmra.mrb[30].mxu0 %vm1083_vm4, %v2111_v48 }
0x112f   :  { %3822 = vmatpush1.bf16.msra.mxu0 %v4781_v35  ;;  %2335 = vmatprep.mubr.f32.mxu0 %v4519_v5 }
0x1130   :  { %3824 = vmatprep.subr.bf16.mxu0 %v4785_v38 }
0x1133   :  { %3826 = vmatpush1.bf16.msra.mxu0 %v4787_v41 }
0x1134   :  { %3828 = vmatprep.subr.bf16.mxu0 %v4791_v45 }
0x1137   :  { %3830 = vmatpush1.bf16.msra.mxu0 %v4799_v50 }
0x1138   :  { %3832 = vmatprep.subr.bf16.mxu0 %v4773_v26 }
0x118d   :  { %v892_v54 = vpop.f32.mrb[28].mxu1 }
0x118e   :  { %v894_v58 = vpop.f32.mrb[29].mxu1 }
0x1191   :  { %v898_v53 = vpop.f32.mrb[30].mxu1 }
0x1192   :  { %v900_v56 = vpop.f32.mrb[31].mxu1 }
0x11fd   :  { %v2189_v59 = vpop.f32.mrb[28].mxu0 }
0x11fe   :  { %v3971_v60 = vadd.f32 %v2189_v59, %v892_v54  ;;  %v2191_v62 = vpop.f32.mrb[29].mxu0 }
0x11ff   :  { %v3972_v63 = vadd.f32 %v2191_v62, %v894_v58 }
0x1200   :  { %v3571_v7 = vmul.f32 -1.442695, %v3971_v60 }
0x1201   :  { %4251 = vtanh.f32 %v3972_v63  ;;  %v2195_v0 = vpop.f32.mrb[30].mxu0 }
0x1202   :  { %v3973_v1 = vadd.f32 %v2195_v0, %v898_v53  ;;  %v2197_v2 = vpop.f32.mrb[31].mxu0 }
0x1203   :  { %v3974_v3 = vadd.f32 %v2197_v2, %v900_v56 }
0x1204   :  { %v3572_v8 = vmul.f32 -1.442695, %v3973_v1 }
0x1205   :  { %4253 = vtanh.f32 %v3974_v3  ;;  %v3574_v43 = vmul.f32 -1.442695, %v3974_v3 }
0x1206   :  { %4255 = vpow2.f32 %v3571_v7 }
0x1207   :  { %4257 = vpow2.f32 %v3572_v8 }
0x120b   :  { %v4252_v4 = vpop.eup %4251 }
0x120c   :  { %2230 = vrot.lane.b32.xlu0 %v4252_v4, %s4521_s2 }
0x120f   :  { %v4254_v6 = vpop.eup %4253 }
0x1210   :  { %2232 = vrot.lane.b32.xlu1 %v4254_v6, %s4521_s2  ;;  %v4256_v9 = vpop.eup %4255 }
0x1211   :  { %v2206_v10 = vadd.f32 1.0, %v4256_v9  ;;  %v4258_v11 = vpop.eup %4257 }
0x1212   :  { %v2207_v12 = vadd.f32 1.0, %v4258_v11 }
0x1213   :  { %4259 = vrcp.f32 %v2206_v10 }
0x1214   :  { %4261 = vrcp.f32 %v2207_v12 }
0x121d   :  { %v4260_v13 = vpop.eup %4259 }
0x121e   :  { %v4262_v16 = vpop.eup %4261  ;;  %v2226_v21 = vmul.f32 %v4260_v13, %v5241_v27 }
0x121f   :  { %v2227_v24 = vmul.f32 %v4262_v16, %v5245_v32  ;;  %v3573_v32 = vmul.f32 -1.442695, %v3972_v63 }
0x127e   :  { %v2231_v14 = vpop.permute.xlu0 %2230 }
0x127f   :  { %v2236_v15 = vmul.f32 %v4260_v13, %v2231_v14 }
0x1281   :  { %2240 = vrot.lane.b32.xlu0 %v2236_v15, %s4521_s2  ;;  %v55_v15 = vld [vmem:[%s5583_s0 + $0x90] sm:$0xff] }
0x1282   :  { %v2233_v17 = vpop.permute.xlu1 %2232 }
0x1283   :  { %v2237_v19 = vmul.f32 %v4262_v16, %v2233_v17  ;;  %v56_v17 = vld [vmem:[%s5583_s0 + $0x98] sm:$0xff] }
0x1285   :  { %118 = vperm.xlu0 %4081, %v53_v18   ;;  %2242 = vrot.lane.b32.xlu1 %v2237_v19, %s4521_s2 }
0x1289   :  { %121 = vperm.xlu1 %4082, %v54_v20  }
0x12f3   :  { %v2241_v22 = vpop.permute.xlu0 %2240 }
0x12f4   :  { %v5279_v23 = vadd.f32 %v2241_v22, %v2226_v21 }
0x12f6   :  { %4263 = vtanh.f32 %v5279_v23 }
0x12f7   :  { %v2243_v25 = vpop.permute.xlu1 %2242 }
0x12f8   :  { %v5283_v28 = vadd.f32 %v2243_v25, %v2227_v24 }
0x12fa   :  { %4265 = vtanh.f32 %v5283_v28 }
0x12fb   :  { %4267 = vpow2.f32 %v3573_v32 }
0x12fc   :  { %4269 = vpow2.f32 %v3574_v43 }
0x1300   :  { %v4264_v30 = vpop.eup %4263 }
0x1301   :  { %2252 = vrot.lane.b32.xlu0 %v4264_v30, %s4521_s2 }
0x1304   :  { %v4266_v33 = vpop.eup %4265  ;;  %v119_v39 = vpop.permute.xlu0 %118 }
0x1305   :  { %vm181_vm1 = vcmp.eq.s32.totalorder %v4801_v51, %v119_v39  ;;  %2254 = vrot.lane.b32.xlu1 %v4266_v33, %s4521_s2  ;;  %v4268_v31 = vpop.eup %4267 }
0x1306   :  { %3513 = vmatmul.mubr.msk.f32.gmra.mrb[32].mxu1 %vm181_vm1, %v4520_v61  ;;  %v2218_v37 = vadd.f32 1.0, %v4268_v31  ;;  %v4270_v47 = vpop.eup %4269 }
0x1307   :  { %908 = vmatprep.mubr.f32.mxu1 %v4519_v5  ;;  %v2219_v36 = vadd.f32 1.0, %v4270_v47 }
0x1308   :  { %v122_v27 = vpop.permute.xlu1 %121  ;;  %4271 = vrcp.f32 %v2218_v37 }
0x1309   :  { %vm182_vm2 = vcmp.eq.s32.totalorder %v4801_v51, %v122_v27  ;;  %4273 = vrcp.f32 %v2219_v36 }
0x130a   :  { %3514 = vmatmul.mubr.msk.f32.gmra.mrb[34].mxu1 %vm182_vm2, %v4520_v61 }
0x130b   :  { %914 = vmatprep.mubr.f32.mxu1 %v4519_v5 }
0x1312   :  { %v4272_v42 = vpop.eup %4271 }
0x1313   :  { %v4274_v46 = vpop.eup %4273 }
0x1373   :  { %v2253_v52 = vpop.permute.xlu0 %2252 }
0x1374   :  { %v2258_v40 = vmul.f32 %v4272_v42, %v2253_v52 }
0x1376   :  { %3575 = vmatmul.mubr.msk.f32.vlgmr.msra.gmra.mrb[32].mxu0 %vm1083_vm4, %v2258_v40 }
0x1377   :  { %v2255_v55 = vpop.permute.xlu1 %2254  ;;  %2341 = vmatprep.mubr.f32.mxu0 %v4519_v5  ;;  %3834 = vmatpush1.bf16.msra.mxu0 %v4776_v29 }
0x1378   :  { %v2259_v44 = vmul.f32 %v4274_v46, %v2255_v55  ;;  %3836 = vmatprep.subr.bf16.mxu0 %v4779_v34 }
0x137a   :  { %3576 = vmatmul.mubr.msk.f32.gmra.mrb[34].mxu0 %vm1083_vm4, %v2259_v44 }
0x137b   :  { %3838 = vmatpush1.bf16.msra.mxu0 %v4781_v35  ;;  %2483 = vmatprep.mubr.f32.mxu0 %v4519_v5 }
0x137c   :  { %3840 = vmatprep.subr.bf16.mxu0 %v4785_v38 }
0x137f   :  { %3842 = vmatpush1.bf16.msra.mxu0 %v4787_v41 }
0x1380   :  { %3844 = vmatprep.subr.bf16.mxu0 %v4791_v45 }
0x1383   :  { %3846 = vmatpush1.bf16.msra.mxu0 %v4799_v50 }
0x1384   :  { %3848 = vmatprep.subr.bf16.mxu0 %v4773_v26 }
0x13d9   :  { %v904_v49 = vpop.f32.mrb[32].mxu1 }
0x13da   :  { %v906_v57 = vpop.f32.mrb[33].mxu1 }
0x13dd   :  { %v910_v48 = vpop.f32.mrb[34].mxu1 }
0x13de   :  { %v912_v54 = vpop.f32.mrb[35].mxu1 }
0x1449   :  { %v2337_v58 = vpop.f32.mrb[32].mxu0 }
0x144a   :  { %v3975_v53 = vadd.f32 %v2337_v58, %v904_v49  ;;  %v2339_v56 = vpop.f32.mrb[33].mxu0 }
0x144b   :  { %v3976_v59 = vadd.f32 %v2339_v56, %v906_v57 }
0x144c   :  { %v3577_v3 = vmul.f32 -1.442695, %v3975_v53 }
0x144d   :  { %4275 = vtanh.f32 %v3976_v59  ;;  %v2343_v60 = vpop.f32.mrb[34].mxu0 }
0x144e   :  { %v3977_v62 = vadd.f32 %v2343_v60, %v910_v48  ;;  %v2345_v63 = vpop.f32.mrb[35].mxu0 }
0x144f   :  { %v3978_v0 = vadd.f32 %v2345_v63, %v912_v54 }
0x1450   :  { %v3578_v4 = vmul.f32 -1.442695, %v3977_v62 }
0x1451   :  { %4277 = vtanh.f32 %v3978_v0  ;;  %v3580_v39 = vmul.f32 -1.442695, %v3978_v0 }
0x1452   :  { %4279 = vpow2.f32 %v3577_v3 }
0x1453   :  { %4281 = vpow2.f32 %v3578_v4 }
0x1457   :  { %v4276_v1 = vpop.eup %4275 }
0x1458   :  { %2378 = vrot.lane.b32.xlu0 %v4276_v1, %s4521_s2 }
0x145b   :  { %v4278_v2 = vpop.eup %4277 }
0x145c   :  { %2380 = vrot.lane.b32.xlu1 %v4278_v2, %s4521_s2  ;;  %v4280_v6 = vpop.eup %4279 }
0x145d   :  { %v2354_v7 = vadd.f32 1.0, %v4280_v6  ;;  %v4282_v8 = vpop.eup %4281 }
0x145e   :  { %v2355_v9 = vadd.f32 1.0, %v4282_v8 }
0x145f   :  { %4283 = vrcp.f32 %v2354_v7 }
0x1460   :  { %4285 = vrcp.f32 %v2355_v9 }
0x1469   :  { %v4284_v10 = vpop.eup %4283 }
0x146a   :  { %v4286_v13 = vpop.eup %4285  ;;  %v2374_v18 = vmul.f32 %v4284_v10, %v5279_v23 }
0x146b   :  { %v2375_v21 = vmul.f32 %v4286_v13, %v5283_v28  ;;  %v3579_v28 = vmul.f32 -1.442695, %v3976_v59 }
0x14ca   :  { %v2379_v11 = vpop.permute.xlu0 %2378 }
0x14cb   :  { %v2384_v12 = vmul.f32 %v4284_v10, %v2379_v11 }
0x14cd   :  { %2388 = vrot.lane.b32.xlu0 %v2384_v12, %s4521_s2  ;;  %v57_v12 = vld [vmem:[%s5583_s0 + $0xa0] sm:$0xff] }
0x14ce   :  { %v2381_v14 = vpop.permute.xlu1 %2380 }
0x14cf   :  { %v2385_v16 = vmul.f32 %v4286_v13, %v2381_v14  ;;  %v58_v14 = vld [vmem:[%s5583_s0 + $0xa8] sm:$0xff] }
0x14d1   :  { %124 = vperm.xlu0 %4081, %v55_v15   ;;  %2390 = vrot.lane.b32.xlu1 %v2385_v16, %s4521_s2 }
0x14d5   :  { %127 = vperm.xlu1 %4082, %v56_v17  }
0x153f   :  { %v2389_v19 = vpop.permute.xlu0 %2388 }
0x1540   :  { %v5317_v20 = vadd.f32 %v2389_v19, %v2374_v18 }
0x1542   :  { %4287 = vtanh.f32 %v5317_v20 }
0x1543   :  { %v2391_v22 = vpop.permute.xlu1 %2390 }
0x1544   :  { %v5321_v24 = vadd.f32 %v2391_v22, %v2375_v21 }
0x1546   :  { %4289 = vtanh.f32 %v5321_v24 }
0x1547   :  { %4291 = vpow2.f32 %v3579_v28 }
0x1548   :  { %4293 = vpow2.f32 %v3580_v39 }
0x154c   :  { %v4288_v25 = vpop.eup %4287 }
0x154d   :  { %2400 = vrot.lane.b32.xlu0 %v4288_v25, %s4521_s2 }
0x1550   :  { %v4290_v30 = vpop.eup %4289  ;;  %v125_v33 = vpop.permute.xlu0 %124 }
0x1551   :  { %vm183_vm3 = vcmp.eq.s32.totalorder %v4801_v51, %v125_v33  ;;  %2402 = vrot.lane.b32.xlu1 %v4290_v30, %s4521_s2  ;;  %v4292_v27 = vpop.eup %4291 }
0x1552   :  { %3515 = vmatmul.mubr.msk.f32.gmra.mrb[36].mxu1 %vm183_vm3, %v4520_v61  ;;  %v2366_v32 = vadd.f32 1.0, %v4292_v27  ;;  %v4294_v43 = vpop.eup %4293 }
0x1553   :  { %920 = vmatprep.mubr.f32.mxu1 %v4519_v5  ;;  %v2367_v31 = vadd.f32 1.0, %v4294_v43 }
0x1554   :  { %v128_v23 = vpop.permute.xlu1 %127  ;;  %4295 = vrcp.f32 %v2366_v32 }
0x1555   :  { %vm184_vm5 = vcmp.eq.s32.totalorder %v4801_v51, %v128_v23  ;;  %4297 = vrcp.f32 %v2367_v31 }
0x1556   :  { %3516 = vmatmul.mubr.msk.f32.gmra.mrb[38].mxu1 %vm184_vm5, %v4520_v61 }
0x1557   :  { %926 = vmatprep.mubr.f32.mxu1 %v4519_v5 }
0x155e   :  { %v4296_v37 = vpop.eup %4295 }
0x155f   :  { %v4298_v42 = vpop.eup %4297 }
0x15bf   :  { %v2401_v47 = vpop.permute.xlu0 %2400 }
0x15c0   :  { %v2406_v36 = vmul.f32 %v4296_v37, %v2401_v47 }
0x15c2   :  { %3581 = vmatmul.mubr.msk.f32.vlgmr.msra.gmra.mrb[36].mxu0 %vm1083_vm4, %v2406_v36 }
0x15c3   :  { %v2403_v52 = vpop.permute.xlu1 %2402  ;;  %2489 = vmatprep.mubr.f32.mxu0 %v4519_v5  ;;  %3850 = vmatpush1.bf16.msra.mxu0 %v4776_v29 }
0x15c4   :  { %v2407_v40 = vmul.f32 %v4298_v42, %v2403_v52  ;;  %3852 = vmatprep.subr.bf16.mxu0 %v4779_v34 }
0x15c6   :  { %3582 = vmatmul.mubr.msk.f32.gmra.mrb[38].mxu0 %vm1083_vm4, %v2407_v40 }
0x15c7   :  { %3854 = vmatpush1.bf16.msra.mxu0 %v4781_v35  ;;  %2631 = vmatprep.mubr.f32.mxu0 %v4519_v5 }
0x15c8   :  { %3856 = vmatprep.subr.bf16.mxu0 %v4785_v38 }
0x15cb   :  { %3858 = vmatpush1.bf16.msra.mxu0 %v4787_v41 }
0x15cc   :  { %3860 = vmatprep.subr.bf16.mxu0 %v4791_v45 }
0x15cf   :  { %3862 = vmatpush1.bf16.msra.mxu0 %v4799_v50 }
0x15d0   :  { %3864 = vmatprep.subr.bf16.mxu0 %v4773_v26 }
0x1625   :  { %v916_v46 = vpop.f32.mrb[36].mxu1 }
0x1626   :  { %v918_v55 = vpop.f32.mrb[37].mxu1 }
0x1629   :  { %v922_v44 = vpop.f32.mrb[38].mxu1 }
0x162a   :  { %v924_v49 = vpop.f32.mrb[39].mxu1 }
0x1695   :  { %v2485_v57 = vpop.f32.mrb[36].mxu0 }
0x1696   :  { %v3979_v48 = vadd.f32 %v2485_v57, %v916_v46  ;;  %v2487_v54 = vpop.f32.mrb[37].mxu0 }
0x1697   :  { %v3980_v58 = vadd.f32 %v2487_v54, %v918_v55 }
0x1698   :  { %v3583_v0 = vmul.f32 -1.442695, %v3979_v48 }
0x1699   :  { %4299 = vtanh.f32 %v3980_v58  ;;  %v2491_v53 = vpop.f32.mrb[38].mxu0 }
0x169a   :  { %v3981_v56 = vadd.f32 %v2491_v53, %v922_v44  ;;  %v2493_v59 = vpop.f32.mrb[39].mxu0 }
0x169b   :  { %v3982_v60 = vadd.f32 %v2493_v59, %v924_v49 }
0x169c   :  { %v3584_v1 = vmul.f32 -1.442695, %v3981_v56 }
0x169d   :  { %4301 = vtanh.f32 %v3982_v60  ;;  %v3586_v33 = vmul.f32 -1.442695, %v3982_v60 }
0x169e   :  { %4303 = vpow2.f32 %v3583_v0 }
0x169f   :  { %4305 = vpow2.f32 %v3584_v1 }
0x16a3   :  { %v4300_v62 = vpop.eup %4299 }
0x16a4   :  { %2526 = vrot.lane.b32.xlu0 %v4300_v62, %s4521_s2 }
0x16a7   :  { %v4302_v63 = vpop.eup %4301 }
0x16a8   :  { %2528 = vrot.lane.b32.xlu1 %v4302_v63, %s4521_s2  ;;  %v4304_v2 = vpop.eup %4303 }
0x16a9   :  { %v2502_v3 = vadd.f32 1.0, %v4304_v2  ;;  %v4306_v4 = vpop.eup %4305 }
0x16aa   :  { %v2503_v6 = vadd.f32 1.0, %v4306_v4 }
0x16ab   :  { %4307 = vrcp.f32 %v2502_v3 }
0x16ac   :  { %4309 = vrcp.f32 %v2503_v6 }
0x16b5   :  { %v4308_v7 = vpop.eup %4307 }
0x16b6   :  { %v4310_v10 = vpop.eup %4309  ;;  %v2522_v15 = vmul.f32 %v4308_v7, %v5317_v20 }
0x16b7   :  { %v2523_v18 = vmul.f32 %v4310_v10, %v5321_v24  ;;  %v3585_v24 = vmul.f32 -1.442695, %v3980_v58 }
0x1716   :  { %v2527_v8 = vpop.permute.xlu0 %2526 }
0x1717   :  { %v2532_v9 = vmul.f32 %v4308_v7, %v2527_v8 }
0x1719   :  { %2536 = vrot.lane.b32.xlu0 %v2532_v9, %s4521_s2  ;;  %v59_v9 = vld [vmem:[%s5583_s0 + $0xb0] sm:$0xff] }
0x171a   :  { %v2529_v11 = vpop.permute.xlu1 %2528 }
0x171b   :  { %v2533_v13 = vmul.f32 %v4310_v10, %v2529_v11  ;;  %v60_v11 = vld [vmem:[%s5583_s0 + $0xb8] sm:$0xff] }
0x171d   :  { %130 = vperm.xlu0 %4081, %v57_v12   ;;  %2538 = vrot.lane.b32.xlu1 %v2533_v13, %s4521_s2 }
0x1721   :  { %133 = vperm.xlu1 %4082, %v58_v14  }
0x178b   :  { %v2537_v16 = vpop.permute.xlu0 %2536 }
0x178c   :  { %v5355_v17 = vadd.f32 %v2537_v16, %v2522_v15 }
0x178e   :  { %4311 = vtanh.f32 %v5355_v17 }
0x178f   :  { %v2539_v19 = vpop.permute.xlu1 %2538 }
0x1790   :  { %v5359_v21 = vadd.f32 %v2539_v19, %v2523_v18 }
0x1792   :  { %4313 = vtanh.f32 %v5359_v21 }
0x1793   :  { %4315 = vpow2.f32 %v3585_v24 }
0x1794   :  { %4317 = vpow2.f32 %v3586_v33 }
0x1798   :  { %v4312_v22 = vpop.eup %4311 }
0x1799   :  { %2548 = vrot.lane.b32.xlu0 %v4312_v22, %s4521_s2 }
0x179c   :  { %v4314_v25 = vpop.eup %4313  ;;  %v131_v30 = vpop.permute.xlu0 %130 }
0x179d   :  { %vm185_vm6 = vcmp.eq.s32.totalorder %v4801_v51, %v131_v30  ;;  %2550 = vrot.lane.b32.xlu1 %v4314_v25, %s4521_s2  ;;  %v4316_v23 = vpop.eup %4315 }
0x179e   :  { %3517 = vmatmul.mubr.msk.f32.gmra.mrb[40].mxu1 %vm185_vm6, %v4520_v61  ;;  %v2514_v28 = vadd.f32 1.0, %v4316_v23  ;;  %v4318_v39 = vpop.eup %4317 }
0x179f   :  { %932 = vmatprep.mubr.f32.mxu1 %v4519_v5  ;;  %v2515_v27 = vadd.f32 1.0, %v4318_v39 }
0x17a0   :  { %v134_v20 = vpop.permute.xlu1 %133  ;;  %4319 = vrcp.f32 %v2514_v28 }
0x17a1   :  { %vm186_vm7 = vcmp.eq.s32.totalorder %v4801_v51, %v134_v20  ;;  %4321 = vrcp.f32 %v2515_v27 }
0x17a2   :  { %3518 = vmatmul.mubr.msk.f32.gmra.mrb[42].mxu1 %vm186_vm7, %v4520_v61 }
0x17a3   :  { %938 = vmatprep.mubr.f32.mxu1 %v4519_v5 }
0x17aa   :  { %v4320_v32 = vpop.eup %4319 }
0x17ab   :  { %v4322_v37 = vpop.eup %4321 }
0x180b   :  { %v2549_v43 = vpop.permute.xlu0 %2548 }
0x180c   :  { %v2554_v31 = vmul.f32 %v4320_v32, %v2549_v43 }
0x180e   :  { %3587 = vmatmul.mubr.msk.f32.vlgmr.msra.gmra.mrb[40].mxu0 %vm1083_vm4, %v2554_v31 }
0x180f   :  { %v2551_v47 = vpop.permute.xlu1 %2550  ;;  %2637 = vmatprep.mubr.f32.mxu0 %v4519_v5  ;;  %3866 = vmatpush1.bf16.msra.mxu0 %v4776_v29 }
0x1810   :  { %v2555_v36 = vmul.f32 %v4322_v37, %v2551_v47  ;;  %3868 = vmatprep.subr.bf16.mxu0 %v4779_v34 }
0x1812   :  { %3588 = vmatmul.mubr.msk.f32.gmra.mrb[42].mxu0 %vm1083_vm4, %v2555_v36 }
0x1813   :  { %3870 = vmatpush1.bf16.msra.mxu0 %v4781_v35  ;;  %2779 = vmatprep.mubr.f32.mxu0 %v4519_v5 }
0x1814   :  { %3872 = vmatprep.subr.bf16.mxu0 %v4785_v38 }
0x1817   :  { %3874 = vmatpush1.bf16.msra.mxu0 %v4787_v41 }
0x1818   :  { %3876 = vmatprep.subr.bf16.mxu0 %v4791_v45 }
0x181b   :  { %3878 = vmatpush1.bf16.msra.mxu0 %v4799_v50 }
0x181c   :  { %3880 = vmatprep.subr.bf16.mxu0 %v4773_v26 }
0x1871   :  { %v928_v42 = vpop.f32.mrb[40].mxu1 }
0x1872   :  { %v930_v52 = vpop.f32.mrb[41].mxu1 }
0x1875   :  { %v934_v40 = vpop.f32.mrb[42].mxu1 }
0x1876   :  { %v936_v46 = vpop.f32.mrb[43].mxu1 }
0x18e1   :  { %v2633_v55 = vpop.f32.mrb[40].mxu0 }
0x18e2   :  { %v3983_v44 = vadd.f32 %v2633_v55, %v928_v42  ;;  %v2635_v49 = vpop.f32.mrb[41].mxu0 }
0x18e3   :  { %v3984_v57 = vadd.f32 %v2635_v49, %v930_v52 }
0x18e4   :  { %v3589_v60 = vmul.f32 -1.442695, %v3983_v44 }
0x18e5   :  { %4323 = vtanh.f32 %v3984_v57  ;;  %v2639_v48 = vpop.f32.mrb[42].mxu0 }
0x18e6   :  { %v3985_v54 = vadd.f32 %v2639_v48, %v934_v40  ;;  %v2641_v58 = vpop.f32.mrb[43].mxu0 }
0x18e7   :  { %v3986_v53 = vadd.f32 %v2641_v58, %v936_v46 }
0x18e8   :  { %v3590_v62 = vmul.f32 -1.442695, %v3985_v54 }
0x18e9   :  { %4325 = vtanh.f32 %v3986_v53  ;;  %v3592_v30 = vmul.f32 -1.442695, %v3986_v53 }
0x18ea   :  { %4327 = vpow2.f32 %v3589_v60 }
0x18eb   :  { %4329 = vpow2.f32 %v3590_v62 }
0x18ef   :  { %v4324_v56 = vpop.eup %4323 }
0x18f0   :  { %2674 = vrot.lane.b32.xlu0 %v4324_v56, %s4521_s2 }
0x18f3   :  { %v4326_v59 = vpop.eup %4325 }
0x18f4   :  { %2676 = vrot.lane.b32.xlu1 %v4326_v59, %s4521_s2  ;;  %v4328_v63 = vpop.eup %4327 }
0x18f5   :  { %v2650_v0 = vadd.f32 1.0, %v4328_v63  ;;  %v4330_v1 = vpop.eup %4329 }
0x18f6   :  { %v2651_v2 = vadd.f32 1.0, %v4330_v1 }
0x18f7   :  { %4331 = vrcp.f32 %v2650_v0 }
0x18f8   :  { %4333 = vrcp.f32 %v2651_v2 }
0x1901   :  { %v4332_v3 = vpop.eup %4331 }
0x1902   :  { %v4334_v7 = vpop.eup %4333  ;;  %v2670_v12 = vmul.f32 %v4332_v3, %v5355_v17 }
0x1903   :  { %v2671_v15 = vmul.f32 %v4334_v7, %v5359_v21  ;;  %v3591_v21 = vmul.f32 -1.442695, %v3984_v57 }
0x1962   :  { %v2675_v4 = vpop.permute.xlu0 %2674 }
0x1963   :  { %v2680_v6 = vmul.f32 %v4332_v3, %v2675_v4 }
0x1965   :  { %2684 = vrot.lane.b32.xlu0 %v2680_v6, %s4521_s2  ;;  %v61_v6 = vld [vmem:[%s5583_s0 + $0xc0] sm:$0xff] }
0x1966   :  { %v2677_v8 = vpop.permute.xlu1 %2676 }
0x1967   :  { %v2681_v10 = vmul.f32 %v4334_v7, %v2677_v8  ;;  %v62_v8 = vld [vmem:[%s5583_s0 + $0xc8] sm:$0xff] }
0x1969   :  { %136 = vperm.xlu0 %4081, %v59_v9   ;;  %2686 = vrot.lane.b32.xlu1 %v2681_v10, %s4521_s2 }
0x196d   :  { %139 = vperm.xlu1 %4082, %v60_v11  }
0x19d7   :  { %v2685_v13 = vpop.permute.xlu0 %2684 }
0x19d8   :  { %v5393_v14 = vadd.f32 %v2685_v13, %v2670_v12 }
0x19da   :  { %4335 = vtanh.f32 %v5393_v14 }
0x19db   :  { %v2687_v16 = vpop.permute.xlu1 %2686 }
0x19dc   :  { %v5397_v18 = vadd.f32 %v2687_v16, %v2671_v15 }
0x19de   :  { %4337 = vtanh.f32 %v5397_v18 }
0x19df   :  { %4339 = vpow2.f32 %v3591_v21 }
0x19e0   :  { %4341 = vpow2.f32 %v3592_v30 }
0x19e4   :  { %v4336_v19 = vpop.eup %4335 }
0x19e5   :  { %2696 = vrot.lane.b32.xlu0 %v4336_v19, %s4521_s2 }
0x19e8   :  { %v4338_v22 = vpop.eup %4337  ;;  %v137_v25 = vpop.permute.xlu0 %136 }
0x19e9   :  { %vm187_vm8 = vcmp.eq.s32.totalorder %v4801_v51, %v137_v25  ;;  %2698 = vrot.lane.b32.xlu1 %v4338_v22, %s4521_s2  ;;  %v4340_v20 = vpop.eup %4339 }
0x19ea   :  { %3519 = vmatmul.mubr.msk.f32.gmra.mrb[44].mxu1 %vm187_vm8, %v4520_v61  ;;  %v2662_v24 = vadd.f32 1.0, %v4340_v20  ;;  %v4342_v33 = vpop.eup %4341 }
0x19eb   :  { %944 = vmatprep.mubr.f32.mxu1 %v4519_v5  ;;  %v2663_v23 = vadd.f32 1.0, %v4342_v33 }
0x19ec   :  { %v140_v17 = vpop.permute.xlu1 %139  ;;  %4343 = vrcp.f32 %v2662_v24 }
0x19ed   :  { %vm188_vm9 = vcmp.eq.s32.totalorder %v4801_v51, %v140_v17  ;;  %4345 = vrcp.f32 %v2663_v23 }
0x19ee   :  { %3520 = vmatmul.mubr.msk.f32.gmra.mrb[46].mxu1 %vm188_vm9, %v4520_v61 }
0x19ef   :  { %950 = vmatprep.mubr.f32.mxu1 %v4519_v5 }
0x19f6   :  { %v4344_v28 = vpop.eup %4343 }
0x19f7   :  { %v4346_v32 = vpop.eup %4345 }
0x1a57   :  { %v2697_v39 = vpop.permute.xlu0 %2696 }
0x1a58   :  { %v2702_v27 = vmul.f32 %v4344_v28, %v2697_v39 }
0x1a5a   :  { %3593 = vmatmul.mubr.msk.f32.vlgmr.msra.gmra.mrb[44].mxu0 %vm1083_vm4, %v2702_v27 }
0x1a5b   :  { %v2699_v43 = vpop.permute.xlu1 %2698  ;;  %2785 = vmatprep.mubr.f32.mxu0 %v4519_v5  ;;  %3882 = vmatpush1.bf16.msra.mxu0 %v4776_v29 }
0x1a5c   :  { %v2703_v31 = vmul.f32 %v4346_v32, %v2699_v43  ;;  %3884 = vmatprep.subr.bf16.mxu0 %v4779_v34 }
0x1a5e   :  { %3594 = vmatmul.mubr.msk.f32.gmra.mrb[46].mxu0 %vm1083_vm4, %v2703_v31 }
0x1a5f   :  { %3886 = vmatpush1.bf16.msra.mxu0 %v4781_v35  ;;  %2927 = vmatprep.mubr.f32.mxu0 %v4519_v5 }
0x1a60   :  { %3888 = vmatprep.subr.bf16.mxu0 %v4785_v38 }
0x1a63   :  { %3890 = vmatpush1.bf16.msra.mxu0 %v4787_v41 }
0x1a64   :  { %3892 = vmatprep.subr.bf16.mxu0 %v4791_v45 }
0x1a67   :  { %3894 = vmatpush1.bf16.msra.mxu0 %v4799_v50 }
0x1a68   :  { %3896 = vmatprep.subr.bf16.mxu0 %v4773_v26 }
0x1abd   :  { %v940_v37 = vpop.f32.mrb[44].mxu1 }
0x1abe   :  { %v942_v47 = vpop.f32.mrb[45].mxu1 }
0x1ac1   :  { %v946_v36 = vpop.f32.mrb[46].mxu1 }
0x1ac2   :  { %v948_v42 = vpop.f32.mrb[47].mxu1 }
0x1b2d   :  { %v2781_v52 = vpop.f32.mrb[44].mxu0 }
0x1b2e   :  { %v3987_v40 = vadd.f32 %v2781_v52, %v940_v37  ;;  %v2783_v46 = vpop.f32.mrb[45].mxu0 }
0x1b2f   :  { %v3988_v55 = vadd.f32 %v2783_v46, %v942_v47 }
0x1b30   :  { %v3595_v53 = vmul.f32 -1.442695, %v3987_v40 }
0x1b31   :  { %4347 = vtanh.f32 %v3988_v55  ;;  %v2787_v44 = vpop.f32.mrb[46].mxu0 }
0x1b32   :  { %v3989_v49 = vadd.f32 %v2787_v44, %v946_v36  ;;  %v2789_v57 = vpop.f32.mrb[47].mxu0 }
0x1b33   :  { %v3990_v48 = vadd.f32 %v2789_v57, %v948_v42 }
0x1b34   :  { %v3596_v56 = vmul.f32 -1.442695, %v3989_v49 }
0x1b35   :  { %4349 = vtanh.f32 %v3990_v48  ;;  %v3598_v25 = vmul.f32 -1.442695, %v3990_v48 }
0x1b36   :  { %4351 = vpow2.f32 %v3595_v53 }
0x1b37   :  { %4353 = vpow2.f32 %v3596_v56 }
0x1b3b   :  { %v4348_v54 = vpop.eup %4347 }
0x1b3c   :  { %2822 = vrot.lane.b32.xlu0 %v4348_v54, %s4521_s2 }
0x1b3f   :  { %v4350_v58 = vpop.eup %4349 }
0x1b40   :  { %2824 = vrot.lane.b32.xlu1 %v4350_v58, %s4521_s2  ;;  %v4352_v59 = vpop.eup %4351 }
0x1b41   :  { %v2798_v60 = vadd.f32 1.0, %v4352_v59  ;;  %v4354_v62 = vpop.eup %4353 }
0x1b42   :  { %v2799_v63 = vadd.f32 1.0, %v4354_v62 }
0x1b43   :  { %4355 = vrcp.f32 %v2798_v60 }
0x1b44   :  { %4357 = vrcp.f32 %v2799_v63 }
0x1b4d   :  { %v4356_v0 = vpop.eup %4355 }
0x1b4e   :  { %v4358_v3 = vpop.eup %4357  ;;  %v2818_v9 = vmul.f32 %v4356_v0, %v5393_v14 }
0x1b4f   :  { %v2819_v12 = vmul.f32 %v4358_v3, %v5397_v18  ;;  %v3597_v18 = vmul.f32 -1.442695, %v3988_v55 }
0x1bae   :  { %v2823_v1 = vpop.permute.xlu0 %2822 }
0x1baf   :  { %v2828_v2 = vmul.f32 %v4356_v0, %v2823_v1 }
0x1bb1   :  { %2832 = vrot.lane.b32.xlu0 %v2828_v2, %s4521_s2  ;;  %v63_v2 = vld [vmem:[%s5583_s0 + $0xd0] sm:$0xff] }
0x1bb2   :  { %v2825_v4 = vpop.permute.xlu1 %2824 }
0x1bb3   :  { %v2829_v7 = vmul.f32 %v4358_v3, %v2825_v4  ;;  %v64_v4 = vld [vmem:[%s5583_s0 + $0xd8] sm:$0xff] }
0x1bb5   :  { %142 = vperm.xlu0 %4081, %v61_v6   ;;  %2834 = vrot.lane.b32.xlu1 %v2829_v7, %s4521_s2 }
0x1bb9   :  { %145 = vperm.xlu1 %4082, %v62_v8  }
0x1c23   :  { %v2833_v10 = vpop.permute.xlu0 %2832 }
0x1c24   :  { %v5431_v11 = vadd.f32 %v2833_v10, %v2818_v9 }
0x1c26   :  { %4359 = vtanh.f32 %v5431_v11 }
0x1c27   :  { %v2835_v13 = vpop.permute.xlu1 %2834 }
0x1c28   :  { %v5435_v15 = vadd.f32 %v2835_v13, %v2819_v12 }
0x1c2a   :  { %4361 = vtanh.f32 %v5435_v15 }
0x1c2b   :  { %4363 = vpow2.f32 %v3597_v18 }
0x1c2c   :  { %4365 = vpow2.f32 %v3598_v25 }
0x1c30   :  { %v4360_v16 = vpop.eup %4359 }
0x1c31   :  { %2844 = vrot.lane.b32.xlu0 %v4360_v16, %s4521_s2 }
0x1c34   :  { %v4362_v19 = vpop.eup %4361  ;;  %v143_v22 = vpop.permute.xlu0 %142 }
0x1c35   :  { %vm189_vm10 = vcmp.eq.s32.totalorder %v4801_v51, %v143_v22  ;;  %2846 = vrot.lane.b32.xlu1 %v4362_v19, %s4521_s2  ;;  %v4364_v17 = vpop.eup %4363 }
0x1c36   :  { %3521 = vmatmul.mubr.msk.f32.gmra.mrb[48].mxu1 %vm189_vm10, %v4520_v61  ;;  %v2810_v21 = vadd.f32 1.0, %v4364_v17  ;;  %v4366_v30 = vpop.eup %4365 }
0x1c37   :  { %956 = vmatprep.mubr.f32.mxu1 %v4519_v5  ;;  %v2811_v20 = vadd.f32 1.0, %v4366_v30 }
0x1c38   :  { %v146_v14 = vpop.permute.xlu1 %145  ;;  %4367 = vrcp.f32 %v2810_v21 }
0x1c39   :  { %vm190_vm11 = vcmp.eq.s32.totalorder %v4801_v51, %v146_v14  ;;  %4369 = vrcp.f32 %v2811_v20 }
0x1c3a   :  { %3522 = vmatmul.mubr.msk.f32.gmra.mrb[50].mxu1 %vm190_vm11, %v4520_v61 }
0x1c3b   :  { %962 = vmatprep.mubr.f32.mxu1 %v4519_v5 }
0x1c42   :  { %v4368_v24 = vpop.eup %4367 }
0x1c43   :  { %v4370_v28 = vpop.eup %4369 }
0x1ca3   :  { %v2845_v33 = vpop.permute.xlu0 %2844 }
0x1ca4   :  { %v2850_v23 = vmul.f32 %v4368_v24, %v2845_v33 }
0x1ca6   :  { %3599 = vmatmul.mubr.msk.f32.vlgmr.msra.gmra.mrb[48].mxu0 %vm1083_vm4, %v2850_v23 }
0x1ca7   :  { %v2847_v39 = vpop.permute.xlu1 %2846  ;;  %2933 = vmatprep.mubr.f32.mxu0 %v4519_v5  ;;  %3898 = vmatpush1.bf16.msra.mxu0 %v4776_v29 }
0x1ca8   :  { %v2851_v27 = vmul.f32 %v4370_v28, %v2847_v39  ;;  %3900 = vmatprep.subr.bf16.mxu0 %v4779_v34 }
0x1caa   :  { %3600 = vmatmul.mubr.msk.f32.gmra.mrb[50].mxu0 %vm1083_vm4, %v2851_v27 }
0x1cab   :  { %3902 = vmatpush1.bf16.msra.mxu0 %v4781_v35  ;;  %3075 = vmatprep.mubr.f32.mxu0 %v4519_v5 }
0x1cac   :  { %3904 = vmatprep.subr.bf16.mxu0 %v4785_v38 }
0x1caf   :  { %3906 = vmatpush1.bf16.msra.mxu0 %v4787_v41 }
0x1cb0   :  { %3908 = vmatprep.subr.bf16.mxu0 %v4791_v45 }
0x1cb3   :  { %3910 = vmatpush1.bf16.msra.mxu0 %v4799_v50 }
0x1cb4   :  { %3912 = vmatprep.subr.bf16.mxu0 %v4773_v26 }
0x1d09   :  { %v952_v32 = vpop.f32.mrb[48].mxu1 }
0x1d0a   :  { %v954_v43 = vpop.f32.mrb[49].mxu1 }
0x1d0d   :  { %v958_v31 = vpop.f32.mrb[50].mxu1 }
0x1d0e   :  { %v960_v37 = vpop.f32.mrb[51].mxu1 }
0x1d79   :  { %v2929_v47 = vpop.f32.mrb[48].mxu0 }
0x1d7a   :  { %v3991_v36 = vadd.f32 %v2929_v47, %v952_v32  ;;  %v2931_v42 = vpop.f32.mrb[49].mxu0 }
0x1d7b   :  { %v3992_v52 = vadd.f32 %v2931_v42, %v954_v43 }
0x1d7c   :  { %v3601_v48 = vmul.f32 -1.442695, %v3991_v36 }
0x1d7d   :  { %4371 = vtanh.f32 %v3992_v52  ;;  %v2935_v40 = vpop.f32.mrb[50].mxu0 }
0x1d7e   :  { %v3993_v46 = vadd.f32 %v2935_v40, %v958_v31  ;;  %v2937_v55 = vpop.f32.mrb[51].mxu0 }
0x1d7f   :  { %v3994_v44 = vadd.f32 %v2937_v55, %v960_v37 }
0x1d80   :  { %v3602_v54 = vmul.f32 -1.442695, %v3993_v46 }
0x1d81   :  { %4373 = vtanh.f32 %v3994_v44  ;;  %v3604_v22 = vmul.f32 -1.442695, %v3994_v44 }
0x1d82   :  { %4375 = vpow2.f32 %v3601_v48 }
0x1d83   :  { %4377 = vpow2.f32 %v3602_v54 }
0x1d87   :  { %v4372_v49 = vpop.eup %4371 }
0x1d88   :  { %2970 = vrot.lane.b32.xlu0 %v4372_v49, %s4521_s2 }
0x1d8b   :  { %v4374_v57 = vpop.eup %4373 }
0x1d8c   :  { %2972 = vrot.lane.b32.xlu1 %v4374_v57, %s4521_s2  ;;  %v4376_v58 = vpop.eup %4375 }
0x1d8d   :  { %v2946_v53 = vadd.f32 1.0, %v4376_v58  ;;  %v4378_v56 = vpop.eup %4377 }
0x1d8e   :  { %v2947_v59 = vadd.f32 1.0, %v4378_v56 }
0x1d8f   :  { %4379 = vrcp.f32 %v2946_v53 }
0x1d90   :  { %4381 = vrcp.f32 %v2947_v59 }
0x1d99   :  { %v4380_v60 = vpop.eup %4379 }
0x1d9a   :  { %v4382_v0 = vpop.eup %4381  ;;  %v2966_v6 = vmul.f32 %v4380_v60, %v5431_v11 }
0x1d9b   :  { %v2967_v9 = vmul.f32 %v4382_v0, %v5435_v15  ;;  %v3603_v15 = vmul.f32 -1.442695, %v3992_v52 }
0x1dfa   :  { %v2971_v62 = vpop.permute.xlu0 %2970 }
0x1dfb   :  { %v2976_v63 = vmul.f32 %v4380_v60, %v2971_v62  ;;  %v65_v62 = vld [vmem:[%s5583_s0 + $0xe0] sm:$0xff] }
0x1dfd   :  { %2980 = vrot.lane.b32.xlu0 %v2976_v63, %s4521_s2 }
0x1dfe   :  { %v2973_v1 = vpop.permute.xlu1 %2972 }
0x1dff   :  { %v2977_v3 = vmul.f32 %v4382_v0, %v2973_v1  ;;  %v66_v0 = vld [vmem:[%s5583_s0 + $0xe8] sm:$0xff] }
0x1e01   :  { %148 = vperm.xlu0 %4081, %v63_v2   ;;  %2982 = vrot.lane.b32.xlu1 %v2977_v3, %s4521_s2 }
0x1e05   :  { %151 = vperm.xlu1 %4082, %v64_v4  }
0x1e6f   :  { %v2981_v7 = vpop.permute.xlu0 %2980 }
0x1e70   :  { %v5469_v8 = vadd.f32 %v2981_v7, %v2966_v6 }
0x1e72   :  { %4383 = vtanh.f32 %v5469_v8 }
0x1e73   :  { %v2983_v10 = vpop.permute.xlu1 %2982 }
0x1e74   :  { %v5473_v12 = vadd.f32 %v2983_v10, %v2967_v9 }
0x1e76   :  { %4385 = vtanh.f32 %v5473_v12 }
0x1e77   :  { %4387 = vpow2.f32 %v3603_v15 }
0x1e78   :  { %4389 = vpow2.f32 %v3604_v22 }
0x1e7c   :  { %v4384_v13 = vpop.eup %4383 }
0x1e7d   :  { %2992 = vrot.lane.b32.xlu0 %v4384_v13, %s4521_s2 }
0x1e80   :  { %v4386_v16 = vpop.eup %4385  ;;  %v149_v19 = vpop.permute.xlu0 %148 }
0x1e81   :  { %vm191_vm12 = vcmp.eq.s32.totalorder %v4801_v51, %v149_v19  ;;  %2994 = vrot.lane.b32.xlu1 %v4386_v16, %s4521_s2  ;;  %v4388_v14 = vpop.eup %4387 }
0x1e82   :  { %3523 = vmatmul.mubr.msk.f32.gmra.mrb[52].mxu1 %vm191_vm12, %v4520_v61  ;;  %v2958_v18 = vadd.f32 1.0, %v4388_v14  ;;  %v4390_v25 = vpop.eup %4389 }
0x1e83   :  { %968 = vmatprep.mubr.f32.mxu1 %v4519_v5  ;;  %v2959_v17 = vadd.f32 1.0, %v4390_v25 }
0x1e84   :  { %v152_v11 = vpop.permute.xlu1 %151  ;;  %4391 = vrcp.f32 %v2958_v18 }
0x1e85   :  { %vm192_vm13 = vcmp.eq.s32.totalorder %v4801_v51, %v152_v11  ;;  %4393 = vrcp.f32 %v2959_v17 }
0x1e86   :  { %3524 = vmatmul.mubr.msk.f32.gmra.mrb[54].mxu1 %vm192_vm13, %v4520_v61 }
0x1e87   :  { %974 = vmatprep.mubr.f32.mxu1 %v4519_v5 }
0x1e8e   :  { %v4392_v21 = vpop.eup %4391 }
0x1e8f   :  { %v4394_v24 = vpop.eup %4393 }
0x1eef   :  { %v2993_v30 = vpop.permute.xlu0 %2992 }
0x1ef0   :  { %v2998_v20 = vmul.f32 %v4392_v21, %v2993_v30 }
0x1ef2   :  { %3605 = vmatmul.mubr.msk.f32.vlgmr.msra.gmra.mrb[52].mxu0 %vm1083_vm4, %v2998_v20 }
0x1ef3   :  { %v2995_v33 = vpop.permute.xlu1 %2994  ;;  %3081 = vmatprep.mubr.f32.mxu0 %v4519_v5  ;;  %3914 = vmatpush1.bf16.msra.mxu0 %v4776_v29 }
0x1ef4   :  { %v2999_v23 = vmul.f32 %v4394_v24, %v2995_v33  ;;  %3916 = vmatprep.subr.bf16.mxu0 %v4779_v34 }
0x1ef6   :  { %3606 = vmatmul.mubr.msk.f32.gmra.mrb[54].mxu0 %vm1083_vm4, %v2999_v23 }
0x1ef7   :  { %3918 = vmatpush1.bf16.msra.mxu0 %v4781_v35  ;;  %3223 = vmatprep.mubr.f32.mxu0 %v4519_v5 }
0x1ef8   :  { %3920 = vmatprep.subr.bf16.mxu0 %v4785_v38 }
0x1efb   :  { %3922 = vmatpush1.bf16.msra.mxu0 %v4787_v41 }
0x1efc   :  { %3924 = vmatprep.subr.bf16.mxu0 %v4791_v45 }
0x1eff   :  { %3926 = vmatpush1.bf16.msra.mxu0 %v4799_v50 }
0x1f00   :  { %3928 = vmatprep.subr.bf16.mxu0 %v4773_v26 }
0x1f55   :  { %v964_v28 = vpop.f32.mrb[52].mxu1 }
0x1f56   :  { %v966_v39 = vpop.f32.mrb[53].mxu1 }
0x1f59   :  { %v970_v27 = vpop.f32.mrb[54].mxu1 }
0x1f5a   :  { %v972_v32 = vpop.f32.mrb[55].mxu1 }
0x1fc5   :  { %v3077_v43 = vpop.f32.mrb[52].mxu0 }
0x1fc6   :  { %v3995_v31 = vadd.f32 %v3077_v43, %v964_v28  ;;  %v3079_v37 = vpop.f32.mrb[53].mxu0 }
0x1fc7   :  { %v3996_v47 = vadd.f32 %v3079_v37, %v966_v39 }
0x1fc8   :  { %v3607_v26 = vmul.f32 -1.442695, %v3995_v31 }
0x1fc9   :  { %4395 = vtanh.f32 %v3996_v47  ;;  %v3083_v36 = vpop.f32.mrb[54].mxu0 }
0x1fca   :  { %v3997_v42 = vadd.f32 %v3083_v36, %v970_v27  ;;  %v3085_v52 = vpop.f32.mrb[55].mxu0 }
0x1fcb   :  { %v3998_v40 = vadd.f32 %v3085_v52, %v972_v32 }
0x1fcc   :  { %v3608_v44 = vmul.f32 -1.442695, %v3997_v42 }
0x1fcd   :  { %4397 = vtanh.f32 %v3998_v40  ;;  %v3610_v16 = vmul.f32 -1.442695, %v3998_v40 }
0x1fce   :  { %4399 = vpow2.f32 %v3607_v26  ;;  %v67_v26 = vld [vmem:[%s5583_s0 + $0xf0] sm:$0xff] }
0x1fcf   :  { %4401 = vpow2.f32 %v3608_v44 }
0x1fd3   :  { %v4396_v46 = vpop.eup %4395 }
0x1fd4   :  { %3118 = vrot.lane.b32.xlu0 %v4396_v46, %s4521_s2 }
0x1fd7   :  { %v4398_v55 = vpop.eup %4397 }
0x1fd8   :  { %3120 = vrot.lane.b32.xlu1 %v4398_v55, %s4521_s2  ;;  %v4400_v49 = vpop.eup %4399 }
0x1fd9   :  { %v3094_v57 = vadd.f32 1.0, %v4400_v49  ;;  %v4402_v48 = vpop.eup %4401  ;;  %v68_v49 = vld [vmem:[%s5583_s0 + $0xf8] sm:$0xff]  ;;  %s4522_s0 = smov [#allocation6]  }
0x1fda   :  { %v3095_v54 = vadd.f32 1.0, %v4402_v48  ;;  %s3453_s17 = sshll.u32 %s4522_s0, 4  ;;  %s3454_s17 = int_to_ptr.vmem [resolvable:$true] %s3453_s17 }
0x1fdb   :  { %4403 = vrcp.f32 %v3094_v57  ;;  %p4494_p9 = scmp.lt.s32.totalorder %s3454_s17, %s3454_s17 }
0x1fdc   :  { %4405 = vrcp.f32 %v3095_v54 }
0x1fe5   :  { %v4404_v58 = vpop.eup %4403 }
0x1fe6   :  { %v4406_v59 = vpop.eup %4405  ;;  %v3114_v1 = vmul.f32 %v4404_v58, %v5469_v8 }
0x1fe7   :  { %v3115_v4 = vmul.f32 %v4406_v59, %v5473_v12  ;;  %v3609_v12 = vmul.f32 -1.442695, %v3996_v47 }
0x2046   :  { %v3119_v53 = vpop.permute.xlu0 %3118 }
0x2047   :  { %v3124_v56 = vmul.f32 %v4404_v58, %v3119_v53 }
0x2049   :  { %3128 = vrot.lane.b32.xlu0 %v3124_v56, %s4521_s2 }
0x204a   :  { %v3121_v60 = vpop.permute.xlu1 %3120 }
0x204b   :  { %v3125_v63 = vmul.f32 %v4406_v59, %v3121_v60 }
0x204d   :  { %154 = vperm.xlu0 %4081, %v65_v62   ;;  %3130 = vrot.lane.b32.xlu1 %v3125_v63, %s4521_s2 }
0x2051   :  { %157 = vperm.xlu1 %4082, %v66_v0  }
0x20bb   :  { %v3129_v2 = vpop.permute.xlu0 %3128 }
0x20bc   :  { %v5507_v3 = vadd.f32 %v3129_v2, %v3114_v1 }
0x20be   :  { %4407 = vtanh.f32 %v5507_v3 }
0x20bf   :  { %v3131_v6 = vpop.permute.xlu1 %3130 }
0x20c0   :  { %v5511_v7 = vadd.f32 %v3131_v6, %v3115_v4 }
0x20c2   :  { %4409 = vtanh.f32 %v5511_v7 }
0x20c3   :  { %4411 = vpow2.f32 %v3609_v12 }
0x20c4   :  { %4413 = vpow2.f32 %v3610_v16 }
0x20c8   :  { %v4408_v9 = vpop.eup %4407 }
0x20c9   :  { %3140 = vrot.lane.b32.xlu0 %v4408_v9, %s4521_s2 }
0x20cc   :  { %v4410_v10 = vpop.eup %4409  ;;  %v155_v13 = vpop.permute.xlu0 %154 }
0x20cd   :  { %vm193_vm14 = vcmp.eq.s32.totalorder %v4801_v51, %v155_v13  ;;  %3142 = vrot.lane.b32.xlu1 %v4410_v10, %s4521_s2  ;;  %v4412_v19 = vpop.eup %4411 }
0x20ce   :  { %3525 = vmatmul.mubr.msk.f32.gmra.mrb[56].mxu1 %vm193_vm14, %v4520_v61  ;;  %v3106_v11 = vadd.f32 1.0, %v4412_v19  ;;  %v4414_v15 = vpop.eup %4413 }
0x20cf   :  { %980 = vmatprep.mubr.f32.mxu1 %v4519_v5  ;;  %v3107_v22 = vadd.f32 1.0, %v4414_v15 }
0x20d0   :  { %v158_v8 = vpop.permute.xlu1 %157  ;;  %4415 = vrcp.f32 %v3106_v11 }
0x20d1   :  { %vm194_vm15 = vcmp.eq.s32.totalorder %v4801_v51, %v158_v8  ;;  %4417 = vrcp.f32 %v3107_v22 }
0x20d2   :  { %3526 = vmatmul.mubr.msk.f32.gmra.mrb[58].mxu1 %vm194_vm15, %v4520_v61 }
0x20d3   :  { %986 = vmatprep.mubr.f32.mxu1 %v4519_v5 }
0x20da   :  { %v4416_v14 = vpop.eup %4415 }
0x20db   :  { %v4418_v17 = vpop.eup %4417 }
0x213b   :  { %v3141_v18 = vpop.permute.xlu0 %3140 }
0x213c   :  { %v3146_v25 = vmul.f32 %v4416_v14, %v3141_v18 }
0x213e   :  { %3611 = vmatmul.mubr.msk.f32.vlgmr.msra.gmra.mrb[56].mxu0 %vm1083_vm4, %v3146_v25 }
0x213f   :  { %v3143_v21 = vpop.permute.xlu1 %3142  ;;  %3229 = vmatprep.mubr.f32.mxu0 %v4519_v5  ;;  %3930 = vmatpush1.bf16.msra.mxu0 %v4776_v29 }
0x2140   :  { %v3147_v30 = vmul.f32 %v4418_v17, %v3143_v21  ;;  %3932 = vmatprep.subr.bf16.mxu0 %v4779_v34 }
0x2142   :  { %3612 = vmatmul.mubr.msk.f32.gmra.mrb[58].mxu0 %vm1083_vm4, %v3147_v30 }
0x2143   :  { %3934 = vmatpush1.bf16.msra.mxu0 %v4781_v35  ;;  %3371 = vmatprep.mubr.f32.mxu0 %v4519_v5 }
0x2144   :  { %3936 = vmatprep.subr.bf16.mxu0 %v4785_v38 }
0x2147   :  { %3938 = vmatpush1.bf16.msra.mxu0 %v4787_v41 }
0x2148   :  { %3940 = vmatprep.subr.bf16.mxu0 %v4791_v45 }
0x214b   :  { %3942 = vmatpush1.bf16.msra.mxu0 %v4799_v50 }
0x21a1   :  { %v976_v20 = vpop.f32.mrb[56].mxu1 }
0x21a2   :  { %v978_v24 = vpop.f32.mrb[57].mxu1 }
0x21a5   :  { %v982_v29 = vpop.f32.mrb[58].mxu1 }
0x21a6   :  { %v984_v33 = vpop.f32.mrb[59].mxu1 }
0x2211   :  { %v3225_v23 = vpop.f32.mrb[56].mxu0 }
0x2212   :  { %v3999_v34 = vadd.f32 %v3225_v23, %v976_v20  ;;  %v3227_v28 = vpop.f32.mrb[57].mxu0 }
0x2213   :  { %v4000_v39 = vadd.f32 %v3227_v28, %v978_v24 }
0x2214   :  { %v3613_v45 = vmul.f32 -1.442695, %v3999_v34 }
0x2215   :  { %4419 = vtanh.f32 %v4000_v39  ;;  %v3231_v35 = vpop.f32.mrb[58].mxu0  ;;  %v3615_v0 = vmul.f32 -1.442695, %v4000_v39 }
0x2216   :  { %v4001_v27 = vadd.f32 %v3231_v35, %v982_v29  ;;  %v3233_v32 = vpop.f32.mrb[59].mxu0 }
0x2217   :  { %v4002_v43 = vadd.f32 %v3233_v32, %v984_v33 }
0x2218   :  { %v3614_v50 = vmul.f32 -1.442695, %v4001_v27 }
0x2219   :  { %4421 = vtanh.f32 %v4002_v43  ;;  %v3616_v1 = vmul.f32 -1.442695, %v4002_v43 }
0x221a   :  { %4423 = vpow2.f32 %v3613_v45 }
0x221b   :  { %4425 = vpow2.f32 %v3614_v50 }
0x221f   :  { %v4420_v38 = vpop.eup %4419 }
0x2220   :  { %3266 = vrot.lane.b32.xlu0 %v4420_v38, %s4521_s2 }
0x2223   :  { %v4422_v41 = vpop.eup %4421 }
0x2224   :  { %3268 = vrot.lane.b32.xlu1 %v4422_v41, %s4521_s2  ;;  %v4424_v31 = vpop.eup %4423 }
0x2225   :  { %v3242_v37 = vadd.f32 1.0, %v4424_v31  ;;  %v4426_v47 = vpop.eup %4425 }
0x2226   :  { %v3243_v36 = vadd.f32 1.0, %v4426_v47 }
0x2227   :  { %4427 = vrcp.f32 %v3242_v37 }
0x2228   :  { %4429 = vrcp.f32 %v3243_v36 }
0x2231   :  { %v4428_v42 = vpop.eup %4427 }
0x2232   :  { %v4430_v46 = vpop.eup %4429  ;;  %v3262_v57 = vmul.f32 %v4428_v42, %v5507_v3 }
0x2233   :  { %v3263_v58 = vmul.f32 %v4430_v46, %v5511_v7 }
0x2292   :  { %v3267_v52 = vpop.permute.xlu0 %3266 }
0x2293   :  { %v3272_v40 = vmul.f32 %v4428_v42, %v3267_v52 }
0x2295   :  { %3276 = vrot.lane.b32.xlu0 %v3272_v40, %s4521_s2 }
0x2296   :  { %v3269_v55 = vpop.permute.xlu1 %3268 }
0x2297   :  { %v3273_v44 = vmul.f32 %v4430_v46, %v3269_v55 }
0x2299   :  { %160 = vperm.xlu0 %4081, %v67_v26   ;;  %3278 = vrot.lane.b32.xlu1 %v3273_v44, %s4521_s2 }
0x229d   :  { %163 = vperm.xlu1 %4082, %v68_v49  }
0x2307   :  { %v3277_v48 = vpop.permute.xlu0 %3276 }
0x2308   :  { %v5544_v54 = vadd.f32 %v3277_v48, %v3262_v57 }
0x230a   :  { %4431 = vtanh.f32 %v5544_v54 }
0x230b   :  { %v3279_v53 = vpop.permute.xlu1 %3278 }
0x230c   :  { %v5548_v56 = vadd.f32 %v3279_v53, %v3263_v58 }
0x230e   :  { %4433 = vtanh.f32 %v5548_v56 }
0x230f   :  { %4435 = vpow2.f32 %v3615_v0 }
0x2310   :  { %4437 = vpow2.f32 %v3616_v1 }
0x2314   :  { %v4432_v59 = vpop.eup %4431 }
0x2315   :  { %3288 = vrot.lane.b32.xlu0 %v4432_v59, %s4521_s2 }
0x2318   :  { %v4434_v60 = vpop.eup %4433  ;;  %v161_v62 = vpop.permute.xlu0 %160 }
0x2319   :  { %vm195_vm0 = vcmp.eq.s32.totalorder %v4801_v51, %v161_v62  ;;  %3290 = vrot.lane.b32.xlu1 %v4434_v60, %s4521_s2  ;;  %v4436_v2 = vpop.eup %4435 }
0x231a   :  { %3527 = vmatmul.mubr.msk.f32.gmra.mrb[60].mxu1 %vm195_vm0, %v4520_v61  ;;  %v3254_v3 = vadd.f32 1.0, %v4436_v2  ;;  %v4438_v4 = vpop.eup %4437 }
0x231b   :  { %992 = vmatprep.mubr.f32.mxu1 %v4519_v5  ;;  %v3255_v6 = vadd.f32 1.0, %v4438_v4 }
0x231c   :  { %v164_v63 = vpop.permute.xlu1 %163  ;;  %4439 = vrcp.f32 %v3254_v3 }
0x231d   :  { %vm196_vm1 = vcmp.eq.s32.totalorder %v4801_v51, %v164_v63  ;;  %4441 = vrcp.f32 %v3255_v6 }
0x231e   :  { %3528 = vmatmul.mubr.msk.f32.gmra.mrb[62].mxu1 %vm196_vm1, %v4520_v61 }
0x2326   :  { %v4440_v7 = vpop.eup %4439 }
0x2327   :  { %v4442_v13 = vpop.eup %4441 }
0x2387   :  { %v3289_v9 = vpop.permute.xlu0 %3288 }
0x2388   :  { %v3294_v10 = vmul.f32 %v4440_v7, %v3289_v9 }
0x238a   :  { %3617 = vmatmul.mubr.msk.f32.vlgmr.msra.gmra.mrb[60].mxu0 %vm1083_vm4, %v3294_v10 }
0x238b   :  { %v3291_v8 = vpop.permute.xlu1 %3290  ;;  %3377 = vmatprep.mubr.f32.mxu0 %v4519_v5 }
0x238c   :  { %v3295_v51 = vmul.f32 %v4442_v13, %v3291_v8 }
0x238e   :  { %3618 = vmatmul.mubr.msk.f32.gmra.mrb[62].mxu0 %vm1083_vm4, %v3295_v51 }
0x23ed   :  { %v988_v61 = vpop.f32.mrb[60].mxu1 }
0x23ee   :  { %v990_v12 = vpop.f32.mrb[61].mxu1 }
0x23f1   :  { %v994_v16 = vpop.f32.mrb[62].mxu1 }
0x23f2   :  { %v996_v19 = vpop.f32.mrb[63].mxu1 }
0x245d   :  { %v3373_v11 = vpop.f32.mrb[60].mxu0 }
0x245e   :  { %v4003_v15 = vadd.f32 %v3373_v11, %v988_v61  ;;  %v3375_v22 = vpop.f32.mrb[61].mxu0 }
0x245f   :  { %v4004_v14 = vadd.f32 %v3375_v22, %v990_v12 }
0x2460   :  { %v3619_v20 = vmul.f32 -1.442695, %v4003_v15 }
0x2461   :  { %4443 = vtanh.f32 %v4004_v14  ;;  %v3379_v18 = vpop.f32.mrb[62].mxu0  ;;  %v3621_v42 = vmul.f32 -1.442695, %v4004_v14 }
0x2462   :  { %v4005_v25 = vadd.f32 %v3379_v18, %v994_v16  ;;  %v3381_v17 = vpop.f32.mrb[63].mxu0 }
0x2463   :  { %v4006_v21 = vadd.f32 %v3381_v17, %v996_v19 }
0x2464   :  { %v3620_v24 = vmul.f32 -1.442695, %v4005_v25 }
0x2465   :  { %4445 = vtanh.f32 %v4006_v21  ;;  %v3622_v52 = vmul.f32 -1.442695, %v4006_v21 }
0x2466   :  { %4447 = vpow2.f32 %v3619_v20 }
0x2467   :  { %4449 = vpow2.f32 %v3620_v24 }
0x246b   :  { %v4444_v30 = vpop.eup %4443 }
0x246c   :  { %3414 = vrot.lane.b32.xlu0 %v4444_v30, %s4521_s2 }
0x246f   :  { %v4446_v5 = vpop.eup %4445 }
0x2470   :  { %3416 = vrot.lane.b32.xlu1 %v4446_v5, %s4521_s2  ;;  %v4448_v29 = vpop.eup %4447 }
0x2471   :  { %v3390_v33 = vadd.f32 1.0, %v4448_v29  ;;  %v4450_v23 = vpop.eup %4449 }
0x2472   :  { %v3391_v34 = vadd.f32 1.0, %v4450_v23 }
0x2473   :  { %4451 = vrcp.f32 %v3390_v33 }
0x2474   :  { %4453 = vrcp.f32 %v3391_v34 }
0x247d   :  { %v4452_v28 = vpop.eup %4451 }
0x247e   :  { %v4454_v27 = vpop.eup %4453  ;;  %v3410_v38 = vmul.f32 %v4452_v28, %v5544_v54 }
0x247f   :  { %v3411_v50 = vmul.f32 %v4454_v27, %v5548_v56 }
0x24de   :  { %v3415_v39 = vpop.permute.xlu0 %3414 }
0x24df   :  { %v3420_v35 = vmul.f32 %v4452_v28, %v3415_v39 }
0x24e1   :  { %3424 = vrot.lane.b32.xlu0 %v3420_v35, %s4521_s2 }
0x24e2   :  { %v3417_v32 = vpop.permute.xlu1 %3416 }
0x24e3   :  { %v3421_v43 = vmul.f32 %v4454_v27, %v3417_v32 }
0x24e5   :  { %3426 = vrot.lane.b32.xlu1 %v3421_v43, %s4521_s2 }
0x2553   :  { %v3425_v41 = vpop.permute.xlu0 %3424 }
0x2554   :  { %v3430_v45 = vadd.f32 %v3425_v41, %v3410_v38 }
0x2556   :  { %4455 = vtanh.f32 %v3430_v45 }
0x2557   :  { %v3427_v31 = vpop.permute.xlu1 %3426 }
0x2558   :  { %v3431_v37 = vadd.f32 %v3427_v31, %v3411_v50 }
0x255a   :  { %4457 = vtanh.f32 %v3431_v37 }
0x255b   :  { %4459 = vpow2.f32 %v3621_v42 }
0x255c   :  { %4461 = vpow2.f32 %v3622_v52 }
0x2560   :  { %v4456_v47 = vpop.eup %4455 }
0x2561   :  { %3436 = vrot.lane.b32.xlu0 %v4456_v47, %s4521_s2 }
0x2564   :  { %v4458_v36 = vpop.eup %4457 }
0x2565   :  { %3438 = vrot.lane.b32.xlu1 %v4458_v36, %s4521_s2  ;;  %v4460_v40 = vpop.eup %4459  ;;  %s4489_s2 = scalar_lea.vmem %s3454_s17, 256 }
0x2566   :  { %v3402_v46 = vadd.f32 1.0, %v4460_v40  ;;  %v4462_v55 = vpop.eup %4461  ;;  %p4490_p8 = scmp.ne.s32.totalorder %s3454_s17, %s4489_s2  ;;  %p4495_p10 = scmp.lt.s32.totalorder %s4489_s2, %s4489_s2 }
0x2567   :  { %v3403_v26 = vadd.f32 1.0, %v4462_v55 }
0x2568   :  { %4463 = vrcp.f32 %v3402_v46  ;;  %p4496_p11 = por %p4495_p10, %p4494_p9 }
0x2569   :  { %4465 = vrcp.f32 %v3403_v26 }
0x256a   :  { %p4497_p12 = pnand %p4496_p11, %p4490_p8 }
0x2572   :  { %v4464_v44 = vpop.eup %4463 }
0x2573   :  { %v4466_v54 = vpop.eup %4465 }
0x25d3   :  { %v3437_v49 = vpop.permute.xlu0 %3436 }
0x25d4   :  { %v3442_v57 = vmul.f32 %v4464_v44, %v3437_v49 }
0x25d6   :  { %v3444_v48 = vsel %vm1083_vm4, %v3442_v57, 0.0 }
0x25d7   :  { %3446 = vst [vmem:[#allocation6] sm:$0xff] %v3444_v48  ;;  %v3439_v58 = vpop.permute.xlu1 %3438 }
0x25d8   :  { %v3443_v53 = vmul.f32 %v4466_v54, %v3439_v58 }
0x25da   :  { %v3445_v56 = vsel %vm1083_vm4, %v3443_v53, 0.0 }
0x25db   :  { %3447 = vst [vmem:[#allocation6 + $0x8] sm:$0xff] %v3445_v56 }
0x25dc   :  { %4500 = shalt.err (!%p4497_p12)
}
0x25dd   :  { %s4501_s20 = scalar_lea.hbm %s5588_s5, 256 }
0x25de   :  { %p4502_p13 = scmp.ne.s32.totalorder %s5588_s5, %s4501_s20  ;;  %p4505_p0 = scmp.lt.u32.totalorder %s4501_s20, %s5588_s5 }
0x25e0   :  { %p4507_p1 = pnand %p4505_p0, %p4502_p13 }
0x25e2   :  { %4510 = shalt.err (!%p4507_p1)
}
0x25e3   :  { %s4523_s25 = smov 128   ;;  %s4524_s26 = smov 8  }
0x25e4   :  { %3459 = dma.vmem_to_hbm [thread:$0]  %s3454_s17, 256, %s5588_s5, [#allocation5], %s4523_s25, %s4523_s25, %s4524_s26  }
0x25e5   :  { %4513 = dma.done.wait [#allocation5], 256  }
0x25e6   :  { %4514 = vsyncadd [#allocation5], 4294967040 }
0x25e7   :  { %3463 = vsyncpa [#allocation4], 1 }
0x25e8   :  { %3464 = vsyncpa [#allocation5], 1 }

</bundles_post_ra>
